<compile_context>
chip_gen: v5e
topology: v5e:2x2
jax: 0.10.0
libtpu: 0.0.40
codegen_flags: <defaults>
</compile_context>

<pallas_src>
import jax
import jax.numpy as jnp
from jax import lax
from jax.experimental import pallas as pl
from jax.experimental.pallas import tpu as pltpu

# Static LeNet geometry (32x32 input).
KSZ = 5                   # conv kernel size
IW1 = 32                  # conv1 input width (= row stride of flat layout)
L1 = 28 * IW1             # conv1 output slab length (28 rows x 32 stored cols)
XPAD = 9 * 128            # padded flat input spatial (>= 4*32 + 4 + L1 = 1028)
IW2 = 14                  # conv2 input width (pooled1 grid is 14x14)
P1PAD = 256               # padded pooled1 spatial (>= 4*14 + 4 + L2 = 200)
L2 = 10 * IW2             # conv2 output slab length (10 rows x 14 stored cols)
NPOOL2 = 25               # 5x5 pooled2 positions per channel


# ---------------------------------------------------------------------------
# Fused kernel: whole forward pass for one image per grid step.
# ---------------------------------------------------------------------------
def _lenet_kernel(x_ref, w1c_ref, b1_ref, p1_ref, w2c_ref, b2_ref, p2_ref,
                  wf1_ref, bf1_ref, wf2_ref, bf2_ref, wf3_ref, bf3_ref,
                  out_ref):
    f32, bf16 = jnp.float32, jnp.bfloat16

    # conv1: 25 accumulated (8,8)@(8,L1) matmuls over shifted lane slices.
    a1 = x_ref[0].astype(bf16)                              # (8, XPAD)
    acc1 = jnp.zeros((8, L1), f32)
    for ki in range(KSZ):
        for kj in range(KSZ):
            off = ki * IW1 + kj
            acc1 += jnp.dot(w1c_ref[ki * KSZ + kj], a1[:, off:off + L1],
                            preferred_element_type=f32)
    acc1 += b1_ref[...]                                     # (8,1) lane-broadcast bias

    # pool1 (2x2 avg, stride 2) + sigmoid as one constant matmul.
    pooled1 = jax.nn.sigmoid(
        jnp.dot(acc1.astype(bf16), p1_ref[...], preferred_element_type=f32))
    a2 = pooled1.astype(bf16)                               # (8, P1PAD); 6 x 14x14 valid

    # conv2: same shifted-slab scheme, (16,8)@(8,L2) x 25.
    acc2 = jnp.zeros((16, L2), f32)
    for ki in range(KSZ):
        for kj in range(KSZ):
            off = ki * IW2 + kj
            acc2 += jnp.dot(w2c_ref[ki * KSZ + kj], a2[:, off:off + L2],
                            preferred_element_type=f32)
    acc2 += b2_ref[...]                                     # (16,1) bias

    # pool2 + sigmoid -> (16, 25): channels on sublanes, 5x5 row-major on lanes.
    pooled2 = jax.nn.sigmoid(
        jnp.dot(acc2.astype(bf16), p2_ref[...], preferred_element_type=f32))
    feat = pooled2.astype(bf16)

    # fc1: contract over (channel, 5x5) as 16 accumulated (1,25)@(25,128) dots.
    h = jnp.zeros((1, 128), f32)
    for c in range(16):
        h += jnp.dot(feat[c:c + 1, :], wf1_ref[c], preferred_element_type=f32)
    h1 = jax.nn.sigmoid(h + bf1_ref[...])                   # (1,128), 120 valid

    # fc2, fc3 (lane-padded to 128; padding rows of the weights are zero).
    h2 = jax.nn.sigmoid(
        jnp.dot(h1.astype(bf16), wf2_ref[...], preferred_element_type=f32)
        + bf2_ref[...])                                     # (1,128), 84 valid
    logits = (jnp.dot(h2.astype(bf16), wf3_ref[...], preferred_element_type=f32)
              + bf3_ref[...])                               # (1,128), first 10 valid
    out_ref[0] = logits


# ---------------------------------------------------------------------------
# Parameters: raw PyTorch-layout init + one-time packing into kernel layout.
# ---------------------------------------------------------------------------
def init_lenet_params(key):
    ks = jax.random.split(key, 10)
    return {
        "conv1_w": 0.1 * jax.random.normal(ks[0], (6, 1, 5, 5), jnp.float32),
        "conv1_b": 0.1 * jax.random.normal(ks[1], (6,), jnp.float32),
        "conv2_w": 0.1 * jax.random.normal(ks[2], (16, 6, 5, 5), jnp.float32),
        "conv2_b": 0.1 * jax.random.normal(ks[3], (16,), jnp.float32),
        "fc1_w": 0.05 * jax.random.normal(ks[4], (120, 400), jnp.float32),
        "fc1_b": 0.05 * jax.random.normal(ks[5], (120,), jnp.float32),
        "fc2_w": 0.05 * jax.random.normal(ks[6], (84, 120), jnp.float32),
        "fc2_b": 0.05 * jax.random.normal(ks[7], (84,), jnp.float32),
        "fc3_w": 0.05 * jax.random.normal(ks[8], (10, 84), jnp.float32),
        "fc3_b": 0.05 * jax.random.normal(ks[9], (10,), jnp.float32),
    }


def _pool_matrix(oh, stored_w, ow, out_cols, dtype):
    """(oh*stored_w, out_cols): right-multiplying a (C, oh*stored_w) activation
    performs 2x2/stride-2 average pooling of the row-major (oh, stored_w) grid
    whose valid width is ow, dropping junk columns and zero-padding the rest."""
    ph, pw = oh // 2, ow // 2
    p = jnp.arange(oh * stored_w)
    src_h, src_w = p // stored_w, p % stored_w
    q = jnp.arange(out_cols)
    dst_h, dst_w = q // pw, q % pw
    hit = ((src_h[:, None] // 2) == dst_h[None, :]) \
        & ((src_w[:, None] // 2) == dst_w[None, :]) \
        & (src_w[:, None] < ow) & (q[None, :] < ph * pw)
    return jnp.where(hit, 0.25, 0.0).astype(dtype)


def pack_params(raw):
    """Pre-transpose / zero-pad / bf16-cast everything once, off the hot path."""
    f32, bf16 = jnp.float32, jnp.bfloat16
    # conv weights -> (25, Cout_pad, Cin_pad): one (Cout, Cin) matrix per tap.
    w1 = jnp.transpose(raw["conv1_w"], (2, 3, 0, 1)).reshape(25, 6, 1)
    w1c = jnp.zeros((25, 8, 8), f32).at[:, :6, :1].set(w1).astype(bf16)
    w2 = jnp.transpose(raw["conv2_w"], (2, 3, 0, 1)).reshape(25, 16, 6)
    w2c = jnp.zeros((25, 16, 8), f32).at[:, :, :6].set(w2).astype(bf16)
    b1 = jnp.zeros((8, 1), f32).at[:6, 0].set(raw["conv1_b"])
    b2 = raw["conv2_b"].reshape(16, 1).astype(f32)
    # constant avg-pool matrices.
    p1 = _pool_matrix(28, IW1, 28, P1PAD, bf16)             # (896, 256)
    p2 = _pool_matrix(10, IW2, 10, NPOOL2, bf16)            # (140, 25)
    # fc1 regrouped to the kernel's (channel, 5x5) feature layout; this is
    # exactly PyTorch's NCHW .view(-1, 400) column ordering.
    wf1 = jnp.transpose(raw["fc1_w"].reshape(120, 16, 25), (1, 2, 0))
    wf1 = jnp.zeros((16, 25, 128), f32).at[:, :, :120].set(wf1).astype(bf16)
    bf1 = jnp.zeros((1, 128), f32).at[0, :120].set(raw["fc1_b"])
    wf2 = jnp.zeros((128, 128), f32).at[:120, :84].set(raw["fc2_w"].T).astype(bf16)
    bf2 = jnp.zeros((1, 128), f32).at[0, :84].set(raw["fc2_b"])
    wf3 = jnp.zeros((128, 128), f32).at[:84, :10].set(raw["fc3_w"].T).astype(bf16)
    bf3 = jnp.zeros((1, 128), f32).at[0, :10].set(raw["fc3_b"])
    return dict(w1c=w1c, b1=b1, p1=p1, w2c=w2c, b2=b2, p2=p2,
                wf1=wf1, bf1=bf1, wf2=wf2, bf2=bf2, wf3=wf3, bf3=bf3)


_PARAM_ORDER = ("w1c", "b1", "p1", "w2c", "b2", "p2",
                "wf1", "bf1", "wf2", "bf2", "wf3", "bf3")


# ---------------------------------------------------------------------------
# Forward pass wrapper (one pallas_call).
# ---------------------------------------------------------------------------
def lenet_forward(packed, x):
    """x: (B, 1, 32, 32) float32 -> logits (B, 10) float32."""
    B = x.shape[0]
    # Flatten spatial row-major; zero-pad channels->8 sublanes and lanes->XPAD
    # so every in-kernel shifted slab stays in bounds.
    xp = jnp.pad(x.reshape(B, 1, 32 * 32), ((0, 0), (0, 7), (0, XPAD - 1024)))

    consts = [packed[n] for n in _PARAM_ORDER]

    def _full(a):
        return pl.BlockSpec(a.shape, lambda b, nd=a.ndim: (0,) * nd)

    out = pl.pallas_call(
        _lenet_kernel,
        out_shape=jax.ShapeDtypeStruct((B, 1, 128), jnp.float32),
        grid_spec=pltpu.PrefetchScalarGridSpec(
            num_scalar_prefetch=0,
            grid=(B,),
            in_specs=[pl.BlockSpec((1, 8, XPAD), lambda b: (b, 0, 0))]
                     + [_full(a) for a in consts],
            out_specs=pl.BlockSpec((1, 1, 128), lambda b: (b, 0, 0)),
        ),
        compiler_params=pltpu.CompilerParams(
            dimension_semantics=("parallel",)),
    )(xp, *consts)
    return out.reshape(B, 128)[:, :10]


# ---------------------------------------------------------------------------
# Pure-JAX f32 reference (for a loose numerical check).
# ---------------------------------------------------------------------------
def _avgpool2_ref(y):
    b, c, h, w = y.shape
    return y.reshape(b, c, h // 2, 2, w // 2, 2).mean(axis=(3, 5))


def lenet_reference(raw, x):
    dn = ("NCHW", "OIHW", "NCHW")
    y = lax.conv_general_dilated(x, raw["conv1_w"], (1, 1), "VALID",
                                 dimension_numbers=dn)
    y = jax.nn.sigmoid(_avgpool2_ref(y + raw["conv1_b"][None, :, None, None]))
    y = lax.conv_general_dilated(y, raw["conv2_w"], (1, 1), "VALID",
                                 dimension_numbers=dn)
    y = jax.nn.sigmoid(_avgpool2_ref(y + raw["conv2_b"][None, :, None, None]))
    f = y.reshape(y.shape[0], 400)
    h1 = jax.nn.sigmoid(f @ raw["fc1_w"].T + raw["fc1_b"])
    h2 = jax.nn.sigmoid(h1 @ raw["fc2_w"].T + raw["fc2_b"])
    return h2 @ raw["fc3_w"].T + raw["fc3_b"]


if __name__ == "__main__":
    key = jax.random.PRNGKey(0)
    pkey, xkey = jax.random.split(key)
    raw = init_lenet_params(pkey)
    packed = pack_params(raw)

    # LeNet's 16*5*5 flatten implies 32x32 inputs; keep the batch small.
    x = jax.random.normal(xkey, (2, 1, 32, 32), jnp.float32)

    out = jax.jit(lenet_forward)(packed, x)
    out = jax.block_until_ready(out)

    assert out.shape == (2, 10), out.shape
    assert out.dtype == jnp.float32
    assert bool(jnp.all(jnp.isfinite(out)))

    # Loose check against the f32 reference (kernel matmuls run in bf16).
    ref = lenet_reference(raw, x)
    err = float(jnp.max(jnp.abs(out - ref)))
    assert err < 5e-2, f"max |pallas - reference| = {err}"

    print("KERNEL_OK")
</pallas_src>

<mosaic_0001>
module attributes {stable_mosaic.version = 11 : i64} {
  func.func @_lenet_kernel(%arg0: i32, %arg1: memref<1x8x1152xf32, #tpu.memory_space<vmem>>, %arg2: memref<25x8x8xbf16, #tpu.memory_space<vmem>>, %arg3: memref<8x1xf32, #tpu.memory_space<vmem>>, %arg4: memref<896x256xbf16, #tpu.memory_space<vmem>>, %arg5: memref<25x16x8xbf16, #tpu.memory_space<vmem>>, %arg6: memref<16x1xf32, #tpu.memory_space<vmem>>, %arg7: memref<140x25xbf16, #tpu.memory_space<vmem>>, %arg8: memref<16x25x128xbf16, #tpu.memory_space<vmem>>, %arg9: memref<1x128xf32, #tpu.memory_space<vmem>>, %arg10: memref<128x128xbf16, #tpu.memory_space<vmem>>, %arg11: memref<1x128xf32, #tpu.memory_space<vmem>>, %arg12: memref<128x128xbf16, #tpu.memory_space<vmem>>, %arg13: memref<1x128xf32, #tpu.memory_space<vmem>>, %arg14: memref<1x1x128xf32, #tpu.memory_space<vmem>>) attributes {dimension_semantics = [#tpu.dimension_semantics<parallel>], iteration_bounds = array<i64: 2>, scalar_prefetch = 0 : i64, scratch_operands = 0 : i64, tpu.core_type = #tpu.core_type<tc>, window_params = [{transform_indices = @transform_0, window_bounds = array<i64: 1, 8, 1152>}, {pipeline_mode = #tpu.pipeline_mode<synchronous>, transform_indices = @transform_1, window_bounds = array<i64: 25, 8, 8>}, {pipeline_mode = #tpu.pipeline_mode<synchronous>, transform_indices = @transform_2, window_bounds = array<i64: 8, 1>}, {pipeline_mode = #tpu.pipeline_mode<synchronous>, transform_indices = @transform_3, window_bounds = array<i64: 896, 256>}, {pipeline_mode = #tpu.pipeline_mode<synchronous>, transform_indices = @transform_4, window_bounds = array<i64: 25, 16, 8>}, {pipeline_mode = #tpu.pipeline_mode<synchronous>, transform_indices = @transform_5, window_bounds = array<i64: 16, 1>}, {pipeline_mode = #tpu.pipeline_mode<synchronous>, transform_indices = @transform_6, window_bounds = array<i64: 140, 25>}, {pipeline_mode = #tpu.pipeline_mode<synchronous>, transform_indices = @transform_7, window_bounds = array<i64: 16, 25, 128>}, {pipeline_mode = #tpu.pipeline_mode<synchronous>, transform_indices = @transform_8, window_bounds = array<i64: 1, 128>}, {pipeline_mode = #tpu.pipeline_mode<synchronous>, transform_indices = @transform_9, window_bounds = array<i64: 128, 128>}, {pipeline_mode = #tpu.pipeline_mode<synchronous>, transform_indices = @transform_10, window_bounds = array<i64: 1, 128>}, {pipeline_mode = #tpu.pipeline_mode<synchronous>, transform_indices = @transform_11, window_bounds = array<i64: 128, 128>}, {pipeline_mode = #tpu.pipeline_mode<synchronous>, transform_indices = @transform_12, window_bounds = array<i64: 1, 128>}, {transform_indices = @transform_13, window_bounds = array<i64: 1, 1, 128>}]} {
    %c0 = arith.constant 0 : index
    %c0_0 = arith.constant 0 : index
    %c0_1 = arith.constant 0 : index
    %0 = vector.load %arg1[%c0, %c0_0, %c0_1] : memref<1x8x1152xf32, #tpu.memory_space<vmem>>, vector<1x8x1152xf32>
    %1 = vector.shape_cast %0 : vector<1x8x1152xf32> to vector<8x1152xf32>
    %2 = arith.truncf %1 : vector<8x1152xf32> to vector<8x1152xbf16>
    %cst = arith.constant 0.000000e+00 : f32
    %3 = vector.broadcast %cst : f32 to vector<8x896xf32>
    %c0_2 = arith.constant 0 : index
    %c0_3 = arith.constant 0 : index
    %c0_4 = arith.constant 0 : index
    %4 = vector.load %arg2[%c0_2, %c0_3, %c0_4] : memref<25x8x8xbf16, #tpu.memory_space<vmem>>, vector<1x8x8xbf16>
    %5 = vector.shape_cast %4 : vector<1x8x8xbf16> to vector<8x8xbf16>
    %6 = vector.extract_strided_slice %2 {offsets = [0, 0], sizes = [8, 896], strides = [1, 1]} : vector<8x1152xbf16> to vector<8x896xbf16>
    %cst_5 = arith.constant dense<0.000000e+00> : vector<8x896xf32>
    %7 = tpu.matmul %5, %6, %cst_5 {dimension_numbers = #tpu.dot_dimension_numbers<[1], [0], [0], [1], [0, 0, 1, 1], [], []>} : vector<8x8xbf16>, vector<8x896xbf16>, vector<8x896xf32> -> vector<8x896xf32>
    %8 = arith.addf %3, %7 : vector<8x896xf32>
    %c1 = arith.constant 1 : index
    %c0_6 = arith.constant 0 : index
    %c0_7 = arith.constant 0 : index
    %9 = vector.load %arg2[%c1, %c0_6, %c0_7] : memref<25x8x8xbf16, #tpu.memory_space<vmem>>, vector<1x8x8xbf16>
    %10 = vector.shape_cast %9 : vector<1x8x8xbf16> to vector<8x8xbf16>
    %11 = vector.extract_strided_slice %2 {offsets = [0, 1], sizes = [8, 896], strides = [1, 1]} : vector<8x1152xbf16> to vector<8x896xbf16>
    %cst_8 = arith.constant dense<0.000000e+00> : vector<8x896xf32>
    %12 = tpu.matmul %10, %11, %cst_8 {dimension_numbers = #tpu.dot_dimension_numbers<[1], [0], [0], [1], [0, 0, 1, 1], [], []>} : vector<8x8xbf16>, vector<8x896xbf16>, vector<8x896xf32> -> vector<8x896xf32>
    %13 = arith.addf %8, %12 : vector<8x896xf32>
    %c2 = arith.constant 2 : index
    %c0_9 = arith.constant 0 : index
    %c0_10 = arith.constant 0 : index
    %14 = vector.load %arg2[%c2, %c0_9, %c0_10] : memref<25x8x8xbf16, #tpu.memory_space<vmem>>, vector<1x8x8xbf16>
    %15 = vector.shape_cast %14 : vector<1x8x8xbf16> to vector<8x8xbf16>
    %16 = vector.extract_strided_slice %2 {offsets = [0, 2], sizes = [8, 896], strides = [1, 1]} : vector<8x1152xbf16> to vector<8x896xbf16>
    %cst_11 = arith.constant dense<0.000000e+00> : vector<8x896xf32>
    %17 = tpu.matmul %15, %16, %cst_11 {dimension_numbers = #tpu.dot_dimension_numbers<[1], [0], [0], [1], [0, 0, 1, 1], [], []>} : vector<8x8xbf16>, vector<8x896xbf16>, vector<8x896xf32> -> vector<8x896xf32>
    %18 = arith.addf %13, %17 : vector<8x896xf32>
    %c3 = arith.constant 3 : index
    %c0_12 = arith.constant 0 : index
    %c0_13 = arith.constant 0 : index
    %19 = vector.load %arg2[%c3, %c0_12, %c0_13] : memref<25x8x8xbf16, #tpu.memory_space<vmem>>, vector<1x8x8xbf16>
    %20 = vector.shape_cast %19 : vector<1x8x8xbf16> to vector<8x8xbf16>
    %21 = vector.extract_strided_slice %2 {offsets = [0, 3], sizes = [8, 896], strides = [1, 1]} : vector<8x1152xbf16> to vector<8x896xbf16>
    %cst_14 = arith.constant dense<0.000000e+00> : vector<8x896xf32>
    %22 = tpu.matmul %20, %21, %cst_14 {dimension_numbers = #tpu.dot_dimension_numbers<[1], [0], [0], [1], [0, 0, 1, 1], [], []>} : vector<8x8xbf16>, vector<8x896xbf16>, vector<8x896xf32> -> vector<8x896xf32>
    %23 = arith.addf %18, %22 : vector<8x896xf32>
    %c4 = arith.constant 4 : index
    %c0_15 = arith.constant 0 : index
    %c0_16 = arith.constant 0 : index
    %24 = vector.load %arg2[%c4, %c0_15, %c0_16] : memref<25x8x8xbf16, #tpu.memory_space<vmem>>, vector<1x8x8xbf16>
    %25 = vector.shape_cast %24 : vector<1x8x8xbf16> to vector<8x8xbf16>
    %26 = vector.extract_strided_slice %2 {offsets = [0, 4], sizes = [8, 896], strides = [1, 1]} : vector<8x1152xbf16> to vector<8x896xbf16>
    %cst_17 = arith.constant dense<0.000000e+00> : vector<8x896xf32>
    %27 = tpu.matmul %25, %26, %cst_17 {dimension_numbers = #tpu.dot_dimension_numbers<[1], [0], [0], [1], [0, 0, 1, 1], [], []>} : vector<8x8xbf16>, vector<8x896xbf16>, vector<8x896xf32> -> vector<8x896xf32>
    %28 = arith.addf %23, %27 : vector<8x896xf32>
    %c5 = arith.constant 5 : index
    %c0_18 = arith.constant 0 : index
    %c0_19 = arith.constant 0 : index
    %29 = vector.load %arg2[%c5, %c0_18, %c0_19] : memref<25x8x8xbf16, #tpu.memory_space<vmem>>, vector<1x8x8xbf16>
    %30 = vector.shape_cast %29 : vector<1x8x8xbf16> to vector<8x8xbf16>
    %31 = vector.extract_strided_slice %2 {offsets = [0, 32], sizes = [8, 896], strides = [1, 1]} : vector<8x1152xbf16> to vector<8x896xbf16>
    %cst_20 = arith.constant dense<0.000000e+00> : vector<8x896xf32>
    %32 = tpu.matmul %30, %31, %cst_20 {dimension_numbers = #tpu.dot_dimension_numbers<[1], [0], [0], [1], [0, 0, 1, 1], [], []>} : vector<8x8xbf16>, vector<8x896xbf16>, vector<8x896xf32> -> vector<8x896xf32>
    %33 = arith.addf %28, %32 : vector<8x896xf32>
    %c6 = arith.constant 6 : index
    %c0_21 = arith.constant 0 : index
    %c0_22 = arith.constant 0 : index
    %34 = vector.load %arg2[%c6, %c0_21, %c0_22] : memref<25x8x8xbf16, #tpu.memory_space<vmem>>, vector<1x8x8xbf16>
    %35 = vector.shape_cast %34 : vector<1x8x8xbf16> to vector<8x8xbf16>
    %36 = vector.extract_strided_slice %2 {offsets = [0, 33], sizes = [8, 896], strides = [1, 1]} : vector<8x1152xbf16> to vector<8x896xbf16>
    %cst_23 = arith.constant dense<0.000000e+00> : vector<8x896xf32>
    %37 = tpu.matmul %35, %36, %cst_23 {dimension_numbers = #tpu.dot_dimension_numbers<[1], [0], [0], [1], [0, 0, 1, 1], [], []>} : vector<8x8xbf16>, vector<8x896xbf16>, vector<8x896xf32> -> vector<8x896xf32>
    %38 = arith.addf %33, %37 : vector<8x896xf32>
    %c7 = arith.constant 7 : index
    %c0_24 = arith.constant 0 : index
    %c0_25 = arith.constant 0 : index
    %39 = vector.load %arg2[%c7, %c0_24, %c0_25] : memref<25x8x8xbf16, #tpu.memory_space<vmem>>, vector<1x8x8xbf16>
    %40 = vector.shape_cast %39 : vector<1x8x8xbf16> to vector<8x8xbf16>
    %41 = vector.extract_strided_slice %2 {offsets = [0, 34], sizes = [8, 896], strides = [1, 1]} : vector<8x1152xbf16> to vector<8x896xbf16>
    %cst_26 = arith.constant dense<0.000000e+00> : vector<8x896xf32>
    %42 = tpu.matmul %40, %41, %cst_26 {dimension_numbers = #tpu.dot_dimension_numbers<[1], [0], [0], [1], [0, 0, 1, 1], [], []>} : vector<8x8xbf16>, vector<8x896xbf16>, vector<8x896xf32> -> vector<8x896xf32>
    %43 = arith.addf %38, %42 : vector<8x896xf32>
    %c8 = arith.constant 8 : index
    %c0_27 = arith.constant 0 : index
    %c0_28 = arith.constant 0 : index
    %44 = vector.load %arg2[%c8, %c0_27, %c0_28] : memref<25x8x8xbf16, #tpu.memory_space<vmem>>, vector<1x8x8xbf16>
    %45 = vector.shape_cast %44 : vector<1x8x8xbf16> to vector<8x8xbf16>
    %46 = vector.extract_strided_slice %2 {offsets = [0, 35], sizes = [8, 896], strides = [1, 1]} : vector<8x1152xbf16> to vector<8x896xbf16>
    %cst_29 = arith.constant dense<0.000000e+00> : vector<8x896xf32>
    %47 = tpu.matmul %45, %46, %cst_29 {dimension_numbers = #tpu.dot_dimension_numbers<[1], [0], [0], [1], [0, 0, 1, 1], [], []>} : vector<8x8xbf16>, vector<8x896xbf16>, vector<8x896xf32> -> vector<8x896xf32>
    %48 = arith.addf %43, %47 : vector<8x896xf32>
    %c9 = arith.constant 9 : index
    %c0_30 = arith.constant 0 : index
    %c0_31 = arith.constant 0 : index
    %49 = vector.load %arg2[%c9, %c0_30, %c0_31] : memref<25x8x8xbf16, #tpu.memory_space<vmem>>, vector<1x8x8xbf16>
    %50 = vector.shape_cast %49 : vector<1x8x8xbf16> to vector<8x8xbf16>
    %51 = vector.extract_strided_slice %2 {offsets = [0, 36], sizes = [8, 896], strides = [1, 1]} : vector<8x1152xbf16> to vector<8x896xbf16>
    %cst_32 = arith.constant dense<0.000000e+00> : vector<8x896xf32>
    %52 = tpu.matmul %50, %51, %cst_32 {dimension_numbers = #tpu.dot_dimension_numbers<[1], [0], [0], [1], [0, 0, 1, 1], [], []>} : vector<8x8xbf16>, vector<8x896xbf16>, vector<8x896xf32> -> vector<8x896xf32>
    %53 = arith.addf %48, %52 : vector<8x896xf32>
    %c10 = arith.constant 10 : index
    %c0_33 = arith.constant 0 : index
    %c0_34 = arith.constant 0 : index
    %54 = vector.load %arg2[%c10, %c0_33, %c0_34] : memref<25x8x8xbf16, #tpu.memory_space<vmem>>, vector<1x8x8xbf16>
    %55 = vector.shape_cast %54 : vector<1x8x8xbf16> to vector<8x8xbf16>
    %56 = vector.extract_strided_slice %2 {offsets = [0, 64], sizes = [8, 896], strides = [1, 1]} : vector<8x1152xbf16> to vector<8x896xbf16>
    %cst_35 = arith.constant dense<0.000000e+00> : vector<8x896xf32>
    %57 = tpu.matmul %55, %56, %cst_35 {dimension_numbers = #tpu.dot_dimension_numbers<[1], [0], [0], [1], [0, 0, 1, 1], [], []>} : vector<8x8xbf16>, vector<8x896xbf16>, vector<8x896xf32> -> vector<8x896xf32>
    %58 = arith.addf %53, %57 : vector<8x896xf32>
    %c11 = arith.constant 11 : index
    %c0_36 = arith.constant 0 : index
    %c0_37 = arith.constant 0 : index
    %59 = vector.load %arg2[%c11, %c0_36, %c0_37] : memref<25x8x8xbf16, #tpu.memory_space<vmem>>, vector<1x8x8xbf16>
    %60 = vector.shape_cast %59 : vector<1x8x8xbf16> to vector<8x8xbf16>
    %61 = vector.extract_strided_slice %2 {offsets = [0, 65], sizes = [8, 896], strides = [1, 1]} : vector<8x1152xbf16> to vector<8x896xbf16>
    %cst_38 = arith.constant dense<0.000000e+00> : vector<8x896xf32>
    %62 = tpu.matmul %60, %61, %cst_38 {dimension_numbers = #tpu.dot_dimension_numbers<[1], [0], [0], [1], [0, 0, 1, 1], [], []>} : vector<8x8xbf16>, vector<8x896xbf16>, vector<8x896xf32> -> vector<8x896xf32>
    %63 = arith.addf %58, %62 : vector<8x896xf32>
    %c12 = arith.constant 12 : index
    %c0_39 = arith.constant 0 : index
    %c0_40 = arith.constant 0 : index
    %64 = vector.load %arg2[%c12, %c0_39, %c0_40] : memref<25x8x8xbf16, #tpu.memory_space<vmem>>, vector<1x8x8xbf16>
    %65 = vector.shape_cast %64 : vector<1x8x8xbf16> to vector<8x8xbf16>
    %66 = vector.extract_strided_slice %2 {offsets = [0, 66], sizes = [8, 896], strides = [1, 1]} : vector<8x1152xbf16> to vector<8x896xbf16>
    %cst_41 = arith.constant dense<0.000000e+00> : vector<8x896xf32>
    %67 = tpu.matmul %65, %66, %cst_41 {dimension_numbers = #tpu.dot_dimension_numbers<[1], [0], [0], [1], [0, 0, 1, 1], [], []>} : vector<8x8xbf16>, vector<8x896xbf16>, vector<8x896xf32> -> vector<8x896xf32>
    %68 = arith.addf %63, %67 : vector<8x896xf32>
    %c13 = arith.constant 13 : index
    %c0_42 = arith.constant 0 : index
    %c0_43 = arith.constant 0 : index
    %69 = vector.load %arg2[%c13, %c0_42, %c0_43] : memref<25x8x8xbf16, #tpu.memory_space<vmem>>, vector<1x8x8xbf16>
    %70 = vector.shape_cast %69 : vector<1x8x8xbf16> to vector<8x8xbf16>
    %71 = vector.extract_strided_slice %2 {offsets = [0, 67], sizes = [8, 896], strides = [1, 1]} : vector<8x1152xbf16> to vector<8x896xbf16>
    %cst_44 = arith.constant dense<0.000000e+00> : vector<8x896xf32>
    %72 = tpu.matmul %70, %71, %cst_44 {dimension_numbers = #tpu.dot_dimension_numbers<[1], [0], [0], [1], [0, 0, 1, 1], [], []>} : vector<8x8xbf16>, vector<8x896xbf16>, vector<8x896xf32> -> vector<8x896xf32>
    %73 = arith.addf %68, %72 : vector<8x896xf32>
    %c14 = arith.constant 14 : index
    %c0_45 = arith.constant 0 : index
    %c0_46 = arith.constant 0 : index
    %74 = vector.load %arg2[%c14, %c0_45, %c0_46] : memref<25x8x8xbf16, #tpu.memory_space<vmem>>, vector<1x8x8xbf16>
    %75 = vector.shape_cast %74 : vector<1x8x8xbf16> to vector<8x8xbf16>
    %76 = vector.extract_strided_slice %2 {offsets = [0, 68], sizes = [8, 896], strides = [1, 1]} : vector<8x1152xbf16> to vector<8x896xbf16>
    %cst_47 = arith.constant dense<0.000000e+00> : vector<8x896xf32>
    %77 = tpu.matmul %75, %76, %cst_47 {dimension_numbers = #tpu.dot_dimension_numbers<[1], [0], [0], [1], [0, 0, 1, 1], [], []>} : vector<8x8xbf16>, vector<8x896xbf16>, vector<8x896xf32> -> vector<8x896xf32>
    %78 = arith.addf %73, %77 : vector<8x896xf32>
    %c15 = arith.constant 15 : index
    %c0_48 = arith.constant 0 : index
    %c0_49 = arith.constant 0 : index
    %79 = vector.load %arg2[%c15, %c0_48, %c0_49] : memref<25x8x8xbf16, #tpu.memory_space<vmem>>, vector<1x8x8xbf16>
    %80 = vector.shape_cast %79 : vector<1x8x8xbf16> to vector<8x8xbf16>
    %81 = vector.extract_strided_slice %2 {offsets = [0, 96], sizes = [8, 896], strides = [1, 1]} : vector<8x1152xbf16> to vector<8x896xbf16>
    %cst_50 = arith.constant dense<0.000000e+00> : vector<8x896xf32>
    %82 = tpu.matmul %80, %81, %cst_50 {dimension_numbers = #tpu.dot_dimension_numbers<[1], [0], [0], [1], [0, 0, 1, 1], [], []>} : vector<8x8xbf16>, vector<8x896xbf16>, vector<8x896xf32> -> vector<8x896xf32>
    %83 = arith.addf %78, %82 : vector<8x896xf32>
    %c16 = arith.constant 16 : index
    %c0_51 = arith.constant 0 : index
    %c0_52 = arith.constant 0 : index
    %84 = vector.load %arg2[%c16, %c0_51, %c0_52] : memref<25x8x8xbf16, #tpu.memory_space<vmem>>, vector<1x8x8xbf16>
    %85 = vector.shape_cast %84 : vector<1x8x8xbf16> to vector<8x8xbf16>
    %86 = vector.extract_strided_slice %2 {offsets = [0, 97], sizes = [8, 896], strides = [1, 1]} : vector<8x1152xbf16> to vector<8x896xbf16>
    %cst_53 = arith.constant dense<0.000000e+00> : vector<8x896xf32>
    %87 = tpu.matmul %85, %86, %cst_53 {dimension_numbers = #tpu.dot_dimension_numbers<[1], [0], [0], [1], [0, 0, 1, 1], [], []>} : vector<8x8xbf16>, vector<8x896xbf16>, vector<8x896xf32> -> vector<8x896xf32>
    %88 = arith.addf %83, %87 : vector<8x896xf32>
    %c17 = arith.constant 17 : index
    %c0_54 = arith.constant 0 : index
    %c0_55 = arith.constant 0 : index
    %89 = vector.load %arg2[%c17, %c0_54, %c0_55] : memref<25x8x8xbf16, #tpu.memory_space<vmem>>, vector<1x8x8xbf16>
    %90 = vector.shape_cast %89 : vector<1x8x8xbf16> to vector<8x8xbf16>
    %91 = vector.extract_strided_slice %2 {offsets = [0, 98], sizes = [8, 896], strides = [1, 1]} : vector<8x1152xbf16> to vector<8x896xbf16>
    %cst_56 = arith.constant dense<0.000000e+00> : vector<8x896xf32>
    %92 = tpu.matmul %90, %91, %cst_56 {dimension_numbers = #tpu.dot_dimension_numbers<[1], [0], [0], [1], [0, 0, 1, 1], [], []>} : vector<8x8xbf16>, vector<8x896xbf16>, vector<8x896xf32> -> vector<8x896xf32>
    %93 = arith.addf %88, %92 : vector<8x896xf32>
    %c18 = arith.constant 18 : index
    %c0_57 = arith.constant 0 : index
    %c0_58 = arith.constant 0 : index
    %94 = vector.load %arg2[%c18, %c0_57, %c0_58] : memref<25x8x8xbf16, #tpu.memory_space<vmem>>, vector<1x8x8xbf16>
    %95 = vector.shape_cast %94 : vector<1x8x8xbf16> to vector<8x8xbf16>
    %96 = vector.extract_strided_slice %2 {offsets = [0, 99], sizes = [8, 896], strides = [1, 1]} : vector<8x1152xbf16> to vector<8x896xbf16>
    %cst_59 = arith.constant dense<0.000000e+00> : vector<8x896xf32>
    %97 = tpu.matmul %95, %96, %cst_59 {dimension_numbers = #tpu.dot_dimension_numbers<[1], [0], [0], [1], [0, 0, 1, 1], [], []>} : vector<8x8xbf16>, vector<8x896xbf16>, vector<8x896xf32> -> vector<8x896xf32>
    %98 = arith.addf %93, %97 : vector<8x896xf32>
    %c19 = arith.constant 19 : index
    %c0_60 = arith.constant 0 : index
    %c0_61 = arith.constant 0 : index
    %99 = vector.load %arg2[%c19, %c0_60, %c0_61] : memref<25x8x8xbf16, #tpu.memory_space<vmem>>, vector<1x8x8xbf16>
    %100 = vector.shape_cast %99 : vector<1x8x8xbf16> to vector<8x8xbf16>
    %101 = vector.extract_strided_slice %2 {offsets = [0, 100], sizes = [8, 896], strides = [1, 1]} : vector<8x1152xbf16> to vector<8x896xbf16>
    %cst_62 = arith.constant dense<0.000000e+00> : vector<8x896xf32>
    %102 = tpu.matmul %100, %101, %cst_62 {dimension_numbers = #tpu.dot_dimension_numbers<[1], [0], [0], [1], [0, 0, 1, 1], [], []>} : vector<8x8xbf16>, vector<8x896xbf16>, vector<8x896xf32> -> vector<8x896xf32>
    %103 = arith.addf %98, %102 : vector<8x896xf32>
    %c20 = arith.constant 20 : index
    %c0_63 = arith.constant 0 : index
    %c0_64 = arith.constant 0 : index
    %104 = vector.load %arg2[%c20, %c0_63, %c0_64] : memref<25x8x8xbf16, #tpu.memory_space<vmem>>, vector<1x8x8xbf16>
    %105 = vector.shape_cast %104 : vector<1x8x8xbf16> to vector<8x8xbf16>
    %106 = vector.extract_strided_slice %2 {offsets = [0, 128], sizes = [8, 896], strides = [1, 1]} : vector<8x1152xbf16> to vector<8x896xbf16>
    %cst_65 = arith.constant dense<0.000000e+00> : vector<8x896xf32>
    %107 = tpu.matmul %105, %106, %cst_65 {dimension_numbers = #tpu.dot_dimension_numbers<[1], [0], [0], [1], [0, 0, 1, 1], [], []>} : vector<8x8xbf16>, vector<8x896xbf16>, vector<8x896xf32> -> vector<8x896xf32>
    %108 = arith.addf %103, %107 : vector<8x896xf32>
    %c21 = arith.constant 21 : index
    %c0_66 = arith.constant 0 : index
    %c0_67 = arith.constant 0 : index
    %109 = vector.load %arg2[%c21, %c0_66, %c0_67] : memref<25x8x8xbf16, #tpu.memory_space<vmem>>, vector<1x8x8xbf16>
    %110 = vector.shape_cast %109 : vector<1x8x8xbf16> to vector<8x8xbf16>
    %111 = vector.extract_strided_slice %2 {offsets = [0, 129], sizes = [8, 896], strides = [1, 1]} : vector<8x1152xbf16> to vector<8x896xbf16>
    %cst_68 = arith.constant dense<0.000000e+00> : vector<8x896xf32>
    %112 = tpu.matmul %110, %111, %cst_68 {dimension_numbers = #tpu.dot_dimension_numbers<[1], [0], [0], [1], [0, 0, 1, 1], [], []>} : vector<8x8xbf16>, vector<8x896xbf16>, vector<8x896xf32> -> vector<8x896xf32>
    %113 = arith.addf %108, %112 : vector<8x896xf32>
    %c22 = arith.constant 22 : index
    %c0_69 = arith.constant 0 : index
    %c0_70 = arith.constant 0 : index
    %114 = vector.load %arg2[%c22, %c0_69, %c0_70] : memref<25x8x8xbf16, #tpu.memory_space<vmem>>, vector<1x8x8xbf16>
    %115 = vector.shape_cast %114 : vector<1x8x8xbf16> to vector<8x8xbf16>
    %116 = vector.extract_strided_slice %2 {offsets = [0, 130], sizes = [8, 896], strides = [1, 1]} : vector<8x1152xbf16> to vector<8x896xbf16>
    %cst_71 = arith.constant dense<0.000000e+00> : vector<8x896xf32>
    %117 = tpu.matmul %115, %116, %cst_71 {dimension_numbers = #tpu.dot_dimension_numbers<[1], [0], [0], [1], [0, 0, 1, 1], [], []>} : vector<8x8xbf16>, vector<8x896xbf16>, vector<8x896xf32> -> vector<8x896xf32>
    %118 = arith.addf %113, %117 : vector<8x896xf32>
    %c23 = arith.constant 23 : index
    %c0_72 = arith.constant 0 : index
    %c0_73 = arith.constant 0 : index
    %119 = vector.load %arg2[%c23, %c0_72, %c0_73] : memref<25x8x8xbf16, #tpu.memory_space<vmem>>, vector<1x8x8xbf16>
    %120 = vector.shape_cast %119 : vector<1x8x8xbf16> to vector<8x8xbf16>
    %121 = vector.extract_strided_slice %2 {offsets = [0, 131], sizes = [8, 896], strides = [1, 1]} : vector<8x1152xbf16> to vector<8x896xbf16>
    %cst_74 = arith.constant dense<0.000000e+00> : vector<8x896xf32>
    %122 = tpu.matmul %120, %121, %cst_74 {dimension_numbers = #tpu.dot_dimension_numbers<[1], [0], [0], [1], [0, 0, 1, 1], [], []>} : vector<8x8xbf16>, vector<8x896xbf16>, vector<8x896xf32> -> vector<8x896xf32>
    %123 = arith.addf %118, %122 : vector<8x896xf32>
    %c24 = arith.constant 24 : index
    %c0_75 = arith.constant 0 : index
    %c0_76 = arith.constant 0 : index
    %124 = vector.load %arg2[%c24, %c0_75, %c0_76] : memref<25x8x8xbf16, #tpu.memory_space<vmem>>, vector<1x8x8xbf16>
    %125 = vector.shape_cast %124 : vector<1x8x8xbf16> to vector<8x8xbf16>
    %126 = vector.extract_strided_slice %2 {offsets = [0, 132], sizes = [8, 896], strides = [1, 1]} : vector<8x1152xbf16> to vector<8x896xbf16>
    %cst_77 = arith.constant dense<0.000000e+00> : vector<8x896xf32>
    %127 = tpu.matmul %125, %126, %cst_77 {dimension_numbers = #tpu.dot_dimension_numbers<[1], [0], [0], [1], [0, 0, 1, 1], [], []>} : vector<8x8xbf16>, vector<8x896xbf16>, vector<8x896xf32> -> vector<8x896xf32>
    %128 = arith.addf %123, %127 : vector<8x896xf32>
    %c0_78 = arith.constant 0 : index
    %c0_79 = arith.constant 0 : index
    %129 = vector.load %arg3[%c0_78, %c0_79] : memref<8x1xf32, #tpu.memory_space<vmem>>, vector<8x1xf32>
    %130 = vector.broadcast %129 : vector<8x1xf32> to vector<8x896xf32>
    %131 = arith.addf %128, %130 : vector<8x896xf32>
    %132 = arith.truncf %131 : vector<8x896xf32> to vector<8x896xbf16>
    %c0_80 = arith.constant 0 : index
    %c0_81 = arith.constant 0 : index
    %133 = vector.load %arg4[%c0_80, %c0_81] : memref<896x256xbf16, #tpu.memory_space<vmem>>, vector<896x256xbf16>
    %cst_82 = arith.constant dense<0.000000e+00> : vector<8x256xf32>
    %134 = tpu.matmul %132, %133, %cst_82 {dimension_numbers = #tpu.dot_dimension_numbers<[1], [0], [0], [1], [0, 0, 1, 1], [], []>} : vector<8x896xbf16>, vector<896x256xbf16>, vector<8x256xf32> -> vector<8x256xf32>
    %135 = arith.negf %134 : vector<8x256xf32>
    %136 = math.exp %135 : vector<8x256xf32>
    %cst_83 = arith.constant 1.000000e+00 : f32
    %137 = vector.broadcast %cst_83 : f32 to vector<8x256xf32>
    %138 = arith.addf %137, %136 : vector<8x256xf32>
    %139 = arith.divf %137, %138 : vector<8x256xf32>
    %140 = arith.truncf %139 : vector<8x256xf32> to vector<8x256xbf16>
    %cst_84 = arith.constant 0.000000e+00 : f32
    %141 = vector.broadcast %cst_84 : f32 to vector<16x140xf32>
    %c0_85 = arith.constant 0 : index
    %c0_86 = arith.constant 0 : index
    %c0_87 = arith.constant 0 : index
    %142 = vector.load %arg5[%c0_85, %c0_86, %c0_87] : memref<25x16x8xbf16, #tpu.memory_space<vmem>>, vector<1x16x8xbf16>
    %143 = vector.shape_cast %142 : vector<1x16x8xbf16> to vector<16x8xbf16>
    %144 = vector.extract_strided_slice %140 {offsets = [0, 0], sizes = [8, 140], strides = [1, 1]} : vector<8x256xbf16> to vector<8x140xbf16>
    %cst_88 = arith.constant dense<0.000000e+00> : vector<16x140xf32>
    %145 = tpu.matmul %143, %144, %cst_88 {dimension_numbers = #tpu.dot_dimension_numbers<[1], [0], [0], [1], [0, 0, 1, 1], [], []>} : vector<16x8xbf16>, vector<8x140xbf16>, vector<16x140xf32> -> vector<16x140xf32>
    %146 = arith.addf %141, %145 : vector<16x140xf32>
    %c1_89 = arith.constant 1 : index
    %c0_90 = arith.constant 0 : index
    %c0_91 = arith.constant 0 : index
    %147 = vector.load %arg5[%c1_89, %c0_90, %c0_91] : memref<25x16x8xbf16, #tpu.memory_space<vmem>>, vector<1x16x8xbf16>
    %148 = vector.shape_cast %147 : vector<1x16x8xbf16> to vector<16x8xbf16>
    %149 = vector.extract_strided_slice %140 {offsets = [0, 1], sizes = [8, 140], strides = [1, 1]} : vector<8x256xbf16> to vector<8x140xbf16>
    %cst_92 = arith.constant dense<0.000000e+00> : vector<16x140xf32>
    %150 = tpu.matmul %148, %149, %cst_92 {dimension_numbers = #tpu.dot_dimension_numbers<[1], [0], [0], [1], [0, 0, 1, 1], [], []>} : vector<16x8xbf16>, vector<8x140xbf16>, vector<16x140xf32> -> vector<16x140xf32>
    %151 = arith.addf %146, %150 : vector<16x140xf32>
    %c2_93 = arith.constant 2 : index
    %c0_94 = arith.constant 0 : index
    %c0_95 = arith.constant 0 : index
    %152 = vector.load %arg5[%c2_93, %c0_94, %c0_95] : memref<25x16x8xbf16, #tpu.memory_space<vmem>>, vector<1x16x8xbf16>
    %153 = vector.shape_cast %152 : vector<1x16x8xbf16> to vector<16x8xbf16>
    %154 = vector.extract_strided_slice %140 {offsets = [0, 2], sizes = [8, 140], strides = [1, 1]} : vector<8x256xbf16> to vector<8x140xbf16>
    %cst_96 = arith.constant dense<0.000000e+00> : vector<16x140xf32>
    %155 = tpu.matmul %153, %154, %cst_96 {dimension_numbers = #tpu.dot_dimension_numbers<[1], [0], [0], [1], [0, 0, 1, 1], [], []>} : vector<16x8xbf16>, vector<8x140xbf16>, vector<16x140xf32> -> vector<16x140xf32>
    %156 = arith.addf %151, %155 : vector<16x140xf32>
    %c3_97 = arith.constant 3 : index
    %c0_98 = arith.constant 0 : index
    %c0_99 = arith.constant 0 : index
    %157 = vector.load %arg5[%c3_97, %c0_98, %c0_99] : memref<25x16x8xbf16, #tpu.memory_space<vmem>>, vector<1x16x8xbf16>
    %158 = vector.shape_cast %157 : vector<1x16x8xbf16> to vector<16x8xbf16>
    %159 = vector.extract_strided_slice %140 {offsets = [0, 3], sizes = [8, 140], strides = [1, 1]} : vector<8x256xbf16> to vector<8x140xbf16>
    %cst_100 = arith.constant dense<0.000000e+00> : vector<16x140xf32>
    %160 = tpu.matmul %158, %159, %cst_100 {dimension_numbers = #tpu.dot_dimension_numbers<[1], [0], [0], [1], [0, 0, 1, 1], [], []>} : vector<16x8xbf16>, vector<8x140xbf16>, vector<16x140xf32> -> vector<16x140xf32>
    %161 = arith.addf %156, %160 : vector<16x140xf32>
    %c4_101 = arith.constant 4 : index
    %c0_102 = arith.constant 0 : index
    %c0_103 = arith.constant 0 : index
    %162 = vector.load %arg5[%c4_101, %c0_102, %c0_103] : memref<25x16x8xbf16, #tpu.memory_space<vmem>>, vector<1x16x8xbf16>
    %163 = vector.shape_cast %162 : vector<1x16x8xbf16> to vector<16x8xbf16>
    %164 = vector.extract_strided_slice %140 {offsets = [0, 4], sizes = [8, 140], strides = [1, 1]} : vector<8x256xbf16> to vector<8x140xbf16>
    %cst_104 = arith.constant dense<0.000000e+00> : vector<16x140xf32>
    %165 = tpu.matmul %163, %164, %cst_104 {dimension_numbers = #tpu.dot_dimension_numbers<[1], [0], [0], [1], [0, 0, 1, 1], [], []>} : vector<16x8xbf16>, vector<8x140xbf16>, vector<16x140xf32> -> vector<16x140xf32>
    %166 = arith.addf %161, %165 : vector<16x140xf32>
    %c5_105 = arith.constant 5 : index
    %c0_106 = arith.constant 0 : index
    %c0_107 = arith.constant 0 : index
    %167 = vector.load %arg5[%c5_105, %c0_106, %c0_107] : memref<25x16x8xbf16, #tpu.memory_space<vmem>>, vector<1x16x8xbf16>
    %168 = vector.shape_cast %167 : vector<1x16x8xbf16> to vector<16x8xbf16>
    %169 = vector.extract_strided_slice %140 {offsets = [0, 14], sizes = [8, 140], strides = [1, 1]} : vector<8x256xbf16> to vector<8x140xbf16>
    %cst_108 = arith.constant dense<0.000000e+00> : vector<16x140xf32>
    %170 = tpu.matmul %168, %169, %cst_108 {dimension_numbers = #tpu.dot_dimension_numbers<[1], [0], [0], [1], [0, 0, 1, 1], [], []>} : vector<16x8xbf16>, vector<8x140xbf16>, vector<16x140xf32> -> vector<16x140xf32>
    %171 = arith.addf %166, %170 : vector<16x140xf32>
    %c6_109 = arith.constant 6 : index
    %c0_110 = arith.constant 0 : index
    %c0_111 = arith.constant 0 : index
    %172 = vector.load %arg5[%c6_109, %c0_110, %c0_111] : memref<25x16x8xbf16, #tpu.memory_space<vmem>>, vector<1x16x8xbf16>
    %173 = vector.shape_cast %172 : vector<1x16x8xbf16> to vector<16x8xbf16>
    %174 = vector.extract_strided_slice %140 {offsets = [0, 15], sizes = [8, 140], strides = [1, 1]} : vector<8x256xbf16> to vector<8x140xbf16>
    %cst_112 = arith.constant dense<0.000000e+00> : vector<16x140xf32>
    %175 = tpu.matmul %173, %174, %cst_112 {dimension_numbers = #tpu.dot_dimension_numbers<[1], [0], [0], [1], [0, 0, 1, 1], [], []>} : vector<16x8xbf16>, vector<8x140xbf16>, vector<16x140xf32> -> vector<16x140xf32>
    %176 = arith.addf %171, %175 : vector<16x140xf32>
    %c7_113 = arith.constant 7 : index
    %c0_114 = arith.constant 0 : index
    %c0_115 = arith.constant 0 : index
    %177 = vector.load %arg5[%c7_113, %c0_114, %c0_115] : memref<25x16x8xbf16, #tpu.memory_space<vmem>>, vector<1x16x8xbf16>
    %178 = vector.shape_cast %177 : vector<1x16x8xbf16> to vector<16x8xbf16>
    %179 = vector.extract_strided_slice %140 {offsets = [0, 16], sizes = [8, 140], strides = [1, 1]} : vector<8x256xbf16> to vector<8x140xbf16>
    %cst_116 = arith.constant dense<0.000000e+00> : vector<16x140xf32>
    %180 = tpu.matmul %178, %179, %cst_116 {dimension_numbers = #tpu.dot_dimension_numbers<[1], [0], [0], [1], [0, 0, 1, 1], [], []>} : vector<16x8xbf16>, vector<8x140xbf16>, vector<16x140xf32> -> vector<16x140xf32>
    %181 = arith.addf %176, %180 : vector<16x140xf32>
    %c8_117 = arith.constant 8 : index
    %c0_118 = arith.constant 0 : index
    %c0_119 = arith.constant 0 : index
    %182 = vector.load %arg5[%c8_117, %c0_118, %c0_119] : memref<25x16x8xbf16, #tpu.memory_space<vmem>>, vector<1x16x8xbf16>
    %183 = vector.shape_cast %182 : vector<1x16x8xbf16> to vector<16x8xbf16>
    %184 = vector.extract_strided_slice %140 {offsets = [0, 17], sizes = [8, 140], strides = [1, 1]} : vector<8x256xbf16> to vector<8x140xbf16>
    %cst_120 = arith.constant dense<0.000000e+00> : vector<16x140xf32>
    %185 = tpu.matmul %183, %184, %cst_120 {dimension_numbers = #tpu.dot_dimension_numbers<[1], [0], [0], [1], [0, 0, 1, 1], [], []>} : vector<16x8xbf16>, vector<8x140xbf16>, vector<16x140xf32> -> vector<16x140xf32>
    %186 = arith.addf %181, %185 : vector<16x140xf32>
    %c9_121 = arith.constant 9 : index
    %c0_122 = arith.constant 0 : index
    %c0_123 = arith.constant 0 : index
    %187 = vector.load %arg5[%c9_121, %c0_122, %c0_123] : memref<25x16x8xbf16, #tpu.memory_space<vmem>>, vector<1x16x8xbf16>
    %188 = vector.shape_cast %187 : vector<1x16x8xbf16> to vector<16x8xbf16>
    %189 = vector.extract_strided_slice %140 {offsets = [0, 18], sizes = [8, 140], strides = [1, 1]} : vector<8x256xbf16> to vector<8x140xbf16>
    %cst_124 = arith.constant dense<0.000000e+00> : vector<16x140xf32>
    %190 = tpu.matmul %188, %189, %cst_124 {dimension_numbers = #tpu.dot_dimension_numbers<[1], [0], [0], [1], [0, 0, 1, 1], [], []>} : vector<16x8xbf16>, vector<8x140xbf16>, vector<16x140xf32> -> vector<16x140xf32>
    %191 = arith.addf %186, %190 : vector<16x140xf32>
    %c10_125 = arith.constant 10 : index
    %c0_126 = arith.constant 0 : index
    %c0_127 = arith.constant 0 : index
    %192 = vector.load %arg5[%c10_125, %c0_126, %c0_127] : memref<25x16x8xbf16, #tpu.memory_space<vmem>>, vector<1x16x8xbf16>
    %193 = vector.shape_cast %192 : vector<1x16x8xbf16> to vector<16x8xbf16>
    %194 = vector.extract_strided_slice %140 {offsets = [0, 28], sizes = [8, 140], strides = [1, 1]} : vector<8x256xbf16> to vector<8x140xbf16>
    %cst_128 = arith.constant dense<0.000000e+00> : vector<16x140xf32>
    %195 = tpu.matmul %193, %194, %cst_128 {dimension_numbers = #tpu.dot_dimension_numbers<[1], [0], [0], [1], [0, 0, 1, 1], [], []>} : vector<16x8xbf16>, vector<8x140xbf16>, vector<16x140xf32> -> vector<16x140xf32>
    %196 = arith.addf %191, %195 : vector<16x140xf32>
    %c11_129 = arith.constant 11 : index
    %c0_130 = arith.constant 0 : index
    %c0_131 = arith.constant 0 : index
    %197 = vector.load %arg5[%c11_129, %c0_130, %c0_131] : memref<25x16x8xbf16, #tpu.memory_space<vmem>>, vector<1x16x8xbf16>
    %198 = vector.shape_cast %197 : vector<1x16x8xbf16> to vector<16x8xbf16>
    %199 = vector.extract_strided_slice %140 {offsets = [0, 29], sizes = [8, 140], strides = [1, 1]} : vector<8x256xbf16> to vector<8x140xbf16>
    %cst_132 = arith.constant dense<0.000000e+00> : vector<16x140xf32>
    %200 = tpu.matmul %198, %199, %cst_132 {dimension_numbers = #tpu.dot_dimension_numbers<[1], [0], [0], [1], [0, 0, 1, 1], [], []>} : vector<16x8xbf16>, vector<8x140xbf16>, vector<16x140xf32> -> vector<16x140xf32>
    %201 = arith.addf %196, %200 : vector<16x140xf32>
    %c12_133 = arith.constant 12 : index
    %c0_134 = arith.constant 0 : index
    %c0_135 = arith.constant 0 : index
    %202 = vector.load %arg5[%c12_133, %c0_134, %c0_135] : memref<25x16x8xbf16, #tpu.memory_space<vmem>>, vector<1x16x8xbf16>
    %203 = vector.shape_cast %202 : vector<1x16x8xbf16> to vector<16x8xbf16>
    %204 = vector.extract_strided_slice %140 {offsets = [0, 30], sizes = [8, 140], strides = [1, 1]} : vector<8x256xbf16> to vector<8x140xbf16>
    %cst_136 = arith.constant dense<0.000000e+00> : vector<16x140xf32>
    %205 = tpu.matmul %203, %204, %cst_136 {dimension_numbers = #tpu.dot_dimension_numbers<[1], [0], [0], [1], [0, 0, 1, 1], [], []>} : vector<16x8xbf16>, vector<8x140xbf16>, vector<16x140xf32> -> vector<16x140xf32>
    %206 = arith.addf %201, %205 : vector<16x140xf32>
    %c13_137 = arith.constant 13 : index
    %c0_138 = arith.constant 0 : index
    %c0_139 = arith.constant 0 : index
    %207 = vector.load %arg5[%c13_137, %c0_138, %c0_139] : memref<25x16x8xbf16, #tpu.memory_space<vmem>>, vector<1x16x8xbf16>
    %208 = vector.shape_cast %207 : vector<1x16x8xbf16> to vector<16x8xbf16>
    %209 = vector.extract_strided_slice %140 {offsets = [0, 31], sizes = [8, 140], strides = [1, 1]} : vector<8x256xbf16> to vector<8x140xbf16>
    %cst_140 = arith.constant dense<0.000000e+00> : vector<16x140xf32>
    %210 = tpu.matmul %208, %209, %cst_140 {dimension_numbers = #tpu.dot_dimension_numbers<[1], [0], [0], [1], [0, 0, 1, 1], [], []>} : vector<16x8xbf16>, vector<8x140xbf16>, vector<16x140xf32> -> vector<16x140xf32>
    %211 = arith.addf %206, %210 : vector<16x140xf32>
    %c14_141 = arith.constant 14 : index
    %c0_142 = arith.constant 0 : index
    %c0_143 = arith.constant 0 : index
    %212 = vector.load %arg5[%c14_141, %c0_142, %c0_143] : memref<25x16x8xbf16, #tpu.memory_space<vmem>>, vector<1x16x8xbf16>
    %213 = vector.shape_cast %212 : vector<1x16x8xbf16> to vector<16x8xbf16>
    %214 = vector.extract_strided_slice %140 {offsets = [0, 32], sizes = [8, 140], strides = [1, 1]} : vector<8x256xbf16> to vector<8x140xbf16>
    %cst_144 = arith.constant dense<0.000000e+00> : vector<16x140xf32>
    %215 = tpu.matmul %213, %214, %cst_144 {dimension_numbers = #tpu.dot_dimension_numbers<[1], [0], [0], [1], [0, 0, 1, 1], [], []>} : vector<16x8xbf16>, vector<8x140xbf16>, vector<16x140xf32> -> vector<16x140xf32>
    %216 = arith.addf %211, %215 : vector<16x140xf32>
    %c15_145 = arith.constant 15 : index
    %c0_146 = arith.constant 0 : index
    %c0_147 = arith.constant 0 : index
    %217 = vector.load %arg5[%c15_145, %c0_146, %c0_147] : memref<25x16x8xbf16, #tpu.memory_space<vmem>>, vector<1x16x8xbf16>
    %218 = vector.shape_cast %217 : vector<1x16x8xbf16> to vector<16x8xbf16>
    %219 = vector.extract_strided_slice %140 {offsets = [0, 42], sizes = [8, 140], strides = [1, 1]} : vector<8x256xbf16> to vector<8x140xbf16>
    %cst_148 = arith.constant dense<0.000000e+00> : vector<16x140xf32>
    %220 = tpu.matmul %218, %219, %cst_148 {dimension_numbers = #tpu.dot_dimension_numbers<[1], [0], [0], [1], [0, 0, 1, 1], [], []>} : vector<16x8xbf16>, vector<8x140xbf16>, vector<16x140xf32> -> vector<16x140xf32>
    %221 = arith.addf %216, %220 : vector<16x140xf32>
    %c16_149 = arith.constant 16 : index
    %c0_150 = arith.constant 0 : index
    %c0_151 = arith.constant 0 : index
    %222 = vector.load %arg5[%c16_149, %c0_150, %c0_151] : memref<25x16x8xbf16, #tpu.memory_space<vmem>>, vector<1x16x8xbf16>
    %223 = vector.shape_cast %222 : vector<1x16x8xbf16> to vector<16x8xbf16>
    %224 = vector.extract_strided_slice %140 {offsets = [0, 43], sizes = [8, 140], strides = [1, 1]} : vector<8x256xbf16> to vector<8x140xbf16>
    %cst_152 = arith.constant dense<0.000000e+00> : vector<16x140xf32>
    %225 = tpu.matmul %223, %224, %cst_152 {dimension_numbers = #tpu.dot_dimension_numbers<[1], [0], [0], [1], [0, 0, 1, 1], [], []>} : vector<16x8xbf16>, vector<8x140xbf16>, vector<16x140xf32> -> vector<16x140xf32>
    %226 = arith.addf %221, %225 : vector<16x140xf32>
    %c17_153 = arith.constant 17 : index
    %c0_154 = arith.constant 0 : index
    %c0_155 = arith.constant 0 : index
    %227 = vector.load %arg5[%c17_153, %c0_154, %c0_155] : memref<25x16x8xbf16, #tpu.memory_space<vmem>>, vector<1x16x8xbf16>
    %228 = vector.shape_cast %227 : vector<1x16x8xbf16> to vector<16x8xbf16>
    %229 = vector.extract_strided_slice %140 {offsets = [0, 44], sizes = [8, 140], strides = [1, 1]} : vector<8x256xbf16> to vector<8x140xbf16>
    %cst_156 = arith.constant dense<0.000000e+00> : vector<16x140xf32>
    %230 = tpu.matmul %228, %229, %cst_156 {dimension_numbers = #tpu.dot_dimension_numbers<[1], [0], [0], [1], [0, 0, 1, 1], [], []>} : vector<16x8xbf16>, vector<8x140xbf16>, vector<16x140xf32> -> vector<16x140xf32>
    %231 = arith.addf %226, %230 : vector<16x140xf32>
    %c18_157 = arith.constant 18 : index
    %c0_158 = arith.constant 0 : index
    %c0_159 = arith.constant 0 : index
    %232 = vector.load %arg5[%c18_157, %c0_158, %c0_159] : memref<25x16x8xbf16, #tpu.memory_space<vmem>>, vector<1x16x8xbf16>
    %233 = vector.shape_cast %232 : vector<1x16x8xbf16> to vector<16x8xbf16>
    %234 = vector.extract_strided_slice %140 {offsets = [0, 45], sizes = [8, 140], strides = [1, 1]} : vector<8x256xbf16> to vector<8x140xbf16>
    %cst_160 = arith.constant dense<0.000000e+00> : vector<16x140xf32>
    %235 = tpu.matmul %233, %234, %cst_160 {dimension_numbers = #tpu.dot_dimension_numbers<[1], [0], [0], [1], [0, 0, 1, 1], [], []>} : vector<16x8xbf16>, vector<8x140xbf16>, vector<16x140xf32> -> vector<16x140xf32>
    %236 = arith.addf %231, %235 : vector<16x140xf32>
    %c19_161 = arith.constant 19 : index
    %c0_162 = arith.constant 0 : index
    %c0_163 = arith.constant 0 : index
    %237 = vector.load %arg5[%c19_161, %c0_162, %c0_163] : memref<25x16x8xbf16, #tpu.memory_space<vmem>>, vector<1x16x8xbf16>
    %238 = vector.shape_cast %237 : vector<1x16x8xbf16> to vector<16x8xbf16>
    %239 = vector.extract_strided_slice %140 {offsets = [0, 46], sizes = [8, 140], strides = [1, 1]} : vector<8x256xbf16> to vector<8x140xbf16>
    %cst_164 = arith.constant dense<0.000000e+00> : vector<16x140xf32>
    %240 = tpu.matmul %238, %239, %cst_164 {dimension_numbers = #tpu.dot_dimension_numbers<[1], [0], [0], [1], [0, 0, 1, 1], [], []>} : vector<16x8xbf16>, vector<8x140xbf16>, vector<16x140xf32> -> vector<16x140xf32>
    %241 = arith.addf %236, %240 : vector<16x140xf32>
    %c20_165 = arith.constant 20 : index
    %c0_166 = arith.constant 0 : index
    %c0_167 = arith.constant 0 : index
    %242 = vector.load %arg5[%c20_165, %c0_166, %c0_167] : memref<25x16x8xbf16, #tpu.memory_space<vmem>>, vector<1x16x8xbf16>
    %243 = vector.shape_cast %242 : vector<1x16x8xbf16> to vector<16x8xbf16>
    %244 = vector.extract_strided_slice %140 {offsets = [0, 56], sizes = [8, 140], strides = [1, 1]} : vector<8x256xbf16> to vector<8x140xbf16>
    %cst_168 = arith.constant dense<0.000000e+00> : vector<16x140xf32>
    %245 = tpu.matmul %243, %244, %cst_168 {dimension_numbers = #tpu.dot_dimension_numbers<[1], [0], [0], [1], [0, 0, 1, 1], [], []>} : vector<16x8xbf16>, vector<8x140xbf16>, vector<16x140xf32> -> vector<16x140xf32>
    %246 = arith.addf %241, %245 : vector<16x140xf32>
    %c21_169 = arith.constant 21 : index
    %c0_170 = arith.constant 0 : index
    %c0_171 = arith.constant 0 : index
    %247 = vector.load %arg5[%c21_169, %c0_170, %c0_171] : memref<25x16x8xbf16, #tpu.memory_space<vmem>>, vector<1x16x8xbf16>
    %248 = vector.shape_cast %247 : vector<1x16x8xbf16> to vector<16x8xbf16>
    %249 = vector.extract_strided_slice %140 {offsets = [0, 57], sizes = [8, 140], strides = [1, 1]} : vector<8x256xbf16> to vector<8x140xbf16>
    %cst_172 = arith.constant dense<0.000000e+00> : vector<16x140xf32>
    %250 = tpu.matmul %248, %249, %cst_172 {dimension_numbers = #tpu.dot_dimension_numbers<[1], [0], [0], [1], [0, 0, 1, 1], [], []>} : vector<16x8xbf16>, vector<8x140xbf16>, vector<16x140xf32> -> vector<16x140xf32>
    %251 = arith.addf %246, %250 : vector<16x140xf32>
    %c22_173 = arith.constant 22 : index
    %c0_174 = arith.constant 0 : index
    %c0_175 = arith.constant 0 : index
    %252 = vector.load %arg5[%c22_173, %c0_174, %c0_175] : memref<25x16x8xbf16, #tpu.memory_space<vmem>>, vector<1x16x8xbf16>
    %253 = vector.shape_cast %252 : vector<1x16x8xbf16> to vector<16x8xbf16>
    %254 = vector.extract_strided_slice %140 {offsets = [0, 58], sizes = [8, 140], strides = [1, 1]} : vector<8x256xbf16> to vector<8x140xbf16>
    %cst_176 = arith.constant dense<0.000000e+00> : vector<16x140xf32>
    %255 = tpu.matmul %253, %254, %cst_176 {dimension_numbers = #tpu.dot_dimension_numbers<[1], [0], [0], [1], [0, 0, 1, 1], [], []>} : vector<16x8xbf16>, vector<8x140xbf16>, vector<16x140xf32> -> vector<16x140xf32>
    %256 = arith.addf %251, %255 : vector<16x140xf32>
    %c23_177 = arith.constant 23 : index
    %c0_178 = arith.constant 0 : index
    %c0_179 = arith.constant 0 : index
    %257 = vector.load %arg5[%c23_177, %c0_178, %c0_179] : memref<25x16x8xbf16, #tpu.memory_space<vmem>>, vector<1x16x8xbf16>
    %258 = vector.shape_cast %257 : vector<1x16x8xbf16> to vector<16x8xbf16>
    %259 = vector.extract_strided_slice %140 {offsets = [0, 59], sizes = [8, 140], strides = [1, 1]} : vector<8x256xbf16> to vector<8x140xbf16>
    %cst_180 = arith.constant dense<0.000000e+00> : vector<16x140xf32>
    %260 = tpu.matmul %258, %259, %cst_180 {dimension_numbers = #tpu.dot_dimension_numbers<[1], [0], [0], [1], [0, 0, 1, 1], [], []>} : vector<16x8xbf16>, vector<8x140xbf16>, vector<16x140xf32> -> vector<16x140xf32>
    %261 = arith.addf %256, %260 : vector<16x140xf32>
    %c24_181 = arith.constant 24 : index
    %c0_182 = arith.constant 0 : index
    %c0_183 = arith.constant 0 : index
    %262 = vector.load %arg5[%c24_181, %c0_182, %c0_183] : memref<25x16x8xbf16, #tpu.memory_space<vmem>>, vector<1x16x8xbf16>
    %263 = vector.shape_cast %262 : vector<1x16x8xbf16> to vector<16x8xbf16>
    %264 = vector.extract_strided_slice %140 {offsets = [0, 60], sizes = [8, 140], strides = [1, 1]} : vector<8x256xbf16> to vector<8x140xbf16>
    %cst_184 = arith.constant dense<0.000000e+00> : vector<16x140xf32>
    %265 = tpu.matmul %263, %264, %cst_184 {dimension_numbers = #tpu.dot_dimension_numbers<[1], [0], [0], [1], [0, 0, 1, 1], [], []>} : vector<16x8xbf16>, vector<8x140xbf16>, vector<16x140xf32> -> vector<16x140xf32>
    %266 = arith.addf %261, %265 : vector<16x140xf32>
    %c0_185 = arith.constant 0 : index
    %c0_186 = arith.constant 0 : index
    %267 = vector.load %arg6[%c0_185, %c0_186] : memref<16x1xf32, #tpu.memory_space<vmem>>, vector<16x1xf32>
    %268 = vector.broadcast %267 : vector<16x1xf32> to vector<16x140xf32>
    %269 = arith.addf %266, %268 : vector<16x140xf32>
    %270 = arith.truncf %269 : vector<16x140xf32> to vector<16x140xbf16>
    %c0_187 = arith.constant 0 : index
    %c0_188 = arith.constant 0 : index
    %271 = vector.load %arg7[%c0_187, %c0_188] : memref<140x25xbf16, #tpu.memory_space<vmem>>, vector<140x25xbf16>
    %cst_189 = arith.constant dense<0.000000e+00> : vector<16x25xf32>
    %272 = tpu.matmul %270, %271, %cst_189 {dimension_numbers = #tpu.dot_dimension_numbers<[1], [0], [0], [1], [0, 0, 1, 1], [], []>} : vector<16x140xbf16>, vector<140x25xbf16>, vector<16x25xf32> -> vector<16x25xf32>
    %273 = arith.negf %272 : vector<16x25xf32>
    %274 = math.exp %273 : vector<16x25xf32>
    %cst_190 = arith.constant 1.000000e+00 : f32
    %275 = vector.broadcast %cst_190 : f32 to vector<16x25xf32>
    %276 = arith.addf %275, %274 : vector<16x25xf32>
    %277 = arith.divf %275, %276 : vector<16x25xf32>
    %278 = arith.truncf %277 : vector<16x25xf32> to vector<16x25xbf16>
    %cst_191 = arith.constant 0.000000e+00 : f32
    %279 = vector.broadcast %cst_191 : f32 to vector<1x128xf32>
    %280 = vector.extract_strided_slice %278 {offsets = [0, 0], sizes = [1, 25], strides = [1, 1]} : vector<16x25xbf16> to vector<1x25xbf16>
    %c0_192 = arith.constant 0 : index
    %c0_193 = arith.constant 0 : index
    %c0_194 = arith.constant 0 : index
    %281 = vector.load %arg8[%c0_192, %c0_193, %c0_194] : memref<16x25x128xbf16, #tpu.memory_space<vmem>>, vector<1x25x128xbf16>
    %282 = vector.shape_cast %281 : vector<1x25x128xbf16> to vector<25x128xbf16>
    %cst_195 = arith.constant dense<0.000000e+00> : vector<1x128xf32>
    %283 = tpu.matmul %280, %282, %cst_195 {dimension_numbers = #tpu.dot_dimension_numbers<[1], [0], [0], [1], [0, 0, 1, 1], [], []>} : vector<1x25xbf16>, vector<25x128xbf16>, vector<1x128xf32> -> vector<1x128xf32>
    %284 = arith.addf %279, %283 : vector<1x128xf32>
    %285 = vector.extract_strided_slice %278 {offsets = [1, 0], sizes = [1, 25], strides = [1, 1]} : vector<16x25xbf16> to vector<1x25xbf16>
    %c1_196 = arith.constant 1 : index
    %c0_197 = arith.constant 0 : index
    %c0_198 = arith.constant 0 : index
    %286 = vector.load %arg8[%c1_196, %c0_197, %c0_198] : memref<16x25x128xbf16, #tpu.memory_space<vmem>>, vector<1x25x128xbf16>
    %287 = vector.shape_cast %286 : vector<1x25x128xbf16> to vector<25x128xbf16>
    %cst_199 = arith.constant dense<0.000000e+00> : vector<1x128xf32>
    %288 = tpu.matmul %285, %287, %cst_199 {dimension_numbers = #tpu.dot_dimension_numbers<[1], [0], [0], [1], [0, 0, 1, 1], [], []>} : vector<1x25xbf16>, vector<25x128xbf16>, vector<1x128xf32> -> vector<1x128xf32>
    %289 = arith.addf %284, %288 : vector<1x128xf32>
    %290 = vector.extract_strided_slice %278 {offsets = [2, 0], sizes = [1, 25], strides = [1, 1]} : vector<16x25xbf16> to vector<1x25xbf16>
    %c2_200 = arith.constant 2 : index
    %c0_201 = arith.constant 0 : index
    %c0_202 = arith.constant 0 : index
    %291 = vector.load %arg8[%c2_200, %c0_201, %c0_202] : memref<16x25x128xbf16, #tpu.memory_space<vmem>>, vector<1x25x128xbf16>
    %292 = vector.shape_cast %291 : vector<1x25x128xbf16> to vector<25x128xbf16>
    %cst_203 = arith.constant dense<0.000000e+00> : vector<1x128xf32>
    %293 = tpu.matmul %290, %292, %cst_203 {dimension_numbers = #tpu.dot_dimension_numbers<[1], [0], [0], [1], [0, 0, 1, 1], [], []>} : vector<1x25xbf16>, vector<25x128xbf16>, vector<1x128xf32> -> vector<1x128xf32>
    %294 = arith.addf %289, %293 : vector<1x128xf32>
    %295 = vector.extract_strided_slice %278 {offsets = [3, 0], sizes = [1, 25], strides = [1, 1]} : vector<16x25xbf16> to vector<1x25xbf16>
    %c3_204 = arith.constant 3 : index
    %c0_205 = arith.constant 0 : index
    %c0_206 = arith.constant 0 : index
    %296 = vector.load %arg8[%c3_204, %c0_205, %c0_206] : memref<16x25x128xbf16, #tpu.memory_space<vmem>>, vector<1x25x128xbf16>
    %297 = vector.shape_cast %296 : vector<1x25x128xbf16> to vector<25x128xbf16>
    %cst_207 = arith.constant dense<0.000000e+00> : vector<1x128xf32>
    %298 = tpu.matmul %295, %297, %cst_207 {dimension_numbers = #tpu.dot_dimension_numbers<[1], [0], [0], [1], [0, 0, 1, 1], [], []>} : vector<1x25xbf16>, vector<25x128xbf16>, vector<1x128xf32> -> vector<1x128xf32>
    %299 = arith.addf %294, %298 : vector<1x128xf32>
    %300 = vector.extract_strided_slice %278 {offsets = [4, 0], sizes = [1, 25], strides = [1, 1]} : vector<16x25xbf16> to vector<1x25xbf16>
    %c4_208 = arith.constant 4 : index
    %c0_209 = arith.constant 0 : index
    %c0_210 = arith.constant 0 : index
    %301 = vector.load %arg8[%c4_208, %c0_209, %c0_210] : memref<16x25x128xbf16, #tpu.memory_space<vmem>>, vector<1x25x128xbf16>
    %302 = vector.shape_cast %301 : vector<1x25x128xbf16> to vector<25x128xbf16>
    %cst_211 = arith.constant dense<0.000000e+00> : vector<1x128xf32>
    %303 = tpu.matmul %300, %302, %cst_211 {dimension_numbers = #tpu.dot_dimension_numbers<[1], [0], [0], [1], [0, 0, 1, 1], [], []>} : vector<1x25xbf16>, vector<25x128xbf16>, vector<1x128xf32> -> vector<1x128xf32>
    %304 = arith.addf %299, %303 : vector<1x128xf32>
    %305 = vector.extract_strided_slice %278 {offsets = [5, 0], sizes = [1, 25], strides = [1, 1]} : vector<16x25xbf16> to vector<1x25xbf16>
    %c5_212 = arith.constant 5 : index
    %c0_213 = arith.constant 0 : index
    %c0_214 = arith.constant 0 : index
    %306 = vector.load %arg8[%c5_212, %c0_213, %c0_214] : memref<16x25x128xbf16, #tpu.memory_space<vmem>>, vector<1x25x128xbf16>
    %307 = vector.shape_cast %306 : vector<1x25x128xbf16> to vector<25x128xbf16>
    %cst_215 = arith.constant dense<0.000000e+00> : vector<1x128xf32>
    %308 = tpu.matmul %305, %307, %cst_215 {dimension_numbers = #tpu.dot_dimension_numbers<[1], [0], [0], [1], [0, 0, 1, 1], [], []>} : vector<1x25xbf16>, vector<25x128xbf16>, vector<1x128xf32> -> vector<1x128xf32>
    %309 = arith.addf %304, %308 : vector<1x128xf32>
    %310 = vector.extract_strided_slice %278 {offsets = [6, 0], sizes = [1, 25], strides = [1, 1]} : vector<16x25xbf16> to vector<1x25xbf16>
    %c6_216 = arith.constant 6 : index
    %c0_217 = arith.constant 0 : index
    %c0_218 = arith.constant 0 : index
    %311 = vector.load %arg8[%c6_216, %c0_217, %c0_218] : memref<16x25x128xbf16, #tpu.memory_space<vmem>>, vector<1x25x128xbf16>
    %312 = vector.shape_cast %311 : vector<1x25x128xbf16> to vector<25x128xbf16>
    %cst_219 = arith.constant dense<0.000000e+00> : vector<1x128xf32>
    %313 = tpu.matmul %310, %312, %cst_219 {dimension_numbers = #tpu.dot_dimension_numbers<[1], [0], [0], [1], [0, 0, 1, 1], [], []>} : vector<1x25xbf16>, vector<25x128xbf16>, vector<1x128xf32> -> vector<1x128xf32>
    %314 = arith.addf %309, %313 : vector<1x128xf32>
    %315 = vector.extract_strided_slice %278 {offsets = [7, 0], sizes = [1, 25], strides = [1, 1]} : vector<16x25xbf16> to vector<1x25xbf16>
    %c7_220 = arith.constant 7 : index
    %c0_221 = arith.constant 0 : index
    %c0_222 = arith.constant 0 : index
    %316 = vector.load %arg8[%c7_220, %c0_221, %c0_222] : memref<16x25x128xbf16, #tpu.memory_space<vmem>>, vector<1x25x128xbf16>
    %317 = vector.shape_cast %316 : vector<1x25x128xbf16> to vector<25x128xbf16>
    %cst_223 = arith.constant dense<0.000000e+00> : vector<1x128xf32>
    %318 = tpu.matmul %315, %317, %cst_223 {dimension_numbers = #tpu.dot_dimension_numbers<[1], [0], [0], [1], [0, 0, 1, 1], [], []>} : vector<1x25xbf16>, vector<25x128xbf16>, vector<1x128xf32> -> vector<1x128xf32>
    %319 = arith.addf %314, %318 : vector<1x128xf32>
    %320 = vector.extract_strided_slice %278 {offsets = [8, 0], sizes = [1, 25], strides = [1, 1]} : vector<16x25xbf16> to vector<1x25xbf16>
    %c8_224 = arith.constant 8 : index
    %c0_225 = arith.constant 0 : index
    %c0_226 = arith.constant 0 : index
    %321 = vector.load %arg8[%c8_224, %c0_225, %c0_226] : memref<16x25x128xbf16, #tpu.memory_space<vmem>>, vector<1x25x128xbf16>
    %322 = vector.shape_cast %321 : vector<1x25x128xbf16> to vector<25x128xbf16>
    %cst_227 = arith.constant dense<0.000000e+00> : vector<1x128xf32>
    %323 = tpu.matmul %320, %322, %cst_227 {dimension_numbers = #tpu.dot_dimension_numbers<[1], [0], [0], [1], [0, 0, 1, 1], [], []>} : vector<1x25xbf16>, vector<25x128xbf16>, vector<1x128xf32> -> vector<1x128xf32>
    %324 = arith.addf %319, %323 : vector<1x128xf32>
    %325 = vector.extract_strided_slice %278 {offsets = [9, 0], sizes = [1, 25], strides = [1, 1]} : vector<16x25xbf16> to vector<1x25xbf16>
    %c9_228 = arith.constant 9 : index
    %c0_229 = arith.constant 0 : index
    %c0_230 = arith.constant 0 : index
    %326 = vector.load %arg8[%c9_228, %c0_229, %c0_230] : memref<16x25x128xbf16, #tpu.memory_space<vmem>>, vector<1x25x128xbf16>
    %327 = vector.shape_cast %326 : vector<1x25x128xbf16> to vector<25x128xbf16>
    %cst_231 = arith.constant dense<0.000000e+00> : vector<1x128xf32>
    %328 = tpu.matmul %325, %327, %cst_231 {dimension_numbers = #tpu.dot_dimension_numbers<[1], [0], [0], [1], [0, 0, 1, 1], [], []>} : vector<1x25xbf16>, vector<25x128xbf16>, vector<1x128xf32> -> vector<1x128xf32>
    %329 = arith.addf %324, %328 : vector<1x128xf32>
    %330 = vector.extract_strided_slice %278 {offsets = [10, 0], sizes = [1, 25], strides = [1, 1]} : vector<16x25xbf16> to vector<1x25xbf16>
    %c10_232 = arith.constant 10 : index
    %c0_233 = arith.constant 0 : index
    %c0_234 = arith.constant 0 : index
    %331 = vector.load %arg8[%c10_232, %c0_233, %c0_234] : memref<16x25x128xbf16, #tpu.memory_space<vmem>>, vector<1x25x128xbf16>
    %332 = vector.shape_cast %331 : vector<1x25x128xbf16> to vector<25x128xbf16>
    %cst_235 = arith.constant dense<0.000000e+00> : vector<1x128xf32>
    %333 = tpu.matmul %330, %332, %cst_235 {dimension_numbers = #tpu.dot_dimension_numbers<[1], [0], [0], [1], [0, 0, 1, 1], [], []>} : vector<1x25xbf16>, vector<25x128xbf16>, vector<1x128xf32> -> vector<1x128xf32>
    %334 = arith.addf %329, %333 : vector<1x128xf32>
    %335 = vector.extract_strided_slice %278 {offsets = [11, 0], sizes = [1, 25], strides = [1, 1]} : vector<16x25xbf16> to vector<1x25xbf16>
    %c11_236 = arith.constant 11 : index
    %c0_237 = arith.constant 0 : index
    %c0_238 = arith.constant 0 : index
    %336 = vector.load %arg8[%c11_236, %c0_237, %c0_238] : memref<16x25x128xbf16, #tpu.memory_space<vmem>>, vector<1x25x128xbf16>
    %337 = vector.shape_cast %336 : vector<1x25x128xbf16> to vector<25x128xbf16>
    %cst_239 = arith.constant dense<0.000000e+00> : vector<1x128xf32>
    %338 = tpu.matmul %335, %337, %cst_239 {dimension_numbers = #tpu.dot_dimension_numbers<[1], [0], [0], [1], [0, 0, 1, 1], [], []>} : vector<1x25xbf16>, vector<25x128xbf16>, vector<1x128xf32> -> vector<1x128xf32>
    %339 = arith.addf %334, %338 : vector<1x128xf32>
    %340 = vector.extract_strided_slice %278 {offsets = [12, 0], sizes = [1, 25], strides = [1, 1]} : vector<16x25xbf16> to vector<1x25xbf16>
    %c12_240 = arith.constant 12 : index
    %c0_241 = arith.constant 0 : index
    %c0_242 = arith.constant 0 : index
    %341 = vector.load %arg8[%c12_240, %c0_241, %c0_242] : memref<16x25x128xbf16, #tpu.memory_space<vmem>>, vector<1x25x128xbf16>
    %342 = vector.shape_cast %341 : vector<1x25x128xbf16> to vector<25x128xbf16>
    %cst_243 = arith.constant dense<0.000000e+00> : vector<1x128xf32>
    %343 = tpu.matmul %340, %342, %cst_243 {dimension_numbers = #tpu.dot_dimension_numbers<[1], [0], [0], [1], [0, 0, 1, 1], [], []>} : vector<1x25xbf16>, vector<25x128xbf16>, vector<1x128xf32> -> vector<1x128xf32>
    %344 = arith.addf %339, %343 : vector<1x128xf32>
    %345 = vector.extract_strided_slice %278 {offsets = [13, 0], sizes = [1, 25], strides = [1, 1]} : vector<16x25xbf16> to vector<1x25xbf16>
    %c13_244 = arith.constant 13 : index
    %c0_245 = arith.constant 0 : index
    %c0_246 = arith.constant 0 : index
    %346 = vector.load %arg8[%c13_244, %c0_245, %c0_246] : memref<16x25x128xbf16, #tpu.memory_space<vmem>>, vector<1x25x128xbf16>
    %347 = vector.shape_cast %346 : vector<1x25x128xbf16> to vector<25x128xbf16>
    %cst_247 = arith.constant dense<0.000000e+00> : vector<1x128xf32>
    %348 = tpu.matmul %345, %347, %cst_247 {dimension_numbers = #tpu.dot_dimension_numbers<[1], [0], [0], [1], [0, 0, 1, 1], [], []>} : vector<1x25xbf16>, vector<25x128xbf16>, vector<1x128xf32> -> vector<1x128xf32>
    %349 = arith.addf %344, %348 : vector<1x128xf32>
    %350 = vector.extract_strided_slice %278 {offsets = [14, 0], sizes = [1, 25], strides = [1, 1]} : vector<16x25xbf16> to vector<1x25xbf16>
    %c14_248 = arith.constant 14 : index
    %c0_249 = arith.constant 0 : index
    %c0_250 = arith.constant 0 : index
    %351 = vector.load %arg8[%c14_248, %c0_249, %c0_250] : memref<16x25x128xbf16, #tpu.memory_space<vmem>>, vector<1x25x128xbf16>
    %352 = vector.shape_cast %351 : vector<1x25x128xbf16> to vector<25x128xbf16>
    %cst_251 = arith.constant dense<0.000000e+00> : vector<1x128xf32>
    %353 = tpu.matmul %350, %352, %cst_251 {dimension_numbers = #tpu.dot_dimension_numbers<[1], [0], [0], [1], [0, 0, 1, 1], [], []>} : vector<1x25xbf16>, vector<25x128xbf16>, vector<1x128xf32> -> vector<1x128xf32>
    %354 = arith.addf %349, %353 : vector<1x128xf32>
    %355 = vector.extract_strided_slice %278 {offsets = [15, 0], sizes = [1, 25], strides = [1, 1]} : vector<16x25xbf16> to vector<1x25xbf16>
    %c15_252 = arith.constant 15 : index
    %c0_253 = arith.constant 0 : index
    %c0_254 = arith.constant 0 : index
    %356 = vector.load %arg8[%c15_252, %c0_253, %c0_254] : memref<16x25x128xbf16, #tpu.memory_space<vmem>>, vector<1x25x128xbf16>
    %357 = vector.shape_cast %356 : vector<1x25x128xbf16> to vector<25x128xbf16>
    %cst_255 = arith.constant dense<0.000000e+00> : vector<1x128xf32>
    %358 = tpu.matmul %355, %357, %cst_255 {dimension_numbers = #tpu.dot_dimension_numbers<[1], [0], [0], [1], [0, 0, 1, 1], [], []>} : vector<1x25xbf16>, vector<25x128xbf16>, vector<1x128xf32> -> vector<1x128xf32>
    %359 = arith.addf %354, %358 : vector<1x128xf32>
    %c0_256 = arith.constant 0 : index
    %c0_257 = arith.constant 0 : index
    %360 = vector.load %arg9[%c0_256, %c0_257] : memref<1x128xf32, #tpu.memory_space<vmem>>, vector<1x128xf32>
    %361 = arith.addf %359, %360 : vector<1x128xf32>
    %362 = arith.negf %361 : vector<1x128xf32>
    %363 = math.exp %362 : vector<1x128xf32>
    %cst_258 = arith.constant 1.000000e+00 : f32
    %364 = vector.broadcast %cst_258 : f32 to vector<1x128xf32>
    %365 = arith.addf %364, %363 : vector<1x128xf32>
    %366 = arith.divf %364, %365 : vector<1x128xf32>
    %367 = arith.truncf %366 : vector<1x128xf32> to vector<1x128xbf16>
    %c0_259 = arith.constant 0 : index
    %c0_260 = arith.constant 0 : index
    %368 = vector.load %arg10[%c0_259, %c0_260] : memref<128x128xbf16, #tpu.memory_space<vmem>>, vector<128x128xbf16>
    %cst_261 = arith.constant dense<0.000000e+00> : vector<1x128xf32>
    %369 = tpu.matmul %367, %368, %cst_261 {dimension_numbers = #tpu.dot_dimension_numbers<[1], [0], [0], [1], [0, 0, 1, 1], [], []>} : vector<1x128xbf16>, vector<128x128xbf16>, vector<1x128xf32> -> vector<1x128xf32>
    %c0_262 = arith.constant 0 : index
    %c0_263 = arith.constant 0 : index
    %370 = vector.load %arg11[%c0_262, %c0_263] : memref<1x128xf32, #tpu.memory_space<vmem>>, vector<1x128xf32>
    %371 = arith.addf %369, %370 : vector<1x128xf32>
    %372 = arith.negf %371 : vector<1x128xf32>
    %373 = math.exp %372 : vector<1x128xf32>
    %cst_264 = arith.constant 1.000000e+00 : f32
    %374 = vector.broadcast %cst_264 : f32 to vector<1x128xf32>
    %375 = arith.addf %374, %373 : vector<1x128xf32>
    %376 = arith.divf %374, %375 : vector<1x128xf32>
    %377 = arith.truncf %376 : vector<1x128xf32> to vector<1x128xbf16>
    %c0_265 = arith.constant 0 : index
    %c0_266 = arith.constant 0 : index
    %378 = vector.load %arg12[%c0_265, %c0_266] : memref<128x128xbf16, #tpu.memory_space<vmem>>, vector<128x128xbf16>
    %cst_267 = arith.constant dense<0.000000e+00> : vector<1x128xf32>
    %379 = tpu.matmul %377, %378, %cst_267 {dimension_numbers = #tpu.dot_dimension_numbers<[1], [0], [0], [1], [0, 0, 1, 1], [], []>} : vector<1x128xbf16>, vector<128x128xbf16>, vector<1x128xf32> -> vector<1x128xf32>
    %c0_268 = arith.constant 0 : index
    %c0_269 = arith.constant 0 : index
    %380 = vector.load %arg13[%c0_268, %c0_269] : memref<1x128xf32, #tpu.memory_space<vmem>>, vector<1x128xf32>
    %381 = arith.addf %379, %380 : vector<1x128xf32>
    %c0_270 = arith.constant 0 : index
    %c0_271 = arith.constant 0 : index
    %c0_272 = arith.constant 0 : index
    %382 = vector.load %arg14[%c0_270, %c0_271, %c0_272] : memref<1x1x128xf32, #tpu.memory_space<vmem>>, vector<1x1x128xf32>
    %383 = vector.shape_cast %382 : vector<1x1x128xf32> to vector<1x128xf32>
    %384 = vector.shape_cast %381 : vector<1x128xf32> to vector<1x1x128xf32>
    tpu.vector_store %arg14[%c0_270, %c0_271, %c0_272], %384 {strides = array<i32>} : memref<1x1x128xf32, #tpu.memory_space<vmem>>, vector<1x1x128xf32>,
    return
  }
  func.func @transform_0(%arg0: i32) -> (i32, i32, i32) {
    %c0_i32 = arith.constant 0 : i32
    %c0_i32_0 = arith.constant 0 : i32
    %c0_i32_1 = arith.constant 0 : i32
    return %arg0, %c0_i32, %c0_i32_0 : i32, i32, i32
  }
  func.func @transform_1(%arg0: i32) -> (i32, i32, i32) {
    %c0_i32 = arith.constant 0 : i32
    %c0_i32_0 = arith.constant 0 : i32
    %c0_i32_1 = arith.constant 0 : i32
    %c0_i32_2 = arith.constant 0 : i32
    return %c0_i32, %c0_i32_0, %c0_i32_1 : i32, i32, i32
  }
  func.func @transform_2(%arg0: i32) -> (i32, i32) {
    %c0_i32 = arith.constant 0 : i32
    %c0_i32_0 = arith.constant 0 : i32
    %c0_i32_1 = arith.constant 0 : i32
    return %c0_i32, %c0_i32_0 : i32, i32
  }
  func.func @transform_3(%arg0: i32) -> (i32, i32) {
    %c0_i32 = arith.constant 0 : i32
    %c0_i32_0 = arith.constant 0 : i32
    %c0_i32_1 = arith.constant 0 : i32
    return %c0_i32, %c0_i32_0 : i32, i32
  }
  func.func @transform_4(%arg0: i32) -> (i32, i32, i32) {
    %c0_i32 = arith.constant 0 : i32
    %c0_i32_0 = arith.constant 0 : i32
    %c0_i32_1 = arith.constant 0 : i32
    %c0_i32_2 = arith.constant 0 : i32
    return %c0_i32, %c0_i32_0, %c0_i32_1 : i32, i32, i32
  }
  func.func @transform_5(%arg0: i32) -> (i32, i32) {
    %c0_i32 = arith.constant 0 : i32
    %c0_i32_0 = arith.constant 0 : i32
    %c0_i32_1 = arith.constant 0 : i32
    return %c0_i32, %c0_i32_0 : i32, i32
  }
  func.func @transform_6(%arg0: i32) -> (i32, i32) {
    %c0_i32 = arith.constant 0 : i32
    %c0_i32_0 = arith.constant 0 : i32
    %c0_i32_1 = arith.constant 0 : i32
    return %c0_i32, %c0_i32_0 : i32, i32
  }
  func.func @transform_7(%arg0: i32) -> (i32, i32, i32) {
    %c0_i32 = arith.constant 0 : i32
    %c0_i32_0 = arith.constant 0 : i32
    %c0_i32_1 = arith.constant 0 : i32
    %c0_i32_2 = arith.constant 0 : i32
    return %c0_i32, %c0_i32_0, %c0_i32_1 : i32, i32, i32
  }
  func.func @transform_8(%arg0: i32) -> (i32, i32) {
    %c0_i32 = arith.constant 0 : i32
    %c0_i32_0 = arith.constant 0 : i32
    %c0_i32_1 = arith.constant 0 : i32
    return %c0_i32, %c0_i32_0 : i32, i32
  }
  func.func @transform_9(%arg0: i32) -> (i32, i32) {
    %c0_i32 = arith.constant 0 : i32
    %c0_i32_0 = arith.constant 0 : i32
    %c0_i32_1 = arith.constant 0 : i32
    return %c0_i32, %c0_i32_0 : i32, i32
  }
  func.func @transform_10(%arg0: i32) -> (i32, i32) {
    %c0_i32 = arith.constant 0 : i32
    %c0_i32_0 = arith.constant 0 : i32
    %c0_i32_1 = arith.constant 0 : i32
    return %c0_i32, %c0_i32_0 : i32, i32
  }
  func.func @transform_11(%arg0: i32) -> (i32, i32) {
    %c0_i32 = arith.constant 0 : i32
    %c0_i32_0 = arith.constant 0 : i32
    %c0_i32_1 = arith.constant 0 : i32
    return %c0_i32, %c0_i32_0 : i32, i32
  }
  func.func @transform_12(%arg0: i32) -> (i32, i32) {
    %c0_i32 = arith.constant 0 : i32
    %c0_i32_0 = arith.constant 0 : i32
    %c0_i32_1 = arith.constant 0 : i32
    return %c0_i32, %c0_i32_0 : i32, i32
  }
  func.func @transform_13(%arg0: i32) -> (i32, i32, i32) {
    %c0_i32 = arith.constant 0 : i32
    %c0_i32_0 = arith.constant 0 : i32
    %c0_i32_1 = arith.constant 0 : i32
    return %arg0, %c0_i32, %c0_i32_0 : i32, i32, i32
  }
}

</mosaic_0001>

<bundles_post_ra>
// kernel: lenet_forward.1
= control target key start
LH: loop header
LB: loop body
LE: loop exit
PB: predicated region body
PF: predicated region fallthrough
CT: control target
= control target key end

     0   :  { %s11479_s0 = inlined_call_operand.vmem [shape: f32[2,8,1152], index: 0, kind: input, shape index: {}]   ;;  %s11480_s1 = inlined_call_operand.vmem [shape: bf16[25,8,8], index: 1, kind: input, shape index: {}]   ;;  %s11481_s2 = inlined_call_operand.vmem [shape: f32[8,1], index: 2, kind: input, shape index: {}]   ;;  %s11482_s3 = inlined_call_operand.hbm [shape: bf16[896,256], index: 3, kind: input, shape index: {}]   ;;  %s11483_s4 = inlined_call_operand.vmem [shape: bf16[25,16,8], index: 4, kind: input, shape index: {}]   ;;  %s11484_s5 = inlined_call_operand.vmem [shape: f32[16,1], index: 5, kind: input, shape index: {}]   ;;  %s11485_s6 = inlined_call_operand.vmem [shape: bf16[140,25], index: 6, kind: input, shape index: {}]   ;;  %s11486_s7 = inlined_call_operand.vmem [shape: bf16[16,25,128], index: 7, kind: input, shape index: {}]   ;;  %s11487_s8 = inlined_call_operand.vmem [shape: f32[1,128], index: 8, kind: input, shape index: {}]   ;;  %s11488_s9 = inlined_call_operand.vmem [shape: bf16[128,128], index: 9, kind: input, shape index: {}]   ;;  %s11489_s10 = inlined_call_operand.vmem [shape: f32[1,128], index: 10, kind: input, shape index: {}]   ;;  %s11490_s11 = inlined_call_operand.vmem [shape: bf16[128,128], index: 11, kind: input, shape index: {}]   ;;  %s11491_s12 = inlined_call_operand.vmem [shape: f32[1,128], index: 12, kind: input, shape index: {}]   ;;  %s11492_s13 = inlined_call_operand.hbm [shape: f32[2,1,128], index: 13, kind: output, shape index: {}]  }
   0x1   :  { %11509 = sst [smem:[#allocation22_spill]] %s11479_s0 }
   0x2   :  { %11510 = sst [smem:[#allocation23_spill]] %s11480_s1 }
   0x3   :  { %11511 = sst [smem:[#allocation24_spill]] %s11481_s2 }
   0x4   :  { %11512 = sst [smem:[#allocation25_spill]] %s11482_s3 }
   0x5   :  { %18 = vsyncpa [#allocation3], 0 }
   0x6   :  { %19 = vsyncpa [#allocation4], 0 }
   0x7   :  { %21 = vsyncpa [#allocation4 + $0x1], 0  ;;  %s8965_s25 = smov 0   ;;  %s8967_s26 = smov 0  }
   0x8   :  { %s8969_s27 = smov 0   ;;  %s8971_s28 = smov 0  }
   0x9 LB: > { %s8986_s29 = sadd.s32 4294967295, %s8850_s28   ;;  %s7276_s30 = sadd.s32 4294967294, %s8850_s28   ;;  %s8850_s28 = sphi %s8971_s28, %s11551_s28   ;;  %s8846_s27 = sphi %s8969_s27, %s11550_s27   ;;  %s8842_s26 = sphi %s8967_s26, %s11549_s26   ;;  %s8838_s25 = sphi %s8965_s25, %s11548_s25  }
   0xa   : > { %s8990_s14 = sadd.s32 1, %s8850_s28   ;;  %s312_s15 = sadd.s32 1, %s8846_s27 }
   0xb   : > { %s309_s16 = ssub.s32 %s8850_s28, %s8990_s14  ;;  %p322_p0 = scmp.ne.s32.totalorder %s8846_s27, %s8842_s26 }
   0xc   : > { %p310_p1 = scmp.eq.s32.totalorder %s309_s16, 0  ;;  %p323_p2 = scmp.eq.s32.totalorder %s8986_s29, 1 }
   0xd   : > { %p328_p3 = scmp.ne.s32.totalorder %s8842_s26, %s8838_s25  ;;  %p329_p4 = scmp.eq.s32.totalorder %s7276_s30, 1 }
   0xe   : > { %s9001_s17 = scalar_select %p310_p1, %s8846_s27, %s312_s15  }
   0xf   : > { %p9003_p5 = por %p323_p2, %p322_p0  ;;  %p9007_p6 = por %p329_p4, %p328_p3 }
  0x10   : > { %p7277_p7 = scmp.ge.s32.totalorder %s8850_s28, 1  ;;  %p336_p8 = scmp.lt.s32.totalorder %s8850_s28, 3 }
  0x11   : > { %p8650_p9 = scmp.eq.s32.totalorder %s8986_s29, 0  ;;  %s11515_s3 = sld [smem:[#allocation25_spill]] }
  0x12   : > { %p337_p10 = pnand %p7277_p7, %p336_p8  ;;  %s8852_s23 = smov [#allocation2]  }
  0x13   : > { %s355_s24 = sshll.u32 %s8852_s23, 4  ;;  %s8853_s30 = smov 128   ;;  %s356_s24 = int_to_ptr.vmem [resolvable:$true] %s355_s24 }
  0x14   : > { %p8642_p11 = pneg %p337_p10  ;;  %s8854_s15 = smov 8  }
  0x15   : > { %406 = sbr.rel (%p337_p10) target bundleno = 2351 (0x92f), region = 72 }
  0x16   : > { %p8643_p12 = pnand %p8650_p9, %p8642_p11 }
  0x17   : > { %s353_s22 = sshll.u32 %s11515_s3, 4  ;;  %s354_s22 = int_to_ptr.hbm [resolvable:$true] %s353_s22 }
  0x18   : > { %8645 = dma.hbm_to_vmem [thread:$0]  (!%p8643_p12), %s354_s22, 14336, %s356_s24, [#allocation3], %s8853_s30, %s8853_s30, %s8854_s15  }
  0x1a   : > { %8829 = dma.done.wait (%p8650_p9), [#allocation3], 14336  }
  0x1b   : > { %8831 = vsyncadd (%p8650_p9), [#allocation3], 4294952960  ;;  %p450_p13 = scmp.lt.s32.totalorder %s8986_s29, 1  ;;  %s11516_s0 = sld [smem:[#allocation22_spill]]  ;;  %vm509_vm0 = vcmask 1039360   ;;  %vm521_vm1 = vcmask 1043456  }
  0x1c   : > { %s8855_s22 = smov 127   ;;  %s8856_s24 = smov 126   ;;  %vm517_vm2 = vcmask 64512   ;;  %vm767_vm3 = vcmask 1031168   ;;  %vm915_vm4 = vcmask 1022976   ;;  %vm1063_vm5 = vcmask 1014784  }
  0x1d   : > { %s451_s16 = scalar_select %p450_p13, %s8986_s29, 1  ;;  %vm1211_vm6 = vcmask 785408   ;;  %vm1359_vm7 = vcmask 777216   ;;  %vm1507_vm8 = vcmask 769024   ;;  %vm1655_vm9 = vcmask 760832  }
  0x1e   : > { %s8857_s30 = smov 125   ;;  %s8858_s15 = smov 124   ;;  %vm1803_vm10 = vcmask 752640   ;;  %vm1951_vm11 = vcmask 523264   ;;  %vm2099_vm12 = vcmask 515072   ;;  %vm2247_vm13 = vcmask 506880  }
  0x1f   : > { %s8635_s20 = smul.u32 72, %s451_s16  ;;  %s11493_s16 = smov 96   ;;  %vm2395_vm14 = vcmask 498688   ;;  %vm2543_vm15 = vcmask 490496  }
  0x20   : > { %s11517_s1 = sld [smem:[#allocation23_spill]]  ;;  %s8860_s23 = smov 95  }
  0x21   : > { %s9028_s3 = scalar_lea.vmem %s11516_s0, %s8635_s20  ;;  %s8862_s20 = smov 93  }
  0x22   : > { %v460_v0 = vld [vmem:[%s9028_s3 + $0x20] sm:$0xff]  ;;  %v461_v1 = vld [vmem:[%s9028_s3 + $0x28] sm:$0xff]  ;;  %v458_v5 = vld [vmem:[%s9028_s3 + $0x10] sm:$0xff]  ;;  %s8864_s21 = smov 64   ;;  %s11535_s2 = sld [smem:[#allocation24_spill]] }
  0x23   : > { %v456_v2 = vld [vmem:[%s9028_s3] sm:$0xff]  ;;  %v467_v3 = vpack.c.bf16 %v461_v1, %v460_v0  ;;  %v457_v4 = vld [vmem:[%s9028_s3 + $0x8] sm:$0xff]  ;;  %v459_v6 = vld [vmem:[%s9028_s3 + $0x18] sm:$0xff] }
  0x24   : > { %v465_v7 = vpack.c.bf16 %v457_v4, %v456_v2  ;;  %v466_v11 = vpack.c.bf16 %v459_v6, %v458_v5  ;;  %v462_v18 = vld [vmem:[%s9028_s3 + $0x30] sm:$0xff]  ;;  %v463_v19 = vld [vmem:[%s9028_s3 + $0x38] sm:$0xff] }
  0x25   : > { %v481_v8 = vunpack.c.l.b16 %v467_v3  ;;  %v482_v15 = vunpack.c.h.b16 %v467_v3  ;;  %v468_v23 = vpack.c.bf16 %v463_v19, %v462_v18 }
  0x26   : > { %v478_v9 = vunpack.c.h.b16 %v465_v7  ;;  %v477_v10 = vunpack.c.l.b16 %v465_v7  ;;  %v479_v16 = vunpack.c.l.b16 %v466_v11  ;;  %v480_v17 = vunpack.c.h.b16 %v466_v11  ;;  %v9144_v33 = vld [vmem:[%s11517_s1 + $0x4] sm:$0xf]  ;;  %v9168_v40 = vld [vmem:[%s11517_s1] sm:$0xf] }
  0x27   : > { %v9036_v12 = vpack.c.b16 %v481_v8, %v481_v8  ;;  %v9050_v20 = vpack.c.b16 %v482_v15, %v482_v15  ;;  %v483_v24 = vunpack.c.l.b16 %v468_v23  ;;  %v484_v25 = vunpack.c.h.b16 %v468_v23  ;;  %v9276_v8 = vld [vmem:[%s11517_s1 + $0x8] sm:$0xf] }
  0x28   : > { %v9038_v13 = vpack.c.b16 %v478_v9, %v478_v9  ;;  %v9040_v14 = vpack.c.b16 %v477_v10, %v477_v10  ;;  %v9052_v21 = vpack.c.b16 %v479_v16, %v479_v16  ;;  %v9054_v22 = vpack.c.b16 %v480_v17, %v480_v17 }
  0x29   : > { %501 = vrot.lane.b32.xlu2 %v9036_v12, %s8855_s22  ;;  %v9062_v26 = vpack.c.b16 %v483_v24, %v483_v24  ;;  %v9064_v27 = vpack.c.b16 %v484_v25, %v484_v25  ;;  %v9149_v34 = vsel %vm521_vm1, %v9050_v20, 0  ;;  %v9256_v2 = vsel %vm521_vm1, %v9036_v12, 0 }
  0x2a   : > { %495 = vrot.lane.b32.xlu0 %v9038_v13, %s8855_s22  ;;  %493 = vrot.lane.b32.xlu1 %v9040_v14, %s8855_s22  ;;  %v9135_v31 = vsel %vm521_vm1, %v9038_v13, 0  ;;  %v638_v50 = vsel %vm521_vm1, %v9040_v14, 0  ;;  %v9213_v56 = vsel %vm521_vm1, %v9052_v21, 0  ;;  %v9230_v59 = vsel %vm521_vm1, %v9054_v22, 0 }
  0x2b   : > { %v9234_v60 = vsel %vm521_vm1, %v9062_v26, 0 }
  0x31   : > { %503 = vrot.lane.b32.xlu2 %v9050_v20, %s8855_s22 }
  0x32   : > { %497 = vrot.lane.b32.xlu0 %v9052_v21, %s8855_s22  ;;  %499 = vrot.lane.b32.xlu1 %v9054_v22, %s8855_s22 }
  0x39   : > { %753 = vrot.lane.b32.xlu2 %v9038_v13, %s8856_s24 }
  0x3a   : > { %505 = vrot.lane.b32.xlu0 %v9062_v26, %s8855_s22  ;;  %507 = vrot.lane.b32.xlu1 %v9064_v27, %s8855_s22 }
  0x41   : > { %757 = vrot.lane.b32.xlu2 %v9054_v22, %s8856_s24 }
  0x42   : > { %755 = vrot.lane.b32.xlu0 %v9052_v21, %s8856_s24  ;;  %751 = vrot.lane.b32.xlu1 %v9040_v14, %s8856_s24 }
  0x49   : > { %763 = vrot.lane.b32.xlu2 %v9062_v26, %s8856_s24 }
  0x4a   : > { %759 = vrot.lane.b32.xlu0 %v9036_v12, %s8856_s24  ;;  %761 = vrot.lane.b32.xlu1 %v9050_v20, %s8856_s24 }
  0x51   : > { %901 = vrot.lane.b32.xlu2 %v9038_v13, %s8857_s30 }
  0x52   : > { %765 = vrot.lane.b32.xlu0 %v9064_v27, %s8856_s24  ;;  %899 = vrot.lane.b32.xlu1 %v9040_v14, %s8857_s30 }
  0x59   : > { %907 = vrot.lane.b32.xlu2 %v9036_v12, %s8857_s30 }
  0x5a   : > { %903 = vrot.lane.b32.xlu0 %v9052_v21, %s8857_s30  ;;  %905 = vrot.lane.b32.xlu1 %v9054_v22, %s8857_s30 }
  0x61   : > { %913 = vrot.lane.b32.xlu2 %v9064_v27, %s8857_s30 }
  0x62   : > { %909 = vrot.lane.b32.xlu0 %v9050_v20, %s8857_s30  ;;  %911 = vrot.lane.b32.xlu1 %v9062_v26, %s8857_s30 }
  0x69   : > { %1051 = vrot.lane.b32.xlu2 %v9052_v21, %s8858_s15 }
  0x6a   : > { %1047 = vrot.lane.b32.xlu0 %v9040_v14, %s8858_s15  ;;  %1049 = vrot.lane.b32.xlu1 %v9038_v13, %s8858_s15 }
  0x71   : > { %1057 = vrot.lane.b32.xlu2 %v9050_v20, %s8858_s15 }
  0x72   : > { %1053 = vrot.lane.b32.xlu0 %v9054_v22, %s8858_s15  ;;  %1055 = vrot.lane.b32.xlu1 %v9036_v12, %s8858_s15 }
  0x79   : > { %1197 = vrot.lane.b32.xlu2 %v9038_v13, %s11493_s16 }
  0x7a   : > { %1059 = vrot.lane.b32.xlu0 %v9062_v26, %s8858_s15  ;;  %1195 = vrot.lane.b32.xlu1 %v9040_v14, %s11493_s16 }
  0x81   : > { %1201 = vrot.lane.b32.xlu2 %v9054_v22, %s11493_s16 }
  0x82   : > { %1061 = vrot.lane.b32.xlu0 %v9064_v27, %s8858_s15  ;;  %1199 = vrot.lane.b32.xlu1 %v9052_v21, %s11493_s16 }
  0x83   : > { %v502_v28 = vpop.permute.xlu2 %501 }
  0x89   : > { %1207 = vrot.lane.b32.xlu2 %v9062_v26, %s11493_s16 }
  0x8a   : > { %1203 = vrot.lane.b32.xlu0 %v9036_v12, %s11493_s16  ;;  %1205 = vrot.lane.b32.xlu1 %v9050_v20, %s11493_s16 }
  0x8b   : > { %v504_v29 = vpop.permute.xlu2 %503 }
  0x8c   : > { %v514_v30 = vsel %vm509_vm0, %v502_v28, %v504_v29 }
  0x8d   : > { %v9138_v32 = vsel %vm521_vm1, %v514_v30, 0 }
  0x8e   : > { %602 = vmatpush.bf16.msra.mxu0 %v9138_v32 }
  0x91   : > { %7288 = vmatmul.msk.bf16.vlgmr.msra.gmra.mxu0 %vm517_vm2, %v9144_v33  ;;  %1347 = vrot.lane.b32.xlu2 %v9052_v21, %s8860_s23 }
  0x92   : > { %678 = vmatpush.bf16.msrb.mxu0 %v9135_v31  ;;  %1209 = vrot.lane.b32.xlu0 %v9064_v27, %s11493_s16  ;;  %s8863_s16 = smov 92  }
  0x93   : > { %1345 = vrot.lane.b32.xlu1 %v9038_v13, %s8860_s23  ;;  %v9158_v35 = vpop.permute.xlu2 %753 }
  0x96   : > { %730 = vmatpush.bf16.msra.mxu0 %v9149_v34 }
  0x99   : > { %1351 = vrot.lane.b32.xlu2 %v9036_v12, %s8860_s23 }
  0x9a   : > { %1343 = vrot.lane.b32.xlu0 %v9040_v14, %s8860_s23 }
  0x9b   : > { %1349 = vrot.lane.b32.xlu1 %v9054_v22, %s8860_s23  ;;  %v9170_v41 = vpop.permute.xlu2 %757 }
  0x9c   : > { %v496_v36 = vpop.permute.xlu0 %495  ;;  %v494_v37 = vpop.permute.xlu1 %493 }
  0x9d   : > { %v510_v38 = vsel %vm509_vm0, %v494_v37, %v496_v36 }
  0x9e   : > { %v523_v39 = vsel %vm521_vm1, %v510_v38, 0 }
  0x9f   : > { %550 = vmatpush.bf16.msra.mxu2 %v523_v39 }
  0xa1   : > { %1357 = vrot.lane.b32.xlu2 %v9064_v27, %s8860_s23  ;;  %7292 = vmatmul.msk.bf16.vlgmr.msrb.gmra.mxu0 %vm517_vm2, %v9168_v40 }
  0xa2   : > { %1353 = vrot.lane.b32.xlu0 %v9050_v20, %s8860_s23  ;;  %7284 = vmatmul.msk.bf16.vlgmr.msra.gmra.mxu2 %vm517_vm2, %v9144_v33 }
  0xa3   : > { %1355 = vrot.lane.b32.xlu1 %v9062_v26, %s8860_s23  ;;  %v9196_v51 = vpop.permute.xlu2 %763  ;;  %s8861_s23 = smov 94  }
  0xa4   : > { %v498_v42 = vpop.permute.xlu0 %497  ;;  %v500_v43 = vpop.permute.xlu1 %499 }
  0xa5   : > { %v511_v44 = vsel %vm509_vm0, %v496_v36, %v498_v42  ;;  %v512_v45 = vsel %vm509_vm0, %v498_v42, %v500_v43  ;;  %v513_v46 = vsel %vm509_vm0, %v500_v43, %v502_v28 }
  0xa6   : > { %v9183_v47 = vsel %vm521_vm1, %v511_v44, 0  ;;  %v9186_v48 = vsel %vm521_vm1, %v512_v45, 0  ;;  %v9189_v49 = vsel %vm521_vm1, %v513_v46, 0 }
  0xa7   : > { %563 = vmatpush.bf16.msra.mxu3 %v9183_v47  ;;  %576 = vmatpush.bf16.msrb.mxu2 %v9186_v48 }
  0xa9   : > { %1495 = vrot.lane.b32.xlu2 %v9052_v21, %s8861_s23 }
  0xaa   : > { %7285 = vmatmul.msk.bf16.vlgmr.msra.gmra.mxu3 %vm517_vm2, %v9144_v33  ;;  %1491 = vrot.lane.b32.xlu0 %v9040_v14, %s8861_s23 }
  0xab   : > { %589 = vmatpush.bf16.msrb.mxu3 %v9189_v49  ;;  %1493 = vrot.lane.b32.xlu1 %v9038_v13, %s8861_s23  ;;  %v9240_v61 = vpop.permute.xlu2 %901 }
  0xac   : > { %v506_v52 = vpop.permute.xlu0 %505  ;;  %v9206_v53 = vpop.permute.xlu1 %507 }
  0xad   : > { %v516_v54 = vsel %vm509_vm0, %v506_v52, %v9206_v53  ;;  %v515_v55 = vsel %vm509_vm0, %v504_v29, %v506_v52 }
  0xae   : > { %v9216_v57 = vsel %vm521_vm1, %v515_v55, 0  ;;  %v9219_v58 = vsel %vm521_vm1, %v516_v54, 0 }
  0xaf   : > { %665 = vmatpush.bf16.msra.mxu3 %v638_v50  ;;  %615 = vmatpush.bf16.msra.mxu1 %v9216_v57 }
  0xb0   : > { %628 = vmatpush.bf16.msra.mxu2 %v9219_v58 }
  0xb1   : > { %1501 = vrot.lane.b32.xlu2 %v9050_v20, %s8861_s23  ;;  %7296 = vmatmul.msk.bf16.vlgmr.msra.gmra.mxu0 %vm517_vm2, %v9168_v40 }
  0xb2   : > { %7289 = vmatmul.msk.bf16.vlgmr.msra.gmra.mxu1 %vm517_vm2, %v9144_v33  ;;  %1497 = vrot.lane.b32.xlu0 %v9054_v22, %s8861_s23 }
  0xb3   : > { %691 = vmatpush.bf16.msrb.mxu1 %v9213_v56  ;;  %1499 = vrot.lane.b32.xlu1 %v9036_v12, %s8861_s23  ;;  %v9267_v5 = vpop.permute.xlu2 %907 }
  0xb4   : > { %7286 = vmatmul.msk.bf16.vlgmr.msrb.gmra.mxu2 %vm517_vm2, %v9144_v33  ;;  %v756_v62 = vpop.permute.xlu0 %755  ;;  %v752_v63 = vpop.permute.xlu1 %751 }
  0xb5   : > { %704 = vmatpush.bf16.msrb.mxu2 %v9230_v59  ;;  %v770_v0 = vsel %vm767_vm3, %v756_v62, %v9170_v41  ;;  %v768_v6 = vsel %vm767_vm3, %v752_v63, %v9158_v35  ;;  %v769_v16 = vsel %vm767_vm3, %v9158_v35, %v756_v62 }
  0xb6   : > { %v9251_v1 = vsel %vm521_vm1, %v770_v0, 0  ;;  %v779_v9 = vsel %vm521_vm1, %v768_v6, 0  ;;  %v9309_v23 = vsel %vm521_vm1, %v769_v16, 0  ;;  %v9432_v16 = vld [vmem:[%s11517_s1 + $0x10] sm:$0xf] }
  0xb7   : > { %743 = vmatpush.bf16.msra.mxu1 %v9234_v60  ;;  %832 = vmatpush.bf16.msrb.mxu0 %v9251_v1 }
  0xb9   : > { %1639 = vrot.lane.b32.xlu2 %v9040_v14, %s8862_s20 }
  0xba   : > { %1503 = vrot.lane.b32.xlu0 %v9062_v26, %s8861_s23  ;;  %7287 = vmatmul.msk.bf16.vlgmr.msrb.gmra.mxu3 %vm517_vm2, %v9144_v33 }
  0xbb   : > { %1505 = vrot.lane.b32.xlu1 %v9064_v27, %s8861_s23  ;;  %717 = vmatpush.bf16.msrb.mxu3 %v9256_v2  ;;  %v9305_v19 = vpop.permute.xlu2 %913  ;;  %s8866_s23 = smov 62  }
  0xbc   : > { %v760_v3 = vpop.permute.xlu0 %759  ;;  %v762_v4 = vpop.permute.xlu1 %761  ;;  %11519 = vst [vmem:[#allocation9_spill] sm:$0xff] %v9305_v19 }
  0xbd   : > { %v771_v7 = vsel %vm767_vm3, %v9170_v41, %v760_v3  ;;  %v772_v29 = vsel %vm767_vm3, %v760_v3, %v762_v4  ;;  %v773_v41 = vsel %vm767_vm3, %v762_v4, %v9196_v51 }
  0xbe   : > { %v9284_v10 = vsel %vm521_vm1, %v771_v7, 0  ;;  %v9337_v37 = vsel %vm521_vm1, %v772_v29, 0  ;;  %v9353_v42 = vsel %vm521_vm1, %v773_v41, 0 }
  0xbf   : > { %11521 = vst [vmem:[#allocation11_spill] sm:$0xff] %v9353_v42 }
  0xc1   : > { %7301 = vmatmul.msk.bf16.vlgmr.msrb.gmra.mxu0 %vm517_vm2, %v9276_v8  ;;  %1645 = vrot.lane.b32.xlu2 %v9054_v22, %s8862_s20 }
  0xc2   : > { %7293 = vmatmul.msk.bf16.vlgmr.msrb.gmra.mxu1 %vm517_vm2, %v9168_v40  ;;  %1641 = vrot.lane.b32.xlu0 %v9038_v13, %s8862_s20 }
  0xc3   : > { %1643 = vrot.lane.b32.xlu1 %v9052_v21, %s8862_s20  ;;  %845 = vmatpush.bf16.msrb.mxu1 %v9284_v10  ;;  %v9329_v35 = vpop.permute.xlu2 %1051 }
  0xc4   : > { %7290 = vmatmul.msk.bf16.vlgmr.msra.gmra.mxu2 %vm517_vm2, %v9144_v33  ;;  %v9294_v11 = vpop.permute.xlu0 %765  ;;  %v900_v15 = vpop.permute.xlu1 %899 }
  0xc5   : > { %806 = vmatpush.bf16.msra.mxu2 %v779_v9  ;;  %v774_v17 = vsel %vm767_vm3, %v9196_v51, %v9294_v11  ;;  %v916_v30 = vsel %vm915_vm4, %v900_v15, %v9240_v61 }
  0xc6   : > { %v9303_v18 = vsel %vm521_vm1, %v774_v17, 0  ;;  %v927_v36 = vsel %vm521_vm1, %v916_v30, 0 }
  0xc7   : > { %11518 = vst [vmem:[#allocation8_spill] sm:$0xff] %v9303_v18  ;;  %884 = vmatpush.bf16.msra.mxu0 %v9303_v18 }
  0xc9   : > { %1651 = vrot.lane.b32.xlu2 %v9062_v26, %s8862_s20 }
  0xca   : > { %1647 = vrot.lane.b32.xlu0 %v9036_v12, %s8862_s20  ;;  %7291 = vmatmul.msk.bf16.vlgmr.msra.gmra.mxu3 %vm517_vm2, %v9168_v40 }
  0xcb   : > { %1649 = vrot.lane.b32.xlu1 %v9050_v20, %s8862_s20  ;;  %819 = vmatpush.bf16.msra.mxu3 %v9309_v23  ;;  %v9361_v43 = vpop.permute.xlu2 %1057 }
  0xcc   : > { %v904_v24 = vpop.permute.xlu0 %903  ;;  %v906_v25 = vpop.permute.xlu1 %905 }
  0xcd   : > { %v919_v28 = vsel %vm915_vm4, %v906_v25, %v9267_v5  ;;  %v917_v50 = vsel %vm915_vm4, %v9240_v61, %v904_v24  ;;  %v918_v63 = vsel %vm915_vm4, %v904_v24, %v906_v25 }
  0xce   : > { %v9326_v33 = vsel %vm521_vm1, %v919_v28, 0  ;;  %v9382_v54 = vsel %vm521_vm1, %v917_v50, 0 }
  0xcf   : > { %11520 = vst [vmem:[#allocation10_spill] sm:$0xff] %v9326_v33  ;;  %993 = vmatpush.bf16.msrb.mxu0 %v9326_v33 }
  0xd0   : > { %11522 = vst [vmem:[#allocation12_spill] sm:$0xff] %v9382_v54 }
  0xd1   : > { %7305 = vmatmul.msk.bf16.vlgmr.msra.gmra.mxu0 %vm517_vm2, %v9276_v8  ;;  %1653 = vrot.lane.b32.xlu2 %v9064_v27, %s8862_s20  ;;  %s8865_s20 = smov 63  }
  0xd2   : > { %7297 = vmatmul.msk.bf16.vlgmr.msra.gmra.mxu1 %vm517_vm2, %v9168_v40  ;;  %1787 = vrot.lane.b32.xlu0 %v9040_v14, %s8863_s16 }
  0xd3   : > { %1789 = vrot.lane.b32.xlu1 %v9038_v13, %s8863_s16  ;;  %954 = vmatpush.bf16.msra.mxu1 %v927_v36  ;;  %v9402_v0 = vpop.permute.xlu2 %1197 }
  0xd4   : > { %7294 = vmatmul.msk.bf16.vlgmr.msrb.gmra.mxu2 %vm517_vm2, %v9168_v40  ;;  %v910_v38 = vpop.permute.xlu0 %909  ;;  %v9347_v39 = vpop.permute.xlu1 %911 }
  0xd5   : > { %858 = vmatpush.bf16.msrb.mxu2 %v9337_v37  ;;  %v920_v51 = vsel %vm915_vm4, %v9267_v5, %v910_v38  ;;  %v9412_v5 = vsel %vm521_vm1, %v918_v63, 0  ;;  %v921_v9 = vsel %vm915_vm4, %v910_v38, %v9347_v39  ;;  %v922_v30 = vsel %vm915_vm4, %v9347_v39, %v9305_v19 }
  0xd6   : > { %v9385_v55 = vsel %vm521_vm1, %v920_v51, 0  ;;  %11524 = vst [vmem:[#allocation14_spill] sm:$0xff] %v9412_v5  ;;  %v9441_v24 = vsel %vm521_vm1, %v921_v9, 0  ;;  %v9465_v41 = vsel %vm521_vm1, %v922_v30, 0 }
  0xd7   : > { %11525 = vst [vmem:[#allocation15_spill] sm:$0xff] %v9441_v24 }
  0xd8   : > { %11527 = vst [vmem:[#allocation17_spill] sm:$0xff] %v9465_v41 }
  0xd9   : > { %1795 = vrot.lane.b32.xlu2 %v9036_v12, %s8863_s16 }
  0xda   : > { %1791 = vrot.lane.b32.xlu0 %v9052_v21, %s8863_s16  ;;  %7295 = vmatmul.msk.bf16.vlgmr.msrb.gmra.mxu3 %vm517_vm2, %v9168_v40  ;;  %v9374_v40 = vld [vmem:[%s11517_s1 + $0xc] sm:$0xf] }
  0xdb   : > { %1793 = vrot.lane.b32.xlu1 %v9054_v22, %s8863_s16  ;;  %871 = vmatpush.bf16.msrb.mxu3 %v9353_v42  ;;  %v9434_v17 = vpop.permute.xlu2 %1201 }
  0xdc   : > { %v1048_v44 = vpop.permute.xlu0 %1047  ;;  %v1050_v45 = vpop.permute.xlu1 %1049 }
  0xdd   : > { %v1064_v46 = vsel %vm1063_vm5, %v1048_v44, %v1050_v45  ;;  %v1065_v15 = vsel %vm1063_vm5, %v1050_v45, %v9329_v35 }
  0xde   : > { %v1075_v52 = vsel %vm521_vm1, %v1064_v46, 0  ;;  %v9444_v25 = vsel %vm521_vm1, %v1065_v15, 0 }
  0xdf   : > { %1102 = vmatpush.bf16.msra.mxu0 %v1075_v52 }
  0xe1   : > { %1801 = vrot.lane.b32.xlu2 %v9064_v27, %s8863_s16  ;;  %7310 = vmatmul.msk.bf16.vlgmr.msrb.gmra.mxu0 %vm517_vm2, %v9374_v40 }
  0xe2   : > { %7302 = vmatmul.msk.bf16.vlgmr.msrb.gmra.mxu1 %vm517_vm2, %v9276_v8  ;;  %1797 = vrot.lane.b32.xlu0 %v9050_v20, %s8863_s16 }
  0xe3   : > { %1799 = vrot.lane.b32.xlu1 %v9062_v26, %s8863_s16  ;;  %1006 = vmatpush.bf16.msrb.mxu1 %v9385_v55  ;;  %v9467_v44 = vpop.permute.xlu2 %1207  ;;  %s8869_s16 = smov 32  }
  0xe4   : > { %7299 = vmatmul.msk.bf16.vlgmr.msra.gmra.mxu2 %vm517_vm2, %v9276_v8  ;;  %v9395_v61 = vpop.permute.xlu0 %1053  ;;  %v9397_v62 = vpop.permute.xlu1 %1055 }
  0xe5   : > { %967 = vmatpush.bf16.msra.mxu2 %v9382_v54  ;;  %v1068_v3 = vsel %vm1063_vm5, %v9397_v62, %v9361_v43  ;;  %v1066_v46 = vsel %vm1063_vm5, %v9329_v35, %v9395_v61  ;;  %v1067_v9 = vsel %vm1063_vm5, %v9395_v61, %v9397_v62 }
  0xe6   : > { %v9408_v4 = vsel %vm521_vm1, %v1068_v3, 0  ;;  %v9495_v51 = vsel %vm521_vm1, %v1066_v46, 0  ;;  %v9519_v15 = vsel %vm521_vm1, %v1067_v9, 0 }
  0xe7   : > { %11523 = vst [vmem:[#allocation13_spill] sm:$0xff] %v9408_v4  ;;  %1154 = vmatpush.bf16.msrb.mxu0 %v9408_v4 }
  0xe8   : > { %11528 = vst [vmem:[#allocation18_spill] sm:$0xff] %v9495_v51 }
  0xe9   : > { %1935 = vrot.lane.b32.xlu2 %v9040_v14, %s8864_s21  ;;  %11530 = vst [vmem:[#allocation20_spill] sm:$0xff] %v9519_v15 }
  0xea   : > { %1937 = vrot.lane.b32.xlu0 %v9038_v13, %s8864_s21  ;;  %7300 = vmatmul.msk.bf16.vlgmr.msra.gmra.mxu3 %vm517_vm2, %v9276_v8 }
  0xeb   : > { %1939 = vrot.lane.b32.xlu1 %v9052_v21, %s8864_s21  ;;  %980 = vmatpush.bf16.msra.mxu3 %v9412_v5 }
  0xec   : > { %v1060_v6 = vpop.permute.xlu0 %1059  ;;  %v9423_v7 = vpop.permute.xlu1 %1195 }
  0xed   : > { %v1069_v50 = vsel %vm1063_vm5, %v9361_v43, %v1060_v6  ;;  %v9505_v43 = vpop.permute.xlu2 %1347  ;;  %v1212_v9 = vsel %vm1211_vm6, %v9423_v7, %v9402_v0 }
  0xee   : > { %v9498_v52 = vsel %vm521_vm1, %v1069_v50, 0  ;;  %v9545_v50 = vld [vmem:[%s11517_s1 + $0x14] sm:$0xf] }
  0xef   : > { %11529 = vst [vmem:[#allocation19_spill] sm:$0xff] %v9498_v52 }
  0xf1   : > { %1945 = vrot.lane.b32.xlu2 %v9050_v20, %s8864_s21  ;;  %7315 = vmatmul.msk.bf16.vlgmr.msra.gmra.mxu0 %vm517_vm2, %v9432_v16 }
  0xf2   : > { %1941 = vrot.lane.b32.xlu0 %v9054_v22, %s8864_s21  ;;  %7307 = vmatmul.msk.bf16.vlgmr.msra.gmra.mxu1 %vm517_vm2, %v9374_v40 }
  0xf3   : > { %1943 = vrot.lane.b32.xlu1 %v9036_v12, %s8864_s21  ;;  %1115 = vmatpush.bf16.msra.mxu1 %v9444_v25 }
  0xf4   : > { %7303 = vmatmul.msk.bf16.vlgmr.msrb.gmra.mxu2 %vm517_vm2, %v9276_v8  ;;  %v9454_v28 = vpop.permute.xlu0 %1061  ;;  %v1200_v29 = vpop.permute.xlu1 %1199 }
  0xf5   : > { %11526 = vst [vmem:[#allocation16_spill] sm:$0xff] %v9454_v28  ;;  %1019 = vmatpush.bf16.msrb.mxu2 %v9441_v24  ;;  %v1213_v36 = vsel %vm1211_vm6, %v9402_v0, %v1200_v29  ;;  %v9532_v62 = vpop.permute.xlu2 %1351  ;;  %v1070_v30 = vsel %vm1063_vm5, %v1060_v6, %v9454_v28  ;;  %v1223_v28 = vsel %vm521_vm1, %v1212_v9, 0 }
  0xf6   : > { %v1226_v38 = vsel %vm521_vm1, %v1213_v36, 0  ;;  %v1214_v36 = vsel %vm1211_vm6, %v1200_v29, %v9434_v17  ;;  %v9555_v6 = vsel %vm521_vm1, %v1070_v30, 0 }
  0xf7   : > { %1263 = vmatpush.bf16.msra.mxu0 %v1226_v38  ;;  %11531 = vst [vmem:[#allocation21_spill] sm:$0xff] %v9555_v6  ;;  %v1229_v29 = vsel %vm521_vm1, %v1214_v36, 0 }
  0xf9   : > { %2083 = vrot.lane.b32.xlu2 %v9040_v14, %s8865_s20 }
  0xfa   : > { %1947 = vrot.lane.b32.xlu0 %v9062_v26, %s8864_s21  ;;  %7304 = vmatmul.msk.bf16.vlgmr.msrb.gmra.mxu3 %vm517_vm2, %v9276_v8 }
  0xfb   : > { %1949 = vrot.lane.b32.xlu1 %v9064_v27, %s8864_s21  ;;  %1032 = vmatpush.bf16.msrb.mxu3 %v9465_v41  ;;  %s8870_s21 = smov 31  }
  0xfc   : > { %v9478_v39 = vpop.permute.xlu0 %1203  ;;  %v9480_v45 = vpop.permute.xlu1 %1205 }
  0xfd   : > { %v1217_v8 = vsel %vm1211_vm6, %v9480_v45, %v9467_v44  ;;  %v1215_v0 = vsel %vm1211_vm6, %v9434_v17, %v9478_v39 }
  0xfe   : > { %v1238_v35 = vsel %vm521_vm1, %v1217_v8, 0 }
 0x101   : > { %2089 = vrot.lane.b32.xlu2 %v9054_v22, %s8865_s20  ;;  %7319 = vmatmul.msk.bf16.vlgmr.msrb.gmra.mxu0 %vm517_vm2, %v9432_v16 }
 0x102   : > { %2085 = vrot.lane.b32.xlu0 %v9038_v13, %s8865_s20  ;;  %7311 = vmatmul.msk.bf16.vlgmr.msrb.gmra.mxu1 %vm517_vm2, %v9374_v40 }
 0x103   : > { %2087 = vrot.lane.b32.xlu1 %v9052_v21, %s8865_s20  ;;  %1167 = vmatpush.bf16.msrb.mxu1 %v9498_v52 }
 0x104   : > { %7308 = vmatmul.msk.bf16.vlgmr.msra.gmra.mxu2 %vm517_vm2, %v9374_v40  ;;  %v1210_v63 = vpop.permute.xlu0 %1209  ;;  %1315 = vmatpush.bf16.msrb.mxu0 %v1238_v35 }
 0x105   : > { %v9511_v3 = vpop.permute.xlu1 %1345  ;;  %1128 = vmatpush.bf16.msra.mxu2 %v9495_v51  ;;  %v1218_v7 = vsel %vm1211_vm6, %v9467_v44, %v1210_v63  ;;  %v1216_v63 = vsel %vm1211_vm6, %v9478_v39, %v9480_v45 }
 0x109   : > { %2095 = vrot.lane.b32.xlu2 %v9062_v26, %s8865_s20 }
 0x10a   : > { %2091 = vrot.lane.b32.xlu0 %v9036_v12, %s8865_s20  ;;  %7309 = vmatmul.msk.bf16.vlgmr.msra.gmra.mxu3 %vm517_vm2, %v9374_v40 }
 0x10b   : > { %2093 = vrot.lane.b32.xlu1 %v9050_v20, %s8865_s20  ;;  %1141 = vmatpush.bf16.msra.mxu3 %v9519_v15 }
 0x10c   : > { %v9530_v61 = vpop.permute.xlu0 %1343 }
 0x10d   : > { %v9538_v38 = vpop.permute.xlu1 %1349 }
 0x10e   : > { %v9540_v46 = vpop.f32.mrf.mxu0  ;;  %v1362_v8 = vsel %vm1359_vm7, %v9505_v43, %v9538_v38 }
 0x10f   : > { %v1377_v35 = vsel %vm521_vm1, %v1362_v8, 0  ;;  %v1358_v8 = vpop.permute.xlu2 %1357 }
 0x111   : > { %2233 = vrot.lane.b32.xlu2 %v9038_v13, %s8866_s23  ;;  %7324 = vmatmul.msk.bf16.vlgmr.msra.gmra.mxu0 %vm517_vm2, %v9545_v50 }
 0x112   : > { %2097 = vrot.lane.b32.xlu0 %v9064_v27, %s8865_s20  ;;  %7316 = vmatmul.msk.bf16.vlgmr.msra.gmra.mxu1 %vm517_vm2, %v9432_v16  ;;  %s8867_s20 = smov 61  }
 0x113   : > { %2231 = vrot.lane.b32.xlu1 %v9040_v14, %s8866_s23  ;;  %1276 = vmatpush.bf16.msra.mxu1 %v1229_v29 }
 0x114   : > { %7312 = vmatmul.msk.bf16.vlgmr.msrb.gmra.mxu2 %vm517_vm2, %v9374_v40  ;;  %v9571_v30 = vpop.permute.xlu0 %1353  ;;  %1424 = vmatpush.bf16.msra.mxu0 %v1377_v35 }
 0x115   : > { %1180 = vmatpush.bf16.msrb.mxu2 %v9555_v6  ;;  %v9574_v4 = vpop.permute.xlu1 %1355 }
 0x116   : > { %v606_v36 = vpop.f32.mrf.mxu0  ;;  %v1366_v35 = vsel %vm1359_vm7, %v9574_v4, %v1358_v8 }
 0x117   : > { %v1241_v36 = vsel %vm521_vm1, %v1218_v7, 0  ;;  %v9599_v17 = vpop.permute.xlu2 %1495  ;;  %v1235_v7 = vsel %vm521_vm1, %v1216_v63, 0 }
 0x119   : > { %2239 = vrot.lane.b32.xlu2 %v9036_v12, %s8866_s23 }
 0x11a   : > { %2235 = vrot.lane.b32.xlu0 %v9052_v21, %s8866_s23  ;;  %7313 = vmatmul.msk.bf16.vlgmr.msrb.gmra.mxu3 %vm517_vm2, %v9374_v40  ;;  %v1232_v40 = vsel %vm521_vm1, %v1215_v0, 0 }
 0x11b   : > { %2237 = vrot.lane.b32.xlu1 %v9054_v22, %s8866_s23  ;;  %1250 = vmatpush.bf16.msrb.mxu3 %v1223_v28  ;;  %v1389_v28 = vsel %vm521_vm1, %v1366_v35, 0 }
 0x11c   : > { %v9591_v9 = vpop.permute.xlu0 %1491 }
 0x11d   : > { %v9606_v44 = vpop.permute.xlu1 %1493 }
 0x11e   : > { %v680_v29 = vpop.f32.mrf.mxu0 }
 0x11f   : > { %v9628_v39 = vpop.permute.xlu2 %1501 }
 0x121   : > { %2379 = vrot.lane.b32.xlu2 %v9040_v14, %s8867_s20  ;;  %7328 = vmatmul.msk.bf16.vlgmr.msrb.gmra.mxu0 %vm517_vm2, %v9545_v50 }
 0x122   : > { %2241 = vrot.lane.b32.xlu0 %v9050_v20, %s8866_s23  ;;  %7320 = vmatmul.msk.bf16.vlgmr.msrb.gmra.mxu1 %vm517_vm2, %v9432_v16 }
 0x123   : > { %2243 = vrot.lane.b32.xlu1 %v9062_v26, %s8866_s23  ;;  %1328 = vmatpush.bf16.msrb.mxu1 %v1241_v36 }
 0x124   : > { %7317 = vmatmul.msk.bf16.vlgmr.msra.gmra.mxu2 %vm517_vm2, %v9432_v16  ;;  %1476 = vmatpush.bf16.msrb.mxu0 %v1389_v28  ;;  %v9618_v35 = vpop.permute.xlu0 %1497  ;;  %v1363_v28 = vsel %vm1359_vm7, %v9538_v38, %v9532_v62 }
 0x125   : > { %1289 = vmatpush.bf16.msra.mxu2 %v1232_v40  ;;  %v9615_v8 = vpop.f32.mrf.mxu2  ;;  %v9630_v45 = vpop.permute.xlu1 %1499  ;;  %v1360_v40 = vsel %vm1359_vm7, %v9530_v61, %v9511_v3  ;;  %v1380_v38 = vsel %vm521_vm1, %v1363_v28, 0 }
 0x126   : > { %v682_v0 = vpop.f32.mrf.mxu0  ;;  %v1511_v6 = vsel %vm1507_vm8, %v9618_v35, %v9630_v45  ;;  %v1371_v61 = vsel %vm521_vm1, %v1360_v40, 0 }
 0x129   : > { %2383 = vrot.lane.b32.xlu2 %v9052_v21, %s8867_s20 }
 0x12a   : > { %2381 = vrot.lane.b32.xlu0 %v9038_v13, %s8867_s20  ;;  %7318 = vmatmul.msk.bf16.vlgmr.msra.gmra.mxu3 %vm517_vm2, %v9432_v16 }
 0x12b   : > { %2245 = vrot.lane.b32.xlu1 %v9064_v27, %s8866_s23  ;;  %1302 = vmatpush.bf16.msra.mxu3 %v1235_v7  ;;  %v9643_v7 = vld [vmem:[%s11517_s1 + $0x18] sm:$0xf]  ;;  %s8868_s23 = smov 60  }
 0x12d   : > { %v565_v36 = vpop.f32.mrf.mxu3  ;;  %v554_v63 = vpop.f32.mrf.mxu2 }
 0x12e   : > { %v9638_v0 = vadd.f32 %v680_v29, %v565_v36  ;;  %v732_v15 = vpop.f32.mrf.mxu0  ;;  %v1528_v29 = vsel %vm521_vm1, %v1511_v6, 0  ;;  %v1640_v6 = vpop.permute.xlu2 %1639 }
 0x12f   : > { %v617_v19 = vpop.f32.mrf.mxu1  ;;  %v9671_v33 = vpop.permute.xlu1 %1505 }
 0x130   : > { %v9648_v41 = vadd.f32 %v732_v15, %v617_v19  ;;  %v9661_v19 = vpop.permute.xlu0 %1503  ;;  %v1361_v15 = vsel %vm1359_vm7, %v9511_v3, %v9505_v43  ;;  %v1364_v3 = vsel %vm1359_vm7, %v9532_v62, %v9571_v30 }
 0x131   : > { %2389 = vrot.lane.b32.xlu2 %v9050_v20, %s8867_s20  ;;  %7333 = vmatmul.msk.bf16.vlgmr.msra.gmra.mxu0 %vm517_vm2, %v9643_v7  ;;  %v1374_v51 = vsel %vm521_vm1, %v1361_v15, 0 }
 0x132   : > { %2385 = vrot.lane.b32.xlu0 %v9054_v22, %s8867_s20  ;;  %7325 = vmatmul.msk.bf16.vlgmr.msra.gmra.mxu1 %vm517_vm2, %v9545_v50 }
 0x133   : > { %2387 = vrot.lane.b32.xlu1 %v9036_v12, %s8867_s20  ;;  %1437 = vmatpush.bf16.msra.mxu1 %v1380_v38 }
 0x134   : > { %7321 = vmatmul.msk.bf16.vlgmr.msrb.gmra.mxu2 %vm517_vm2, %v9432_v16  ;;  %1585 = vmatpush.bf16.msra.mxu0 %v1528_v29 }
 0x135   : > { %1398 = vmatpush.bf16.msrb.mxu2 %v1371_v61  ;;  %v567_v36 = vpop.f32.mrf.mxu3  ;;  %v1508_v61 = vsel %vm1507_vm8, %v9591_v9, %v9606_v44 }
 0x136   : > { %v734_v28 = vpop.f32.mrf.mxu0  ;;  %v1519_v62 = vsel %vm521_vm1, %v1508_v61, 0 }
 0x137   : > { %v578_v40 = vpop.f32.mrf.mxu2  ;;  %v619_v63 = vpop.f32.mrf.mxu1  ;;  %v1383_v28 = vsel %vm521_vm1, %v1364_v3, 0  ;;  %v1365_v3 = vsel %vm1359_vm7, %v9571_v30, %v9574_v4  ;;  %vm2691_vm7 = vcmask 261120  }
 0x138   : > { %v9681_v16 = vpop.permute.xlu0 %1641  ;;  %v9699_v63 = vpop.permute.xlu2 %1645 }
 0x139   : > { %2529 = vrot.lane.b32.xlu2 %v9038_v13, %s8868_s23  ;;  %v1656_v15 = vsel %vm1655_vm9, %v1640_v6, %v9681_v16  ;;  %v9708_v6 = vpop.permute.xlu1 %1643 }
 0x13a   : > { %2391 = vrot.lane.b32.xlu0 %v9062_v26, %s8867_s20  ;;  %7323 = vmatmul.msk.bf16.vlgmr.msrb.gmra.mxu3 %vm517_vm2, %v9545_v50 }
 0x13b   : > { %2393 = vrot.lane.b32.xlu1 %v9064_v27, %s8867_s20  ;;  %1411 = vmatpush.bf16.msrb.mxu3 %v1374_v51  ;;  %s8873_s20 = smov 28  }
 0x13d   : > { %v9683_v43 = vpop.f32.mrf.mxu3 }
 0x13e   : > { %v834_v29 = vpop.f32.mrf.mxu0 }
 0x13f   : > { %v580_v38 = vpop.f32.mrf.mxu2  ;;  %v693_v36 = vpop.f32.mrf.mxu1 }
 0x140   : > { %v694_v51 = vadd.f32 %v693_v36, %v578_v40  ;;  %v1667_v40 = vsel %vm521_vm1, %v1656_v15, 0  ;;  %v1386_v15 = vsel %vm521_vm1, %v1365_v3, 0  ;;  %v9728_v4 = vpop.permute.xlu2 %1651 }
 0x141   : > { %2533 = vrot.lane.b32.xlu2 %v9054_v22, %s8868_s23  ;;  %7337 = vmatmul.msk.bf16.vlgmr.msrb.gmra.mxu0 %vm517_vm2, %v9643_v7  ;;  %v9730_v30 = vpop.permute.xlu1 %1649 }
 0x142   : > { %v9701_v9 = vadd.f32 %v834_v29, %v694_v51  ;;  %2531 = vrot.lane.b32.xlu0 %v9052_v21, %s8868_s23  ;;  %7329 = vmatmul.msk.bf16.vlgmr.msrb.gmra.mxu1 %vm517_vm2, %v9545_v50  ;;  %v9718_v51 = vpop.permute.xlu0 %1647 }
 0x143   : > { %2527 = vrot.lane.b32.xlu1 %v9040_v14, %s8868_s23  ;;  %1546 = vmatpush.bf16.msrb.mxu1 %v1519_v62  ;;  %v1509_v62 = vsel %vm1507_vm8, %v9606_v44, %v9599_v17 }
 0x144   : > { %7326 = vmatmul.msk.bf16.vlgmr.msra.gmra.mxu2 %vm517_vm2, %v9545_v50  ;;  %1694 = vmatpush.bf16.msrb.mxu0 %v1667_v40  ;;  %v1512_v40 = vsel %vm1507_vm8, %v9630_v45, %v9628_v39 }
 0x145   : > { %1450 = vmatpush.bf16.msra.mxu2 %v1383_v28  ;;  %v593_v61 = vpop.f32.mrf.mxu3  ;;  %v1531_v45 = vsel %vm521_vm1, %v1512_v40, 0 }
 0x146   : > { %v836_v29 = vpop.f32.mrf.mxu0 }
 0x147   : > { %v630_v38 = vpop.f32.mrf.mxu2  ;;  %v695_v36 = vpop.f32.mrf.mxu1  ;;  %v9744_v29 = vld [vmem:[%s11517_s1 + $0x1c] sm:$0xf] }
 0x148   : > { %v1660_v36 = vsel %vm1655_vm9, %v9718_v51, %v9730_v30  ;;  %v9772_v5 = vpop.permute.xlu2 %1653 }
 0x149   : > { %2539 = vrot.lane.b32.xlu2 %v9062_v26, %s8868_s23  ;;  %v9775_v52 = vpop.permute.xlu1 %1789 }
 0x14a   : > { %2535 = vrot.lane.b32.xlu0 %v9036_v12, %s8868_s23  ;;  %7327 = vmatmul.msk.bf16.vlgmr.msra.gmra.mxu3 %vm517_vm2, %v9545_v50 }
 0x14b   : > { %2537 = vrot.lane.b32.xlu1 %v9050_v20, %s8868_s23  ;;  %1463 = vmatpush.bf16.msra.mxu3 %v1386_v15 }
 0x14d   : > { %v667_v28 = vpop.f32.mrf.mxu3 }
 0x14e   : > { %v9739_v50 = vadd.f32 %v667_v28, %v9615_v8  ;;  %v886_v61 = vpop.f32.mrf.mxu0  ;;  %v1522_v8 = vsel %vm521_vm1, %v1509_v62, 0  ;;  %v1679_v28 = vsel %vm521_vm1, %v1660_v36, 0  ;;  %v1510_v62 = vsel %vm1507_vm8, %v9599_v17, %v9618_v35 }
 0x14f   : > { %v632_v3 = vpop.f32.mrf.mxu2  ;;  %v745_v15 = vpop.f32.mrf.mxu1  ;;  %v1525_v24 = vsel %vm521_vm1, %v1510_v62, 0  ;;  %v9798_v62 = vld [vmem:[%s11517_s1 + $0x20] sm:$0xf] }
 0x150   : > { %v746_v44 = vadd.f32 %v745_v15, %v630_v38  ;;  %v9762_v38 = vpop.permute.xlu0 %1787 }
 0x151   : > { %2677 = vrot.lane.b32.xlu2 %v9038_v13, %s8869_s16  ;;  %7342 = vmatmul.msk.bf16.vlgmr.msra.gmra.mxu0 %vm517_vm2, %v9744_v29 }
 0x152   : > { %v9756_v3 = vadd.f32 %v886_v61, %v746_v44  ;;  %2541 = vrot.lane.b32.xlu0 %v9064_v27, %s8868_s23  ;;  %7334 = vmatmul.msk.bf16.vlgmr.msra.gmra.mxu1 %vm517_vm2, %v9643_v7  ;;  %s11547_s23 = smov 96  }
 0x153   : > { %2675 = vrot.lane.b32.xlu1 %v9040_v14, %s8869_s16  ;;  %1598 = vmatpush.bf16.msra.mxu1 %v1531_v45 }
 0x154   : > { %7331 = vmatmul.msk.bf16.vlgmr.msrb.gmra.mxu2 %vm517_vm2, %v9643_v7  ;;  %1746 = vmatpush.bf16.msra.mxu0 %v1679_v28 }
 0x155   : > { %1559 = vmatpush.bf16.msrb.mxu2 %v1522_v8  ;;  %v669_v40 = vpop.f32.mrf.mxu3  ;;  %v1657_v8 = vsel %vm1655_vm9, %v9681_v16, %v9708_v6 }
 0x156   : > { %v888_v36 = vpop.f32.mrf.mxu0  ;;  %v1670_v16 = vsel %vm521_vm1, %v1657_v8, 0 }
 0x157   : > { %v706_v61 = vpop.f32.mrf.mxu2  ;;  %v747_v44 = vpop.f32.mrf.mxu1 }
 0x158   : > { %v707_v15 = vadd.f32 %v706_v61, %v9683_v43  ;;  %v9785_v17 = vpop.permute.xlu0 %1791  ;;  %v1513_v43 = vsel %vm1507_vm8, %v9628_v39, %v9661_v19  ;;  %v9809_v36 = vpop.permute.xlu2 %1795 }
 0x159   : > { %2683 = vrot.lane.b32.xlu2 %v9036_v12, %s8869_s16  ;;  %v1534_v39 = vsel %vm521_vm1, %v1513_v43, 0  ;;  %v1514_v43 = vsel %vm1507_vm8, %v9661_v19, %v9671_v33  ;;  %vm2839_vm8 = vcmask 252928  }
 0x15a   : > { %2679 = vrot.lane.b32.xlu0 %v9052_v21, %s8869_s16  ;;  %7332 = vmatmul.msk.bf16.vlgmr.msrb.gmra.mxu3 %vm517_vm2, %v9643_v7  ;;  %v1537_v18 = vsel %vm521_vm1, %v1514_v43, 0 }
 0x15b   : > { %2681 = vrot.lane.b32.xlu1 %v9054_v22, %s8869_s16  ;;  %1572 = vmatpush.bf16.msrb.mxu3 %v1525_v24  ;;  %v1805_v24 = vsel %vm1803_vm10, %v9775_v52, %v9785_v17 }
 0x15c   : > { %v1818_v44 = vsel %vm521_vm1, %v1805_v24, 0 }
 0x15d   : > { %v9787_v35 = vpop.f32.mrf.mxu3 }
 0x15e   : > { %v995_v28 = vpop.f32.mrf.mxu0 }
 0x15f   : > { %v708_v45 = vpop.f32.mrf.mxu2  ;;  %v847_v40 = vpop.f32.mrf.mxu1 }
 0x160   : > { %v893_v61 = vadd.f32 %v847_v40, %v707_v15  ;;  %v9818_v15 = vpop.permute.xlu1 %1793  ;;  %v9829_v42 = vpop.permute.xlu0 %1797 }
 0x161   : > { %2689 = vrot.lane.b32.xlu2 %v9064_v27, %s8869_s16  ;;  %7347 = vmatmul.msk.bf16.vlgmr.msrb.gmra.mxu0 %vm517_vm2, %v9798_v62  ;;  %v9839_v33 = vpop.permute.xlu2 %1801 }
 0x162   : > { %v9812_v45 = vadd.f32 %v995_v28, %v893_v61  ;;  %2685 = vrot.lane.b32.xlu0 %v9050_v20, %s8869_s16  ;;  %7339 = vmatmul.msk.bf16.vlgmr.msrb.gmra.mxu1 %vm517_vm2, %v9744_v29 }
 0x163   : > { %2687 = vrot.lane.b32.xlu1 %v9062_v26, %s8869_s16  ;;  %1707 = vmatpush.bf16.msrb.mxu1 %v1670_v16  ;;  %v1661_v16 = vsel %vm1655_vm9, %v9730_v30, %v9728_v4  ;;  %s8871_s16 = smov 30  }
 0x164   : > { %7335 = vmatmul.msk.bf16.vlgmr.msra.gmra.mxu2 %vm517_vm2, %v9643_v7  ;;  %1855 = vmatpush.bf16.msrb.mxu0 %v1818_v44 }
 0x165   : > { %1611 = vmatpush.bf16.msra.mxu2 %v1534_v39  ;;  %v721_v8 = vpop.f32.mrf.mxu3  ;;  %v1658_v39 = vsel %vm1655_vm9, %v9708_v6, %v9699_v63 }
 0x166   : > { %v997_v24 = vpop.f32.mrf.mxu0  ;;  %v1673_v6 = vsel %vm521_vm1, %v1658_v39, 0 }
 0x167   : > { %v808_v28 = vpop.f32.mrf.mxu2  ;;  %v849_v61 = vpop.f32.mrf.mxu1  ;;  %v1682_v24 = vsel %vm521_vm1, %v1661_v16, 0 }
 0x168   : > { %v890_v40 = vadd.f32 %v808_v28, %v9739_v50  ;;  %v9841_v19 = vpop.permute.xlu1 %1799  ;;  %v1659_v61 = vsel %vm1655_vm9, %v9699_v63, %v9718_v51  ;;  %v1662_v51 = vsel %vm1655_vm9, %v9728_v4, %v9772_v5  ;;  %vm2987_vm9 = vcmask 244736  }
 0x169   : > { %2827 = vrot.lane.b32.xlu2 %v9052_v21, %s8870_s21  ;;  %v1685_v4 = vsel %vm521_vm1, %v1662_v51, 0 }
 0x16a   : > { %2823 = vrot.lane.b32.xlu0 %v9040_v14, %s8870_s21  ;;  %7336 = vmatmul.msk.bf16.vlgmr.msra.gmra.mxu3 %vm517_vm2, %v9643_v7 }
 0x16b   : > { %2825 = vrot.lane.b32.xlu1 %v9038_v13, %s8870_s21  ;;  %1624 = vmatpush.bf16.msra.mxu3 %v1537_v18  ;;  %v1809_v18 = vsel %vm1803_vm10, %v9829_v42, %v9841_v19 }
 0x16d   : > { %v821_v50 = vpop.f32.mrf.mxu3 }
 0x16e   : > { %v9850_v7 = vadd.f32 %v821_v50, %v9638_v0  ;;  %v1104_v43 = vpop.f32.mrf.mxu0  ;;  %v1830_v0 = vsel %vm521_vm1, %v1809_v18, 0  ;;  %v720_v50 = vadd.f32 %v9787_v35, %v9540_v46  ;;  %v1806_v35 = vsel %vm1803_vm10, %v9785_v17, %v9818_v15 }
 0x16f   : > { %v810_v44 = vpop.f32.mrf.mxu2  ;;  %v956_v8 = vpop.f32.mrf.mxu1  ;;  %v1821_v17 = vsel %vm521_vm1, %v1806_v35, 0 }
 0x170   : > { %v1038_v28 = vadd.f32 %v956_v8, %v890_v40  ;;  %v9868_v40 = vpop.permute.xlu0 %1937  ;;  %v1676_v8 = vsel %vm521_vm1, %v1659_v61, 0  ;;  %v9882_v54 = vpop.permute.xlu1 %1939  ;;  %v9906_v61 = vld [vmem:[%s11517_s1 + $0x24] sm:$0xf] }
 0x171   : > { %2833 = vrot.lane.b32.xlu2 %v9050_v20, %s8870_s21  ;;  %7351 = vmatmul.msk.bf16.vlgmr.msra.gmra.mxu0 %vm517_vm2, %v9798_v62 }
 0x172   : > { %v9862_v30 = vadd.f32 %v1104_v43, %v1038_v28  ;;  %2829 = vrot.lane.b32.xlu0 %v9054_v22, %s8870_s21  ;;  %7343 = vmatmul.msk.bf16.vlgmr.msra.gmra.mxu1 %vm517_vm2, %v9744_v29  ;;  %v9880_v28 = vpop.permute.xlu2 %1935 }
 0x173   : > { %2831 = vrot.lane.b32.xlu1 %v9036_v12, %s8870_s21  ;;  %1759 = vmatpush.bf16.msra.mxu1 %v1682_v24 }
 0x174   : > { %7340 = vmatmul.msk.bf16.vlgmr.msrb.gmra.mxu2 %vm517_vm2, %v9744_v29  ;;  %1907 = vmatpush.bf16.msra.mxu0 %v1830_v0 }
 0x175   : > { %1720 = vmatpush.bf16.msrb.mxu2 %v1673_v6  ;;  %v823_v39 = vpop.f32.mrf.mxu3 }
 0x176   : > { %v1106_v44 = vpop.f32.mrf.mxu0 }
 0x177   : > { %v860_v16 = vpop.f32.mrf.mxu2  ;;  %v958_v18 = vpop.f32.mrf.mxu1 }
 0x178   : > { %v894_v43 = vadd.f32 %v860_v16, %v720_v50  ;;  %v9892_v46 = vpop.permute.xlu0 %1941  ;;  %v1804_v18 = vsel %vm1803_vm10, %v9762_v38, %v9775_v52 }
 0x179   : > { %2973 = vrot.lane.b32.xlu2 %v9038_v13, %s8871_s16  ;;  %v1954_v50 = vsel %vm1951_vm11, %v9882_v54, %v9892_v46 }
 0x17a   : > { %2835 = vrot.lane.b32.xlu0 %v9062_v26, %s8870_s21  ;;  %7341 = vmatmul.msk.bf16.vlgmr.msrb.gmra.mxu3 %vm517_vm2, %v9744_v29  ;;  %v1969_v16 = vsel %vm521_vm1, %v1954_v50, 0 }
 0x17b   : > { %2971 = vrot.lane.b32.xlu1 %v9040_v14, %s8871_s16  ;;  %1733 = vmatpush.bf16.msrb.mxu3 %v1676_v8 }
 0x17d   : > { %v873_v63 = vpop.f32.mrf.mxu3 }
 0x17e   : > { %v9901_v6 = vadd.f32 %v873_v63, %v9648_v41  ;;  %v1156_v0 = vpop.f32.mrf.mxu0  ;;  %v9917_v41 = vpop.permute.xlu2 %1945 }
 0x17f   : > { %v862_v24 = vpop.f32.mrf.mxu2  ;;  %v1008_v39 = vpop.f32.mrf.mxu1 }
 0x180   : > { %v1042_v5 = vadd.f32 %v1008_v39, %v894_v43  ;;  %v9926_v43 = vpop.permute.xlu1 %1943  ;;  %v9937_v50 = vpop.permute.xlu0 %1947  ;;  %v1807_v39 = vsel %vm1803_vm10, %v9818_v15, %v9809_v36 }
 0x181   : > { %2977 = vrot.lane.b32.xlu2 %v9054_v22, %s8871_s16  ;;  %7356 = vmatmul.msk.bf16.vlgmr.msrb.gmra.mxu0 %vm517_vm2, %v9906_v61 }
 0x182   : > { %v9920_v44 = vadd.f32 %v1156_v0, %v1042_v5  ;;  %2837 = vrot.lane.b32.xlu0 %v9064_v27, %s8870_s21  ;;  %7348 = vmatmul.msk.bf16.vlgmr.msrb.gmra.mxu1 %vm517_vm2, %v9798_v62  ;;  %v1815_v0 = vsel %vm521_vm1, %v1804_v18, 0  ;;  %v1810_v5 = vsel %vm1803_vm10, %v9841_v19, %v9839_v33  ;;  %s8872_s21 = smov 29   ;;  %v1808_v19 = vsel %vm1803_vm10, %v9809_v36, %v9829_v42 }
 0x183   : > { %2975 = vrot.lane.b32.xlu1 %v9052_v21, %s8871_s16  ;;  %1868 = vmatpush.bf16.msrb.mxu1 %v1821_v17  ;;  %vm3135_vm10 = vcmask 236544  }
 0x184   : > { %7344 = vmatmul.msk.bf16.vlgmr.msra.gmra.mxu2 %vm517_vm2, %v9744_v29  ;;  %2016 = vmatpush.bf16.msrb.mxu0 %v1969_v16 }
 0x185   : > { %1772 = vmatpush.bf16.msra.mxu2 %v1685_v4  ;;  %v875_v8 = vpop.f32.mrf.mxu3 }
 0x186   : > { %v1158_v51 = vpop.f32.mrf.mxu0  ;;  %v9947_v52 = vpop.permute.xlu2 %2083 }
 0x187   : > { %v969_v63 = vpop.f32.mrf.mxu2  ;;  %v1010_v24 = vpop.f32.mrf.mxu1  ;;  %v1833_v51 = vsel %vm521_vm1, %v1810_v5, 0  ;;  %v1827_v5 = vsel %vm521_vm1, %v1808_v19, 0 }
 0x188   : > { %v1039_v35 = vadd.f32 %v969_v63, %v9850_v7  ;;  %v1950_v38 = vpop.permute.xlu1 %1949  ;;  %v1824_v63 = vsel %vm521_vm1, %v1807_v39, 0  ;;  %v9973_v33 = vpop.permute.xlu0 %2085 }
 0x189   : > { %2983 = vrot.lane.b32.xlu2 %v9062_v26, %s8871_s16  ;;  %v1958_v16 = vsel %vm1951_vm11, %v9937_v50, %v1950_v38 }
 0x18a   : > { %2979 = vrot.lane.b32.xlu0 %v9036_v12, %s8871_s16  ;;  %7345 = vmatmul.msk.bf16.vlgmr.msra.gmra.mxu3 %vm517_vm2, %v9744_v29 }
 0x18b   : > { %2981 = vrot.lane.b32.xlu1 %v9050_v20, %s8871_s16  ;;  %1842 = vmatpush.bf16.msra.mxu3 %v1815_v0 }
 0x18d   : > { %v982_v7 = vpop.f32.mrf.mxu3 }
 0x18e   : > { %v9956_v17 = vadd.f32 %v982_v7, %v9701_v9  ;;  %v1265_v29 = vpop.f32.mrf.mxu0  ;;  %v1981_v9 = vsel %vm521_vm1, %v1958_v16, 0  ;;  %v9982_v38 = vpop.permute.xlu2 %2089 }
 0x18f   : > { %v971_v4 = vpop.f32.mrf.mxu2  ;;  %v1117_v18 = vpop.f32.mrf.mxu1 }
 0x190   : > { %v1187_v8 = vadd.f32 %v1117_v18, %v1039_v35  ;;  %v9986_v4 = vpop.permute.xlu1 %2087  ;;  %v9996_v42 = vpop.permute.xlu0 %2091 }
 0x191   : > { %3123 = vrot.lane.b32.xlu2 %v9052_v21, %s8872_s21  ;;  %7360 = vmatmul.msk.bf16.vlgmr.msra.gmra.mxu0 %vm517_vm2, %v9906_v61 }
 0x192   : > { %v9967_v15 = vadd.f32 %v1265_v29, %v1187_v8  ;;  %2985 = vrot.lane.b32.xlu0 %v9064_v27, %s8871_s16  ;;  %7352 = vmatmul.msk.bf16.vlgmr.msra.gmra.mxu1 %vm517_vm2, %v9798_v62  ;;  %v1955_v29 = vsel %vm1951_vm11, %v9892_v46, %v9926_v43  ;;  %s8881_s16 = smov 100  }
 0x193   : > { %3121 = vrot.lane.b32.xlu1 %v9038_v13, %s8872_s21  ;;  %1920 = vmatpush.bf16.msra.mxu1 %v1833_v51  ;;  %v2103_v51 = vsel %vm2099_vm12, %v9982_v38, %v9996_v42  ;;  %v1972_v46 = vsel %vm521_vm1, %v1955_v29, 0 }
 0x194   : > { %7349 = vmatmul.msk.bf16.vlgmr.msrb.gmra.mxu2 %vm517_vm2, %v9798_v62  ;;  %2068 = vmatpush.bf16.msra.mxu0 %v1981_v9 }
 0x195   : > { %1881 = vmatpush.bf16.msrb.mxu2 %v1824_v63  ;;  %v984_v35 = vpop.f32.mrf.mxu3  ;;  %v10010_v63 = vld [vmem:[%s11517_s1 + $0x28] sm:$0xf] }
 0x196   : > { %v1267_v0 = vpop.f32.mrf.mxu0  ;;  %v10016_v35 = vpop.permute.xlu2 %2095 }
 0x197   : > { %v1021_v24 = vpop.f32.mrf.mxu2  ;;  %v1119_v39 = vpop.f32.mrf.mxu1 }
 0x198   : > { %v1043_v7 = vadd.f32 %v1021_v24, %v9901_v6  ;;  %v1952_v6 = vsel %vm1951_vm11, %v9880_v28, %v9868_v40  ;;  %v10030_v0 = vpop.permute.xlu1 %2093 }
 0x199   : > { %3127 = vrot.lane.b32.xlu2 %v9036_v12, %s8872_s21  ;;  %v1963_v19 = vsel %vm521_vm1, %v1952_v6, 0 }
 0x19a   : > { %3119 = vrot.lane.b32.xlu0 %v9040_v14, %s8872_s21  ;;  %7350 = vmatmul.msk.bf16.vlgmr.msrb.gmra.mxu3 %vm517_vm2, %v9798_v62 }
 0x19b   : > { %3125 = vrot.lane.b32.xlu1 %v9054_v22, %s8872_s21  ;;  %1894 = vmatpush.bf16.msrb.mxu3 %v1827_v5 }
 0x19d   : > { %v1034_v36 = vpop.f32.mrf.mxu3 }
 0x19e   : > { %v10005_v18 = vadd.f32 %v1034_v36, %v9756_v3  ;;  %v1317_v8 = vpop.f32.mrf.mxu0  ;;  %v2120_v3 = vsel %vm521_vm1, %v2103_v51, 0 }
 0x19f   : > { %v1023_v16 = vpop.f32.mrf.mxu2  ;;  %v1169_v9 = vpop.f32.mrf.mxu1 }
 0x1a0   : > { %v1191_v28 = vadd.f32 %v1169_v9, %v1043_v7  ;;  %v1953_v7 = vsel %vm1951_vm11, %v9868_v40, %v9882_v54  ;;  %v464_v54 = vld [vmem:[%s9028_s3 + $0x40] sm:$0xff]  ;;  %v2232_v40 = vpop.permute.xlu1 %2231  ;;  %s8875_s3 = smov 113  }
 0x1a1   : > { %3133 = vrot.lane.b32.xlu2 %v9064_v27, %s8872_s21  ;;  %7365 = vmatmul.msk.bf16.vlgmr.msrb.gmra.mxu0 %vm517_vm2, %v10010_v63  ;;  %v1966_v16 = vsel %vm521_vm1, %v1953_v7, 0  ;;  %v469_v51 = vpack.c.bf16 %v464_v54, %v464_v54 }
 0x1a2   : > { %v10024_v24 = vadd.f32 %v1317_v8, %v1191_v28  ;;  %3129 = vrot.lane.b32.xlu0 %v9050_v20, %s8872_s21  ;;  %7357 = vmatmul.msk.bf16.vlgmr.msrb.gmra.mxu1 %vm517_vm2, %v9906_v61  ;;  %v10041_v8 = vpop.permute.xlu0 %2097 }
 0x1a3   : > { %3131 = vrot.lane.b32.xlu1 %v9062_v26, %s8872_s21  ;;  %2029 = vmatpush.bf16.msrb.mxu1 %v1972_v46  ;;  %s8876_s21 = smov 111  }
 0x1a4   : > { %7353 = vmatmul.msk.bf16.vlgmr.msra.gmra.mxu2 %vm517_vm2, %v9798_v62  ;;  %2177 = vmatpush.bf16.msrb.mxu0 %v2120_v3  ;;  %v10050_v62 = vpop.permute.xlu2 %2233 }
 0x1a5   : > { %1990 = vmatpush.bf16.msra.mxu2 %v1963_v19  ;;  %v1036_v39 = vpop.f32.mrf.mxu3 }
 0x1a6   : > { %v1319_v36 = vpop.f32.mrf.mxu0 }
 0x1a7   : > { %v1130_v5 = vpop.f32.mrf.mxu2  ;;  %v1171_v29 = vpop.f32.mrf.mxu1 }
 0x1a8   : > { %v1188_v6 = vadd.f32 %v1130_v5, %v9956_v17  ;;  %v10089_v54 = vpop.permute.xlu1 %2237 }
 0x1a9   : > { %3271 = vrot.lane.b32.xlu2 %v9052_v21, %s8873_s20  ;;  %v1956_v21 = vsel %vm1951_vm11, %v9926_v43, %v9917_v41  ;;  %v3522_v43 = vunpack.c.l.b16 %v469_v51  ;;  %v2104_v51 = vsel %vm2099_vm12, %v9996_v42, %v10030_v0 }
 0x1aa   : > { %3267 = vrot.lane.b32.xlu0 %v9040_v14, %s8873_s20  ;;  %7355 = vmatmul.msk.bf16.vlgmr.msra.gmra.mxu3 %vm517_vm2, %v9906_v61  ;;  %v2100_v14 = vsel %vm2099_vm12, %v9947_v52, %v9973_v33  ;;  %v1975_v7 = vsel %vm521_vm1, %v1956_v21, 0  ;;  %v10078_v5 = vpop.permute.xlu0 %2235  ;;  %v2123_v42 = vsel %vm521_vm1, %v2104_v51, 0 }
 0x1ab   : > { %3269 = vrot.lane.b32.xlu1 %v9038_v13, %s8873_s20  ;;  %2003 = vmatpush.bf16.msra.mxu3 %v1966_v16  ;;  %v2248_v13 = vsel %vm2247_vm13, %v2232_v40, %v10050_v62  ;;  %v2111_v39 = vsel %vm521_vm1, %v2100_v14, 0 }
 0x1ac   : > { %v10087_v36 = vpop.permute.xlu2 %2239 }
 0x1ad   : > { %v1143_v17 = vpop.f32.mrf.mxu3 }
 0x1ae   : > { %v10061_v28 = vadd.f32 %v1143_v17, %v9812_v45  ;;  %v1426_v19 = vpop.f32.mrf.mxu0  ;;  %v2259_v45 = vsel %vm521_vm1, %v2248_v13, 0 }
 0x1af   : > { %v1132_v9 = vpop.f32.mrf.mxu2  ;;  %v1278_v46 = vpop.f32.mrf.mxu1 }
 0x1b0   : > { %v1336_v3 = vadd.f32 %v1278_v46, %v1188_v6  ;;  %v3523_v6 = vpack.c.b16 %v3522_v43, %v3522_v43 }
 0x1b1   : > { %3277 = vrot.lane.b32.xlu2 %v9050_v20, %s8873_s20  ;;  %7369 = vmatmul.msk.bf16.vlgmr.msra.gmra.mxu0 %vm517_vm2, %v10010_v63  ;;  %v1957_v20 = vsel %vm1951_vm11, %v9917_v41, %v9937_v50  ;;  %vm3283_vm11 = vcmask 228352  }
 0x1b2   : > { %v10072_v52 = vadd.f32 %v1426_v19, %v1336_v3  ;;  %3273 = vrot.lane.b32.xlu0 %v9054_v22, %s8873_s20  ;;  %7361 = vmatmul.msk.bf16.vlgmr.msra.gmra.mxu1 %vm517_vm2, %v9906_v61  ;;  %v1978_v17 = vsel %vm521_vm1, %v1957_v20, 0  ;;  %v10100_v41 = vpop.permute.xlu0 %2241  ;;  %v10121_v3 = vpop.permute.xlu1 %2243 }
 0x1b3   : > { %3275 = vrot.lane.b32.xlu1 %v9036_v12, %s8873_s20  ;;  %2138 = vmatpush.bf16.msra.mxu1 %v2111_v39  ;;  %v2252_v9 = vsel %vm2247_vm13, %v10087_v36, %v10100_v41  ;;  %v2102_v39 = vsel %vm2099_vm12, %v9986_v4, %v9982_v38 }
 0x1b4   : > { %7358 = vmatmul.msk.bf16.vlgmr.msrb.gmra.mxu2 %vm517_vm2, %v9906_v61  ;;  %2286 = vmatpush.bf16.msra.mxu0 %v2259_v45  ;;  %v10118_v46 = vpop.permute.xlu2 %2379 }
 0x1b5   : > { %2042 = vmatpush.bf16.msrb.mxu2 %v1975_v7  ;;  %v1145_v22 = vpop.f32.mrf.mxu3 }
 0x1b6   : > { %v1428_v16 = vpop.f32.mrf.mxu0 }
 0x1b7   : > { %v1182_v29 = vpop.f32.mrf.mxu2  ;;  %v1280_v40 = vpop.f32.mrf.mxu1 }
 0x1b8   : > { %v1192_v12 = vadd.f32 %v1182_v29, %v10005_v18  ;;  %v2101_v18 = vsel %vm2099_vm12, %v9973_v33, %v9986_v4  ;;  %v2249_v4 = vsel %vm2247_vm13, %v10050_v62, %v10078_v5 }
 0x1b9   : > { %3524 = vrot.lane.b32.xlu2 %v3523_v6, %s8855_s22  ;;  %v2114_v33 = vsel %vm521_vm1, %v2101_v18, 0 }
 0x1ba   : > { %3279 = vrot.lane.b32.xlu0 %v9062_v26, %s8873_s20  ;;  %7359 = vmatmul.msk.bf16.vlgmr.msrb.gmra.mxu3 %vm517_vm2, %v9906_v61  ;;  %v10112_v61 = vld [vmem:[%s11517_s1 + $0x2c] sm:$0xf]  ;;  %v10138_v22 = vpop.permute.xlu0 %2381  ;;  %v10146_v40 = vpop.permute.xlu1 %2245 }
 0x1bb   : > { %3281 = vrot.lane.b32.xlu1 %v9064_v27, %s8873_s20  ;;  %2055 = vmatpush.bf16.msrb.mxu3 %v1978_v17  ;;  %v2105_v17 = vsel %vm2099_vm12, %v10030_v0, %v10016_v35  ;;  %v2106_v0 = vsel %vm2099_vm12, %v10016_v35, %v10041_v8  ;;  %v2253_v8 = vsel %vm2247_vm13, %v10100_v41, %v10121_v3  ;;  %s8882_s20 = smov 99  }
 0x1bd   : > { %v1252_v50 = vpop.f32.mrf.mxu3 }
 0x1be   : > { %v1334_v26 = vadd.f32 %v1252_v50, %v9862_v30  ;;  %v1478_v14 = vpop.f32.mrf.mxu0  ;;  %v2271_v30 = vsel %vm521_vm1, %v2252_v9, 0 }
 0x1bf   : > { %v1184_v21 = vpop.f32.mrf.mxu2  ;;  %v1330_v19 = vpop.f32.mrf.mxu1 }
 0x1c0   : > { %v1340_v13 = vadd.f32 %v1330_v19, %v1192_v12  ;;  %v10144_v12 = vpop.permute.xlu2 %2383  ;;  %v10161_v21 = vld [vmem:[%s11517_s1 + $0x30] sm:$0xf]  ;;  %v2262_v19 = vsel %vm521_vm1, %v2249_v4, 0 }
 0x1c1   : > { %3851 = vrot.lane.b32.xlu2 %v3523_v6, %s8858_s15  ;;  %7374 = vmatmul.msk.bf16.vlgmr.msrb.gmra.mxu0 %vm517_vm2, %v10112_v61  ;;  %v2397_v38 = vsel %vm2395_vm14, %v10138_v22, %v10144_v12 }
 0x1c2   : > { %v10127_v7 = vadd.f32 %v1478_v14, %v1340_v13  ;;  %3633 = vrot.lane.b32.xlu0 %v3523_v6, %s8856_s24  ;;  %7366 = vmatmul.msk.bf16.vlgmr.msrb.gmra.mxu1 %vm517_vm2, %v10010_v63  ;;  %v2410_v14 = vsel %vm521_vm1, %v2397_v38, 0  ;;  %v2126_v13 = vsel %vm521_vm1, %v2105_v17, 0 }
 0x1c3   : > { %3742 = vrot.lane.b32.xlu1 %v3523_v6, %s8857_s30  ;;  %2190 = vmatpush.bf16.msrb.mxu1 %v2123_v42  ;;  %v2117_v6 = vsel %vm521_vm1, %v2102_v39, 0  ;;  %v10179_v42 = vpop.permute.xlu1 %2387 }
 0x1c4   : > { %7363 = vmatmul.msk.bf16.vlgmr.msra.gmra.mxu2 %vm517_vm2, %v10010_v63  ;;  %2338 = vmatpush.bf16.msrb.mxu0 %v2271_v30 }
 0x1c5   : > { %2151 = vmatpush.bf16.msra.mxu2 %v2114_v33  ;;  %v1254_v43 = vpop.f32.mrf.mxu3  ;;  %v10166_v33 = vpop.permute.xlu0 %2385 }
 0x1c6   : > { %v1480_v20 = vpop.f32.mrf.mxu0 }
 0x1c7   : > { %v1291_v45 = vpop.f32.mrf.mxu2  ;;  %v1332_v16 = vpop.f32.mrf.mxu1 }
 0x1c8   : > { %v1337_v29 = vadd.f32 %v1291_v45, %v10061_v28  ;;  %v10181_v45 = vpop.permute.xlu2 %2389  ;;  %v2129_v16 = vsel %vm521_vm1, %v2106_v0, 0 }
 0x1ca   : > { %7364 = vmatmul.msk.bf16.vlgmr.msra.gmra.mxu3 %vm517_vm2, %v10010_v63 }
 0x1cb   : > { %2164 = vmatpush.bf16.msra.mxu3 %v2117_v6 }
 0x1cd   : > { %v1304_v28 = vpop.f32.mrf.mxu3  ;;  %v10186_v6 = vpop.permute.xlu0 %2391 }
 0x1ce   : > { %v1338_v18 = vadd.f32 %v1304_v28, %v9920_v44  ;;  %v1587_v51 = vpop.f32.mrf.mxu0  ;;  %v2401_v35 = vsel %vm2395_vm14, %v10181_v45, %v10186_v6 }
 0x1cf   : > { %v1293_v50 = vpop.f32.mrf.mxu2  ;;  %v1439_v9 = vpop.f32.mrf.mxu1  ;;  %v2422_v17 = vsel %vm521_vm1, %v2401_v35, 0  ;;  %v2254_v35 = vsel %vm2247_vm13, %v10121_v3, %v10146_v40  ;;  %v2396_v40 = vsel %vm2395_vm14, %v10118_v46, %v10138_v22 }
 0x1d0   : > { %v1485_v62 = vadd.f32 %v1439_v9, %v1337_v29  ;;  %v2394_v50 = vpop.permute.xlu1 %2393 }
 0x1d1   : > { %7379 = vmatmul.msk.bf16.vlgmr.msra.gmra.mxu0 %vm517_vm2, %v10161_v21  ;;  %v2402_v46 = vsel %vm2395_vm14, %v10186_v6, %v2394_v50 }
 0x1d2   : > { %v10170_v44 = vadd.f32 %v1587_v51, %v1485_v62  ;;  %7371 = vmatmul.msk.bf16.vlgmr.msra.gmra.mxu1 %vm517_vm2, %v10112_v61  ;;  %2447 = vmatpush.bf16.msra.mxu0 %v2410_v14  ;;  %v2274_v14 = vsel %vm521_vm1, %v2253_v8, 0  ;;  %v10201_v62 = vpop.permute.xlu2 %2529 }
 0x1d3   : > { %2299 = vmatpush.bf16.msra.mxu1 %v2262_v19 }
 0x1d4   : > { %7367 = vmatmul.msk.bf16.vlgmr.msrb.gmra.mxu2 %vm517_vm2, %v10010_v63 }
 0x1d5   : > { %2203 = vmatpush.bf16.msrb.mxu2 %v2126_v13  ;;  %v1306_v30 = vpop.f32.mrf.mxu3 }
 0x1d6   : > { %v1589_v43 = vpop.f32.mrf.mxu0  ;;  %v10214_v30 = vpop.permute.xlu0 %2531 }
 0x1d7   : > { %v1400_v39 = vpop.f32.mrf.mxu2  ;;  %v1441_v29 = vpop.f32.mrf.mxu1 }
 0x1d8   : > { %v1482_v20 = vadd.f32 %v1400_v39, %v1334_v26  ;;  %v2250_v26 = vsel %vm2247_vm13, %v10078_v5, %v10089_v54  ;;  %v10217_v29 = vpop.permute.xlu1 %2527 }
 0x1d9   : > { %v2265_v19 = vsel %vm521_vm1, %v2250_v26, 0 }
 0x1da   : > { %7368 = vmatmul.msk.bf16.vlgmr.msrb.gmra.mxu3 %vm517_vm2, %v10010_v63 }
 0x1db   : > { %2216 = vmatpush.bf16.msrb.mxu3 %v2129_v16  ;;  %v10221_v16 = vpop.permute.xlu2 %2533 }
 0x1dd   : > { %v1413_v38 = vpop.f32.mrf.mxu3 }
 0x1de   : > { %v1483_v28 = vadd.f32 %v1413_v38, %v9967_v15  ;;  %v1696_v63 = vpop.f32.mrf.mxu0  ;;  %v2251_v15 = vsel %vm2247_vm13, %v10089_v54, %v10087_v36  ;;  %v2546_v36 = vsel %vm2543_vm15, %v10214_v30, %v10221_v16  ;;  %v2398_v54 = vsel %vm2395_vm14, %v10144_v12, %v10166_v33 }
 0x1df   : > { %v1402_v4 = vpop.f32.mrf.mxu2  ;;  %v1548_v51 = vpop.f32.mrf.mxu1 }
 0x1e0   : > { %v1630_v9 = vadd.f32 %v1548_v51, %v1482_v20  ;;  %v2268_v20 = vsel %vm521_vm1, %v2251_v15, 0  ;;  %v10236_v4 = vld [vmem:[%s11517_s1 + $0x34] sm:$0xf]  ;;  %v2413_v51 = vsel %vm521_vm1, %v2398_v54, 0  ;;  %v10249_v3 = vpop.permute.xlu1 %2537 }
 0x1e1   : > { %7383 = vmatmul.msk.bf16.vlgmr.msrb.gmra.mxu0 %vm517_vm2, %v10161_v21 }
 0x1e2   : > { %v10205_v41 = vadd.f32 %v1696_v63, %v1630_v9  ;;  %7375 = vmatmul.msk.bf16.vlgmr.msrb.gmra.mxu1 %vm517_vm2, %v10112_v61  ;;  %2499 = vmatpush.bf16.msrb.mxu0 %v2422_v17  ;;  %v2561_v63 = vsel %vm521_vm1, %v2546_v36, 0  ;;  %v10241_v9 = vpop.permute.xlu0 %2535 }
 0x1e3   : > { %2351 = vmatpush.bf16.msrb.mxu1 %v2274_v14  ;;  %v2277_v14 = vsel %vm521_vm1, %v2254_v35, 0 }
 0x1e4   : > { %7372 = vmatmul.msk.bf16.vlgmr.msra.gmra.mxu2 %vm517_vm2, %v10112_v61 }
 0x1e5   : > { %2312 = vmatpush.bf16.msra.mxu2 %v2265_v19  ;;  %v1415_v5 = vpop.f32.mrf.mxu3 }
 0x1e6   : > { %v1698_v0 = vpop.f32.mrf.mxu0 }
 0x1e7   : > { %v1452_v13 = vpop.f32.mrf.mxu2  ;;  %v1550_v43 = vpop.f32.mrf.mxu1 }
 0x1e8   : > { %v1486_v39 = vadd.f32 %v1452_v13, %v1338_v18  ;;  %v10256_v13 = vpop.permute.xlu2 %2539  ;;  %v2407_v43 = vsel %vm521_vm1, %v2396_v40, 0  ;;  %v10265_v22 = vpop.permute.xlu1 %2675 }
 0x1ea   : > { %7373 = vmatmul.msk.bf16.vlgmr.msra.gmra.mxu3 %vm517_vm2, %v10112_v61 }
 0x1eb   : > { %2325 = vmatpush.bf16.msra.mxu3 %v2268_v20  ;;  %v2542_v20 = vpop.permute.xlu0 %2541 }
 0x1ec   : > { %v2550_v36 = vsel %vm2543_vm15, %v10256_v13, %v2542_v20 }
 0x1ed   : > { %v1465_v18 = vpop.f32.mrf.mxu3 }
 0x1ee   : > { %v1487_v38 = vadd.f32 %v1465_v18, %v10024_v24  ;;  %v1748_v26 = vpop.f32.mrf.mxu0 }
 0x1ef   : > { %v1454_v8 = vpop.f32.mrf.mxu2  ;;  %v1600_v17 = vpop.f32.mrf.mxu1 }
 0x1f0   : > { %v1634_v12 = vadd.f32 %v1600_v17, %v1486_v39  ;;  %v10274_v6 = vpop.permute.xlu2 %2677 }
 0x1f1   : > { %7388 = vmatmul.msk.bf16.vlgmr.msra.gmra.mxu0 %vm517_vm2, %v10236_v4 }
 0x1f2   : > { %v10245_v24 = vadd.f32 %v1748_v26, %v1634_v12  ;;  %7380 = vmatmul.msk.bf16.vlgmr.msra.gmra.mxu1 %vm517_vm2, %v10161_v21  ;;  %2608 = vmatpush.bf16.msra.mxu0 %v2561_v63  ;;  %v2425_v63 = vsel %vm521_vm1, %v2402_v46, 0 }
 0x1f3   : > { %2460 = vmatpush.bf16.msra.mxu1 %v2413_v51 }
 0x1f4   : > { %7376 = vmatmul.msk.bf16.vlgmr.msrb.gmra.mxu2 %vm517_vm2, %v10112_v61 }
 0x1f5   : > { %2364 = vmatpush.bf16.msrb.mxu2 %v2277_v14  ;;  %v1467_v19 = vpop.f32.mrf.mxu3 }
 0x1f6   : > { %v1750_v5 = vpop.f32.mrf.mxu0  ;;  %v10289_v19 = vpop.permute.xlu1 %2681 }
 0x1f7   : > { %v1561_v15 = vpop.f32.mrf.mxu2  ;;  %v1602_v39 = vpop.f32.mrf.mxu1 }
 0x1f8   : > { %v1631_v0 = vadd.f32 %v1561_v15, %v1483_v28  ;;  %v2399_v28 = vsel %vm2395_vm14, %v10166_v33, %v10179_v42  ;;  %v10287_v33 = vpop.permute.xlu0 %2679  ;;  %v10294_v39 = vpop.permute.xlu2 %2683 }
 0x1f9   : > { %v2416_v51 = vsel %vm521_vm1, %v2399_v28, 0 }
 0x1fa   : > { %7377 = vmatmul.msk.bf16.vlgmr.msrb.gmra.mxu3 %vm517_vm2, %v10112_v61  ;;  %v2573_v61 = vsel %vm521_vm1, %v2550_v36, 0 }
 0x1fb   : > { %2434 = vmatpush.bf16.msrb.mxu3 %v2407_v43 }
 0x1fd   : > { %v1574_v54 = vpop.f32.mrf.mxu3 }
 0x1fe   : > { %v1632_v35 = vadd.f32 %v1574_v54, %v10072_v52  ;;  %v1857_v8 = vpop.f32.mrf.mxu0  ;;  %v2400_v52 = vsel %vm2395_vm14, %v10179_v42, %v10181_v45  ;;  %v2695_v42 = vsel %vm2691_vm7, %v10289_v19, %v10294_v39  ;;  %v2547_v45 = vsel %vm2543_vm15, %v10221_v16, %v10241_v9  ;;  %v10309_v54 = vld [vmem:[%s11517_s1 + $0x38] sm:$0xf] }
 0x1ff   : > { %v1563_v18 = vpop.f32.mrf.mxu2  ;;  %v1709_v26 = vpop.f32.mrf.mxu1  ;;  %v2712_v28 = vsel %vm521_vm1, %v2695_v42, 0 }
 0x200   : > { %v1779_v17 = vadd.f32 %v1709_v26, %v1631_v0  ;;  %v2419_v0 = vsel %vm521_vm1, %v2400_v52, 0  ;;  %v10314_v26 = vpop.permute.xlu0 %2685 }
 0x201   : > { %7392 = vmatmul.msk.bf16.vlgmr.msrb.gmra.mxu0 %vm517_vm2, %v10236_v4 }
 0x202   : > { %v10278_v50 = vadd.f32 %v1857_v8, %v1779_v17  ;;  %7384 = vmatmul.msk.bf16.vlgmr.msrb.gmra.mxu1 %vm517_vm2, %v10161_v21  ;;  %2660 = vmatpush.bf16.msrb.mxu0 %v2573_v61  ;;  %v2564_v8 = vsel %vm521_vm1, %v2547_v45, 0 }
 0x203   : > { %2512 = vmatpush.bf16.msrb.mxu1 %v2425_v63  ;;  %v2545_v63 = vsel %vm2543_vm15, %v10201_v62, %v10214_v30  ;;  %v2692_v30 = vsel %vm2691_vm7, %v10265_v22, %v10274_v6 }
 0x204   : > { %7381 = vmatmul.msk.bf16.vlgmr.msra.gmra.mxu2 %vm517_vm2, %v10161_v21 }
 0x205   : > { %2473 = vmatpush.bf16.msra.mxu2 %v2416_v51  ;;  %v1576_v12 = vpop.f32.mrf.mxu3 }
 0x206   : > { %v1859_v40 = vpop.f32.mrf.mxu0  ;;  %v10329_v12 = vpop.permute.xlu2 %2689 }
 0x207   : > { %v1613_v14 = vpop.f32.mrf.mxu2  ;;  %v1711_v5 = vpop.f32.mrf.mxu1 }
 0x208   : > { %v1635_v15 = vadd.f32 %v1613_v14, %v1487_v38  ;;  %v2544_v38 = vsel %vm2543_vm15, %v10217_v29, %v10201_v62  ;;  %v10316_v29 = vpop.permute.xlu1 %2687 }
 0x209   : > { %v2555_v61 = vsel %vm521_vm1, %v2544_v38, 0 }
 0x20a   : > { %7382 = vmatmul.msk.bf16.vlgmr.msra.gmra.mxu3 %vm517_vm2, %v10161_v21 }
 0x20b   : > { %2486 = vmatpush.bf16.msra.mxu3 %v2419_v0 }
 0x20d   : > { %v1626_v43 = vpop.f32.mrf.mxu3 }
 0x20e   : > { %v1636_v36 = vadd.f32 %v1626_v43, %v10127_v7  ;;  %v1909_v46 = vpop.f32.mrf.mxu0 }
 0x20f   : > { %v1615_v20 = vpop.f32.mrf.mxu2  ;;  %v1761_v18 = vpop.f32.mrf.mxu1 }
 0x210   : > { %v1783_v16 = vadd.f32 %v1761_v18, %v1635_v15  ;;  %v2558_v15 = vsel %vm521_vm1, %v2545_v63, 0  ;;  %v10334_v5 = vpop.permute.xlu1 %2825 }
 0x211   : > { %7397 = vmatmul.msk.bf16.vlgmr.msra.gmra.mxu0 %vm517_vm2, %v10309_v54 }
 0x212   : > { %v10320_v7 = vadd.f32 %v1909_v46, %v1783_v16  ;;  %7389 = vmatmul.msk.bf16.vlgmr.msra.gmra.mxu1 %vm517_vm2, %v10236_v4  ;;  %2769 = vmatpush.bf16.msra.mxu0 %v2712_v28  ;;  %v2703_v46 = vsel %vm521_vm1, %v2692_v30, 0  ;;  %v10383_v30 = vld [vmem:[%s11517_s1 + $0x3c] sm:$0xf] }
 0x213   : > { %2621 = vmatpush.bf16.msra.mxu1 %v2564_v8  ;;  %v10348_v8 = vpop.permute.xlu2 %2827 }
 0x214   : > { %7385 = vmatmul.msk.bf16.vlgmr.msrb.gmra.mxu2 %vm517_vm2, %v10161_v21  ;;  %v2824_v21 = vpop.permute.xlu0 %2823 }
 0x215   : > { %2582 = vmatpush.bf16.msrb.mxu2 %v2555_v61  ;;  %v1628_v17 = vpop.f32.mrf.mxu3  ;;  %v2840_v62 = vsel %vm2839_vm8, %v2824_v21, %v10334_v5 }
 0x216   : > { %v1911_v52 = vpop.f32.mrf.mxu0  ;;  %v2851_v38 = vsel %vm521_vm1, %v2840_v62, 0 }
 0x217   : > { %v1722_v51 = vpop.f32.mrf.mxu2  ;;  %v1763_v40 = vpop.f32.mrf.mxu1 }
 0x218   : > { %v1780_v14 = vadd.f32 %v1722_v51, %v1632_v35  ;;  %v2548_v35 = vsel %vm2543_vm15, %v10241_v9, %v10249_v3  ;;  %v10363_v17 = vpop.permute.xlu1 %2831 }
 0x219   : > { %v2567_v18 = vsel %vm521_vm1, %v2548_v35, 0 }
 0x21a   : > { %7387 = vmatmul.msk.bf16.vlgmr.msrb.gmra.mxu3 %vm517_vm2, %v10236_v4 }
 0x21b   : > { %2595 = vmatpush.bf16.msrb.mxu3 %v2558_v15  ;;  %v10368_v40 = vpop.permute.xlu2 %2833 }
 0x21c   : > { %v10361_v9 = vpop.permute.xlu0 %2829 }
 0x21d   : > { %v1735_v0 = vpop.f32.mrf.mxu3 }
 0x21e   : > { %v1781_v45 = vadd.f32 %v1735_v0, %v10170_v44  ;;  %v2018_v43 = vpop.f32.mrf.mxu0  ;;  %v2549_v44 = vsel %vm2543_vm15, %v10249_v3, %v10256_v13  ;;  %v2844_v3 = vsel %vm2839_vm8, %v10363_v17, %v10368_v40  ;;  %v2696_v13 = vsel %vm2691_vm7, %v10294_v39, %v10314_v26 }
 0x21f   : > { %v1724_v42 = vpop.f32.mrf.mxu2  ;;  %v1870_v20 = vpop.f32.mrf.mxu1  ;;  %v2863_v0 = vsel %vm521_vm1, %v2844_v3, 0 }
 0x220   : > { %v1928_v28 = vadd.f32 %v1870_v20, %v1780_v14  ;;  %v2570_v14 = vsel %vm521_vm1, %v2549_v44, 0  ;;  %v2715_v42 = vsel %vm521_vm1, %v2696_v13, 0  ;;  %v2694_v20 = vsel %vm2691_vm7, %v10287_v33, %v10289_v19 }
 0x221   : > { %7401 = vmatmul.msk.bf16.vlgmr.msrb.gmra.mxu0 %vm517_vm2, %v10309_v54  ;;  %v2841_v19 = vsel %vm2839_vm8, %v10334_v5, %v10348_v8 }
 0x222   : > { %v10352_v22 = vadd.f32 %v2018_v43, %v1928_v28  ;;  %7393 = vmatmul.msk.bf16.vlgmr.msrb.gmra.mxu1 %vm517_vm2, %v10236_v4  ;;  %2878 = vmatpush.bf16.msrb.mxu0 %v2851_v38 }
 0x223   : > { %2730 = vmatpush.bf16.msrb.mxu1 %v2703_v46  ;;  %v10403_v44 = vpop.permute.xlu2 %2973 }
 0x224   : > { %7390 = vmatmul.msk.bf16.vlgmr.msra.gmra.mxu2 %vm517_vm2, %v10236_v4  ;;  %v10388_v38 = vpop.permute.xlu0 %2835 }
 0x225   : > { %2634 = vmatpush.bf16.msra.mxu2 %v2567_v18  ;;  %v1737_v16 = vpop.f32.mrf.mxu3 }
 0x226   : > { %v2020_v63 = vpop.f32.mrf.mxu0 }
 0x227   : > { %v1774_v61 = vpop.f32.mrf.mxu2  ;;  %v1872_v52 = vpop.f32.mrf.mxu1  ;;  %v2709_v63 = vsel %vm521_vm1, %v2694_v20, 0 }
 0x228   : > { %v1784_v51 = vadd.f32 %v1774_v61, %v1636_v36  ;;  %v2693_v36 = vsel %vm2691_vm7, %v10274_v6, %v10287_v33  ;;  %v10390_v6 = vpop.permute.xlu1 %2971 }
 0x229   : > { %v2706_v43 = vsel %vm521_vm1, %v2693_v36, 0  ;;  %v10425_v36 = vld [vmem:[%s11517_s1 + $0x40] sm:$0xf] }
 0x22a   : > { %7391 = vmatmul.msk.bf16.vlgmr.msra.gmra.mxu3 %vm517_vm2, %v10236_v4 }
 0x22b   : > { %2647 = vmatpush.bf16.msra.mxu3 %v2570_v14  ;;  %v2697_v14 = vsel %vm2691_vm7, %v10314_v26, %v10316_v29  ;;  %v2698_v26 = vsel %vm2691_vm7, %v10316_v29, %v10329_v12  ;;  %v2845_v12 = vsel %vm2839_vm8, %v10368_v40, %v10388_v38 }
 0x22d   : > { %v1844_v15 = vpop.f32.mrf.mxu3 }
 0x22e   : > { %v1926_v62 = vadd.f32 %v1844_v15, %v10205_v41  ;;  %v2070_v4 = vpop.f32.mrf.mxu0 }
 0x22f   : > { %v1776_v21 = vpop.f32.mrf.mxu2  ;;  %v1922_v35 = vpop.f32.mrf.mxu1 }
 0x230   : > { %v1932_v39 = vadd.f32 %v1922_v35, %v1784_v51  ;;  %v10408_v51 = vpop.permute.xlu0 %2837  ;;  %v10410_v52 = vpop.permute.xlu1 %2975  ;;  %v2718_v35 = vsel %vm521_vm1, %v2697_v14, 0 }
 0x231   : > { %7406 = vmatmul.msk.bf16.vlgmr.msra.gmra.mxu0 %vm517_vm2, %v10383_v30  ;;  %v2989_v33 = vsel %vm2987_vm9, %v10403_v44, %v10410_v52 }
 0x232   : > { %v10394_v41 = vadd.f32 %v2070_v4, %v1932_v39  ;;  %7398 = vmatmul.msk.bf16.vlgmr.msra.gmra.mxu1 %vm517_vm2, %v10309_v54  ;;  %2930 = vmatpush.bf16.msra.mxu0 %v2863_v0  ;;  %v3002_v21 = vsel %vm521_vm1, %v2989_v33, 0  ;;  %v2854_v0 = vsel %vm521_vm1, %v2841_v19, 0 }
 0x233   : > { %2782 = vmatpush.bf16.msra.mxu1 %v2715_v42  ;;  %v10430_v42 = vpop.permute.xlu2 %2977 }
 0x234   : > { %7395 = vmatmul.msk.bf16.vlgmr.msrb.gmra.mxu2 %vm517_vm2, %v10309_v54 }
 0x235   : > { %2743 = vmatpush.bf16.msrb.mxu2 %v2706_v43  ;;  %v1846_v46 = vpop.f32.mrf.mxu3 }
 0x236   : > { %v2072_v18 = vpop.f32.mrf.mxu0 }
 0x237   : > { %v1883_v28 = vpop.f32.mrf.mxu2  ;;  %v1924_v61 = vpop.f32.mrf.mxu1 }
 0x238   : > { %v1929_v16 = vadd.f32 %v1883_v28, %v1781_v45  ;;  %v10443_v39 = vpop.permute.xlu0 %2979  ;;  %v10445_v28 = vpop.permute.xlu1 %2981  ;;  %v2721_v61 = vsel %vm521_vm1, %v2698_v26, 0 }
 0x23a   : > { %7396 = vmatmul.msk.bf16.vlgmr.msrb.gmra.mxu3 %vm517_vm2, %v10309_v54 }
 0x23b   : > { %2756 = vmatpush.bf16.msrb.mxu3 %v2709_v63  ;;  %v10450_v63 = vpop.permute.xlu2 %2983 }
 0x23c   : > { %v2993_v29 = vsel %vm2987_vm9, %v10445_v28, %v10450_v63 }
 0x23d   : > { %v1896_v45 = vpop.f32.mrf.mxu3  ;;  %v3014_v14 = vsel %vm521_vm1, %v2993_v29, 0  ;;  %v2846_v29 = vsel %vm2839_vm8, %v10388_v38, %v10408_v51  ;;  %v2988_v38 = vsel %vm2987_vm9, %v10390_v6, %v10403_v44 }
 0x23e   : > { %v1930_v13 = vadd.f32 %v1896_v45, %v10245_v24  ;;  %v2179_v15 = vpop.f32.mrf.mxu0 }
 0x23f   : > { %v1885_v3 = vpop.f32.mrf.mxu2  ;;  %v2031_v4 = vpop.f32.mrf.mxu1 }
 0x240   : > { %v2077_v5 = vadd.f32 %v2031_v4, %v1929_v16 }
 0x241   : > { %7411 = vmatmul.msk.bf16.vlgmr.msrb.gmra.mxu0 %vm517_vm2, %v10425_v36 }
 0x242   : > { %v10434_v24 = vadd.f32 %v2179_v15, %v2077_v5  ;;  %7403 = vmatmul.msk.bf16.vlgmr.msrb.gmra.mxu1 %vm517_vm2, %v10383_v30  ;;  %3039 = vmatpush.bf16.msrb.mxu0 %v3002_v21  ;;  %v2866_v15 = vsel %vm521_vm1, %v2845_v12, 0  ;;  %v10465_v5 = vpop.permute.xlu1 %3121 }
 0x243   : > { %2891 = vmatpush.bf16.msrb.mxu1 %v2854_v0  ;;  %v2986_v0 = vpop.permute.xlu0 %2985 }
 0x244   : > { %7399 = vmatmul.msk.bf16.vlgmr.msra.gmra.mxu2 %vm517_vm2, %v10309_v54  ;;  %v2994_v6 = vsel %vm2987_vm9, %v10450_v63, %v2986_v0 }
 0x245   : > { %2795 = vmatpush.bf16.msra.mxu2 %v2718_v35  ;;  %v1898_v43 = vpop.f32.mrf.mxu3 }
 0x246   : > { %v2181_v46 = vpop.f32.mrf.mxu0  ;;  %v10478_v43 = vpop.permute.xlu2 %3123 }
 0x247   : > { %v1992_v20 = vpop.f32.mrf.mxu2  ;;  %v2033_v16 = vpop.f32.mrf.mxu1 }
 0x248   : > { %v2074_v18 = vadd.f32 %v1992_v20, %v1926_v62  ;;  %v2842_v62 = vsel %vm2839_vm8, %v10348_v8, %v10361_v9 }
 0x249   : > { %v2857_v4 = vsel %vm521_vm1, %v2842_v62, 0 }
 0x24a   : > { %7400 = vmatmul.msk.bf16.vlgmr.msra.gmra.mxu3 %vm517_vm2, %v10309_v54 }
 0x24b   : > { %2808 = vmatpush.bf16.msra.mxu3 %v2721_v61  ;;  %v10483_v16 = vpop.permute.xlu0 %3119  ;;  %v10485_v61 = vpop.permute.xlu1 %3125 }
 0x24d   : > { %v2005_v33 = vpop.f32.mrf.mxu3 }
 0x24e   : > { %v2075_v45 = vadd.f32 %v2005_v33, %v10278_v50  ;;  %v2288_v54 = vpop.f32.mrf.mxu0  ;;  %v2843_v50 = vsel %vm2839_vm8, %v10361_v9, %v10363_v17  ;;  %v3138_v9 = vsel %vm3135_vm10, %v10478_v43, %v10485_v61  ;;  %v2990_v17 = vsel %vm2987_vm9, %v10410_v52, %v10430_v42 }
 0x24f   : > { %v1994_v19 = vpop.f32.mrf.mxu2  ;;  %v2140_v3 = vpop.f32.mrf.mxu1 }
 0x250   : > { %v2222_v21 = vadd.f32 %v2140_v3, %v2074_v18  ;;  %v2860_v18 = vsel %vm521_vm1, %v2843_v50, 0  ;;  %v10500_v19 = vld [vmem:[%s11517_s1 + $0x44] sm:$0xf]  ;;  %v3005_v3 = vsel %vm521_vm1, %v2990_v17, 0  ;;  %v2991_v17 = vsel %vm2987_vm9, %v10430_v42, %v10443_v39 }
 0x251   : > { %7415 = vmatmul.msk.bf16.vlgmr.msra.gmra.mxu0 %vm517_vm2, %v10425_v36 }
 0x252   : > { %v10469_v40 = vadd.f32 %v2288_v54, %v2222_v21  ;;  %7407 = vmatmul.msk.bf16.vlgmr.msra.gmra.mxu1 %vm517_vm2, %v10383_v30  ;;  %3091 = vmatpush.bf16.msra.mxu0 %v3014_v14  ;;  %v3153_v54 = vsel %vm521_vm1, %v3138_v9, 0  ;;  %v2869_v21 = vsel %vm521_vm1, %v2846_v29, 0 }
 0x253   : > { %2943 = vmatpush.bf16.msra.mxu1 %v2866_v15  ;;  %v10504_v15 = vpop.permute.xlu2 %3127  ;;  %v10518_v51 = vpop.permute.xlu0 %3129 }
 0x254   : > { %7404 = vmatmul.msk.bf16.vlgmr.msrb.gmra.mxu2 %vm517_vm2, %v10383_v30 }
 0x255   : > { %2904 = vmatpush.bf16.msrb.mxu2 %v2857_v4  ;;  %v2007_v8 = vpop.f32.mrf.mxu3 }
 0x256   : > { %v2290_v26 = vpop.f32.mrf.mxu0 }
 0x257   : > { %v2044_v35 = vpop.f32.mrf.mxu2  ;;  %v2142_v46 = vpop.f32.mrf.mxu1 }
 0x258   : > { %v2078_v20 = vadd.f32 %v2044_v35, %v1930_v13  ;;  %v10520_v35 = vpop.permute.xlu1 %3131  ;;  %v2999_v46 = vsel %vm521_vm1, %v2988_v38, 0 }
 0x25a   : > { %7405 = vmatmul.msk.bf16.vlgmr.msrb.gmra.mxu3 %vm517_vm2, %v10383_v30 }
 0x25b   : > { %2917 = vmatpush.bf16.msrb.mxu3 %v2860_v18  ;;  %v3134_v18 = vpop.permute.xlu2 %3133 }
 0x25c   : > { %v3142_v9 = vsel %vm3135_vm10, %v10520_v35, %v3134_v18 }
 0x25d   : > { %v2057_v13 = vpop.f32.mrf.mxu3 }
 0x25e   : > { %v2079_v33 = vadd.f32 %v2057_v13, %v10320_v7  ;;  %v2340_v62 = vpop.f32.mrf.mxu0 }
 0x25f   : > { %v2046_v12 = vpop.f32.mrf.mxu2  ;;  %v2192_v14 = vpop.f32.mrf.mxu1 }
 0x260   : > { %v2226_v52 = vadd.f32 %v2192_v14, %v2078_v20  ;;  %v3165_v12 = vsel %vm521_vm1, %v3142_v9, 0  ;;  %v3008_v14 = vsel %vm521_vm1, %v2991_v17, 0 }
 0x261   : > { %7420 = vmatmul.msk.bf16.vlgmr.msrb.gmra.mxu0 %vm517_vm2, %v10500_v19 }
 0x262   : > { %v10509_v7 = vadd.f32 %v2340_v62, %v2226_v52  ;;  %7412 = vmatmul.msk.bf16.vlgmr.msrb.gmra.mxu1 %vm517_vm2, %v10425_v36  ;;  %3200 = vmatpush.bf16.msrb.mxu0 %v3153_v54  ;;  %v3017_v62 = vsel %vm521_vm1, %v2994_v6, 0  ;;  %v10536_v52 = vpop.permute.xlu1 %3269  ;;  %v10566_v6 = vld [vmem:[%s11517_s1 + $0x48] sm:$0xf] }
 0x263   : > { %3052 = vmatpush.bf16.msrb.mxu1 %v3005_v3  ;;  %v3268_v3 = vpop.permute.xlu0 %3267 }
 0x264   : > { %7408 = vmatmul.msk.bf16.vlgmr.msra.gmra.mxu2 %vm517_vm2, %v10383_v30 }
 0x265   : > { %2956 = vmatpush.bf16.msra.mxu2 %v2869_v21  ;;  %v2059_v4 = vpop.f32.mrf.mxu3 }
 0x266   : > { %v2342_v8 = vpop.f32.mrf.mxu0 }
 0x267   : > { %v2153_v50 = vpop.f32.mrf.mxu2  ;;  %v2194_v20 = vpop.f32.mrf.mxu1 }
 0x268   : > { %v2223_v26 = vadd.f32 %v2153_v50, %v2075_v45 }
 0x26a   : > { %7409 = vmatmul.msk.bf16.vlgmr.msra.gmra.mxu3 %vm517_vm2, %v10383_v30 }
 0x26b   : > { %3026 = vmatpush.bf16.msra.mxu3 %v2999_v46  ;;  %v10552_v8 = vpop.permute.xlu0 %3273 }
 0x26d   : > { %v2166_v44 = vpop.f32.mrf.mxu3 }
 0x26e   : > { %v2224_v13 = vadd.f32 %v2166_v44, %v10352_v22  ;;  %v2449_v29 = vpop.f32.mrf.mxu0  ;;  %v2992_v22 = vsel %vm2987_vm9, %v10443_v39, %v10445_v28  ;;  %v3139_v39 = vsel %vm3135_vm10, %v10485_v61, %v10504_v15 }
 0x26f   : > { %v2155_v45 = vpop.f32.mrf.mxu2  ;;  %v2301_v30 = vpop.f32.mrf.mxu1  ;;  %v3011_v50 = vsel %vm521_vm1, %v2992_v22, 0 }
 0x270   : > { %v2371_v54 = vadd.f32 %v2301_v30, %v2223_v26  ;;  %v3276_v26 = vpop.permute.xlu1 %3275  ;;  %v3156_v45 = vsel %vm521_vm1, %v3139_v39, 0 }
 0x271   : > { %7424 = vmatmul.msk.bf16.vlgmr.msra.gmra.mxu0 %vm517_vm2, %v10500_v19  ;;  %v3287_v20 = vsel %vm3283_vm11, %v10552_v8, %v3276_v26 }
 0x272   : > { %v10540_v63 = vadd.f32 %v2449_v29, %v2371_v54  ;;  %7416 = vmatmul.msk.bf16.vlgmr.msra.gmra.mxu1 %vm517_vm2, %v10425_v36  ;;  %3252 = vmatpush.bf16.msra.mxu0 %v3165_v12  ;;  %v3304_v44 = vsel %vm521_vm1, %v3287_v20, 0  ;;  %v3272_v20 = vpop.permute.xlu2 %3271 }
 0x273   : > { %3104 = vmatpush.bf16.msra.mxu1 %v3017_v62 }
 0x274   : > { %7413 = vmatmul.msk.bf16.vlgmr.msrb.gmra.mxu2 %vm517_vm2, %v10425_v36 }
 0x275   : > { %3065 = vmatpush.bf16.msrb.mxu2 %v3008_v14  ;;  %v2168_v42 = vpop.f32.mrf.mxu3 }
 0x276   : > { %v2451_v21 = vpop.f32.mrf.mxu0 }
 0x277   : > { %v2205_v0 = vpop.f32.mrf.mxu2  ;;  %v2303_v4 = vpop.f32.mrf.mxu1 }
 0x278   : > { %v2227_v38 = vadd.f32 %v2205_v0, %v2079_v33  ;;  %v3136_v33 = vsel %vm3135_vm10, %v10483_v16, %v10465_v5  ;;  %v3140_v0 = vsel %vm3135_vm10, %v10504_v15, %v10518_v51 }
 0x279   : > { %v3147_v29 = vsel %vm521_vm1, %v3136_v33, 0 }
 0x27a   : > { %7414 = vmatmul.msk.bf16.vlgmr.msrb.gmra.mxu3 %vm517_vm2, %v10425_v36 }
 0x27b   : > { %3078 = vmatpush.bf16.msrb.mxu3 %v3011_v50  ;;  %v3159_v50 = vsel %vm521_vm1, %v3140_v0, 0 }
 0x27d   : > { %v2218_v28 = vpop.f32.mrf.mxu3 }
 0x27e   : > { %v2228_v18 = vadd.f32 %v2218_v28, %v10394_v41  ;;  %v2501_v9 = vpop.f32.mrf.mxu0  ;;  %v3137_v41 = vsel %vm3135_vm10, %v10465_v5, %v10478_v43 }
 0x27f   : > { %v2207_v46 = vpop.f32.mrf.mxu2  ;;  %v2353_v17 = vpop.f32.mrf.mxu1  ;;  %v3150_v22 = vsel %vm521_vm1, %v3137_v41, 0 }
 0x280   : > { %v2375_v61 = vadd.f32 %v2353_v17, %v2227_v38 }
 0x281   : > { %7429 = vmatmul.msk.bf16.vlgmr.msrb.gmra.mxu0 %vm517_vm2, %v10566_v6 }
 0x282   : > { %v10573_v16 = vadd.f32 %v2501_v9, %v2375_v61  ;;  %7421 = vmatmul.msk.bf16.vlgmr.msrb.gmra.mxu1 %vm517_vm2, %v10500_v19  ;;  %3361 = vmatpush.bf16.msrb.mxu0 %v3304_v44 }
 0x283   : > { %3213 = vmatpush.bf16.msrb.mxu1 %v3156_v45  ;;  %v3285_v45 = vsel %vm3283_vm11, %v10536_v52, %v3272_v20 }
 0x284   : > { %7417 = vmatmul.msk.bf16.vlgmr.msra.gmra.mxu2 %vm517_vm2, %v10425_v36  ;;  %v3284_v36 = vsel %vm3283_vm11, %v3268_v3, %v10536_v52 }
 0x285   : > { %3174 = vmatpush.bf16.msra.mxu2 %v3147_v29  ;;  %v2220_v12 = vpop.f32.mrf.mxu3  ;;  %v3295_v38 = vsel %vm521_vm1, %v3284_v36, 0 }
 0x286   : > { %v2503_v62 = vpop.f32.mrf.mxu0  ;;  %v3298_v12 = vsel %vm521_vm1, %v3285_v45, 0 }
 0x287   : > { %v2314_v30 = vpop.f32.mrf.mxu2  ;;  %v2355_v14 = vpop.f32.mrf.mxu1 }
 0x288   : > { %v2372_v54 = vadd.f32 %v2314_v30, %v2224_v13 }
 0x28a   : > { %7419 = vmatmul.msk.bf16.vlgmr.msra.gmra.mxu3 %vm517_vm2, %v10500_v19 }
 0x28b   : > { %3187 = vmatpush.bf16.msra.mxu3 %v3150_v22 }
 0x28d   : > { %v2327_v42 = vpop.f32.mrf.mxu3 }
 0x28e   : > { %v2373_v43 = vadd.f32 %v2327_v42, %v10434_v24  ;;  %v2610_v21 = vpop.f32.mrf.mxu0  ;;  %v3141_v24 = vsel %vm3135_vm10, %v10518_v51, %v10520_v35 }
 0x28f   : > { %v2316_v5 = vpop.f32.mrf.mxu2  ;;  %v2462_v13 = vpop.f32.mrf.mxu1  ;;  %v3162_v9 = vsel %vm521_vm1, %v3141_v24, 0 }
 0x290   : > { %v2520_v4 = vadd.f32 %v2462_v13, %v2372_v54 }
 0x291   : > { %7433 = vmatmul.msk.bf16.vlgmr.msra.gmra.mxu0 %vm517_vm2, %v10566_v6 }
 0x292   : > { %v10595_v3 = vadd.f32 %v2610_v21, %v2520_v4  ;;  %7425 = vmatmul.msk.bf16.vlgmr.msra.gmra.mxu1 %vm517_vm2, %v10500_v19  ;;  %3428 = vmatpush.bf16.msra.mxu0 %v9135_v31  ;;  %v3278_v31 = vpop.permute.xlu2 %3277 }
 0x293   : > { %3322 = vmatpush.bf16.msra.mxu1 %v3295_v38  ;;  %v3288_v44 = vsel %vm3283_vm11, %v3276_v26, %v3278_v31 }
 0x294   : > { %7422 = vmatmul.msk.bf16.vlgmr.msrb.gmra.mxu2 %vm517_vm2, %v10500_v19 }
 0x295   : > { %3226 = vmatpush.bf16.msrb.mxu2 %v3159_v50  ;;  %v2329_v15 = vpop.f32.mrf.mxu3 }
 0x296   : > { %v2612_v28 = vpop.f32.mrf.mxu0 }
 0x297   : > { %v2366_v39 = vpop.f32.mrf.mxu2  ;;  %v2464_v46 = vpop.f32.mrf.mxu1 }
 0x298   : > { %v2376_v33 = vadd.f32 %v2366_v39, %v2228_v18  ;;  %v10615_v18 = vld [vmem:[%s11517_s1 + $0x4c] sm:$0xf] }
 0x29a   : > { %7423 = vmatmul.msk.bf16.vlgmr.msrb.gmra.mxu3 %vm517_vm2, %v10500_v19  ;;  %v3307_v19 = vsel %vm521_vm1, %v3288_v44, 0 }
 0x29b   : > { %3239 = vmatpush.bf16.msrb.mxu3 %v3162_v9 }
 0x29d   : > { %v2436_v17 = vpop.f32.mrf.mxu3 }
 0x29e   : > { %v2518_v51 = vadd.f32 %v2436_v17, %v10469_v40  ;;  %v2662_v35 = vpop.f32.mrf.mxu0  ;;  %v3286_v40 = vsel %vm3283_vm11, %v3272_v20, %v10552_v8  ;;  %v10638_v8 = vld [vmem:[%s11517_s1 + $0x50] sm:$0xf] }
 0x29f   : > { %v2368_v61 = vpop.f32.mrf.mxu2  ;;  %v2514_v29 = vpop.f32.mrf.mxu1  ;;  %v3301_v22 = vsel %vm521_vm1, %v3286_v40, 0 }
 0x2a0   : > { %v2524_v41 = vadd.f32 %v2514_v29, %v2376_v33 }
 0x2a1   : > { %7438 = vmatmul.msk.bf16.vlgmr.msrb.gmra.mxu0 %vm517_vm2, %v10615_v18 }
 0x2a2   : > { %v10621_v26 = vadd.f32 %v2662_v35, %v2524_v41  ;;  %7430 = vmatmul.msk.bf16.vlgmr.msrb.gmra.mxu1 %vm517_vm2, %v10566_v6  ;;  %3480 = vmatpush.bf16.msrb.mxu0 %v9149_v34  ;;  %v3280_v34 = vpop.permute.xlu0 %3279 }
 0x2a3   : > { %3374 = vmatpush.bf16.msrb.mxu1 %v3307_v19  ;;  %v3289_v42 = vsel %vm3283_vm11, %v3278_v31, %v3280_v34 }
 0x2a4   : > { %7427 = vmatmul.msk.bf16.vlgmr.msra.gmra.mxu2 %vm517_vm2, %v10566_v6  ;;  %v3310_v38 = vsel %vm521_vm1, %v3289_v42, 0 }
 0x2a5   : > { %3335 = vmatpush.bf16.msra.mxu2 %v3298_v12  ;;  %v2438_v52 = vpop.f32.mrf.mxu3  ;;  %v3419_v12 = vsel %vm521_vm1, %v9064_v27, 0 }
 0x2a6   : > { %v2664_v62 = vpop.f32.mrf.mxu0 }
 0x2a7   : > { %v2475_v30 = vpop.f32.mrf.mxu2  ;;  %v2516_v14 = vpop.f32.mrf.mxu1 }
 0x2a8   : > { %v2521_v54 = vadd.f32 %v2475_v30, %v2373_v43 }
 0x2aa   : > { %7428 = vmatmul.msk.bf16.vlgmr.msra.gmra.mxu3 %vm517_vm2, %v10566_v6  ;;  %v3634_v27 = vpop.permute.xlu0 %3633 }
 0x2ab   : > { %3348 = vmatpush.bf16.msra.mxu3 %v3301_v22 }
 0x2ad   : > { %v2488_v36 = vpop.f32.mrf.mxu3 }
 0x2ae   : > { %v2522_v5 = vadd.f32 %v2488_v36, %v10509_v7  ;;  %v2771_v21 = vpop.f32.mrf.mxu0  ;;  %v3282_v7 = vpop.permute.xlu1 %3281 }
 0x2af   : > { %v2477_v0 = vpop.f32.mrf.mxu2  ;;  %v2623_v43 = vpop.f32.mrf.mxu1  ;;  %v3290_v50 = vsel %vm3283_vm11, %v3280_v34, %v3282_v7  ;;  %vm5419_vm11 = vcmask 818176  }
 0x2b0   : > { %v2669_v13 = vadd.f32 %v2623_v43, %v2521_v54  ;;  %v3313_v33 = vsel %vm521_vm1, %v3290_v50, 0  ;;  %v3525_v54 = vpop.permute.xlu2 %3524 }
 0x2b1   : > { %7443 = vmatmul.msk.bf16.vlgmr.msra.gmra.mxu0 %vm517_vm2, %v10638_v8  ;;  %v3526_v36 = vsel %vm509_vm0, %v9206_v53, %v3525_v54  ;;  %v11539_v54 = vld [vmem:[#allocation10_spill] sm:$0xff] }
 0x2b2   : > { %v10643_v4 = vadd.f32 %v2771_v21, %v2669_v13  ;;  %7435 = vmatmul.msk.bf16.vlgmr.msra.gmra.mxu1 %vm517_vm2, %v10615_v18  ;;  %3553 = vmatpush.bf16.msra.mxu0 %v9186_v48 }
 0x2b3   : > { %3441 = vmatpush.bf16.msra.mxu1 %v9213_v56 }
 0x2b4   : > { %7431 = vmatmul.msk.bf16.vlgmr.msrb.gmra.mxu2 %vm517_vm2, %v10566_v6 }
 0x2b5   : > { %3387 = vmatpush.bf16.msrb.mxu2 %v3310_v38  ;;  %v2490_v20 = vpop.f32.mrf.mxu3 }
 0x2b6   : > { %v2773_v15 = vpop.f32.mrf.mxu0  ;;  %v10714_v20 = vld [vmem:[%s11517_s1 + $0x58] sm:$0xf] }
 0x2b7   : > { %v2584_v24 = vpop.f32.mrf.mxu2  ;;  %v2625_v28 = vpop.f32.mrf.mxu1 }
 0x2b8   : > { %v2666_v39 = vadd.f32 %v2584_v24, %v2518_v51 }
 0x2ba   : > { %7432 = vmatmul.msk.bf16.vlgmr.msrb.gmra.mxu3 %vm517_vm2, %v10566_v6 }
 0x2bb   : > { %3400 = vmatpush.bf16.msrb.mxu3 %v3313_v33 }
 0x2bd   : > { %v2597_v48 = vpop.f32.mrf.mxu3 }
 0x2be   : > { %v2667_v9 = vadd.f32 %v2597_v48, %v10540_v63  ;;  %v2880_v56 = vpop.f32.mrf.mxu0 }
 0x2bf   : > { %v2586_v46 = vpop.f32.mrf.mxu2  ;;  %v2732_v31 = vpop.f32.mrf.mxu1 }
 0x2c0   : > { %v2814_v44 = vadd.f32 %v2732_v31, %v2666_v39 }
 0x2c1   : > { %7447 = vmatmul.msk.bf16.vlgmr.msrb.gmra.mxu0 %vm517_vm2, %v10638_v8 }
 0x2c2   : > { %v10658_v17 = vadd.f32 %v2880_v56, %v2814_v44  ;;  %7439 = vmatmul.msk.bf16.vlgmr.msrb.gmra.mxu1 %vm517_vm2, %v10615_v18  ;;  %3605 = vmatpush.bf16.msrb.mxu0 %v9219_v58 }
 0x2c3   : > { %3493 = vmatpush.bf16.msrb.mxu1 %v9234_v60  ;;  %v10674_v60 = vld [vmem:[%s11517_s1 + $0x54] sm:$0xf] }
 0x2c4   : > { %7436 = vmatmul.msk.bf16.vlgmr.msra.gmra.mxu2 %vm517_vm2, %v10615_v18 }
 0x2c5   : > { %3454 = vmatpush.bf16.msra.mxu2 %v9230_v59  ;;  %v2599_v63 = vpop.f32.mrf.mxu3 }
 0x2c6   : > { %v2882_v45 = vpop.f32.mrf.mxu0 }
 0x2c7   : > { %v2636_v6 = vpop.f32.mrf.mxu2  ;;  %v2734_v51 = vpop.f32.mrf.mxu1  ;;  %v11534_v45 = vld [vmem:[#allocation8_spill] sm:$0xff] }
 0x2c8   : > { %v2670_v61 = vadd.f32 %v2636_v6, %v2522_v5 }
 0x2ca   : > { %7437 = vmatmul.msk.bf16.vlgmr.msra.gmra.mxu3 %vm517_vm2, %v10615_v18 }
 0x2cb   : > { %3467 = vmatpush.bf16.msra.mxu3 %v9256_v2 }
 0x2cd   : > { %v2649_v35 = vpop.f32.mrf.mxu3 }
 0x2ce   : > { %v2671_v58 = vadd.f32 %v2649_v35, %v10573_v16  ;;  %v2932_v19 = vpop.f32.mrf.mxu0 }
 0x2cf   : > { %v2638_v29 = vpop.f32.mrf.mxu2  ;;  %v2784_v59 = vpop.f32.mrf.mxu1 }
 0x2d0   : > { %v2818_v41 = vadd.f32 %v2784_v59, %v2670_v61  ;;  %v10749_v29 = vld [vmem:[%s11517_s1 + $0x5c] sm:$0xf]  ;;  %v8874_v59 = vmov 0  }
 0x2d1   : > { %7452 = vmatmul.msk.bf16.vlgmr.msra.gmra.mxu0 %vm517_vm2, %v10674_v60  ;;  %8728 = vset.pattern.permute.xlu0 %v8874_v59 }
 0x2d2   : > { %v10680_v40 = vadd.f32 %v2932_v19, %v2818_v41  ;;  %7444 = vmatmul.msk.bf16.vlgmr.msra.gmra.mxu1 %vm517_vm2, %v10638_v8  ;;  %3675 = vmatpush.bf16.msra.mxu0 %v9284_v10  ;;  %v3635_v10 = vsel %vm767_vm3, %v9294_v11, %v3634_v27 }
 0x2d3   : > { %3566 = vmatpush.bf16.msra.mxu1 %v9189_v49  ;;  %v3640_v5 = vsel %vm521_vm1, %v3635_v10, 0  ;;  %8729 = vset.pattern.permute.xlu2 %v8874_v59 }
 0x2d4   : > { %7440 = vmatmul.msk.bf16.vlgmr.msrb.gmra.mxu2 %vm517_vm2, %v10615_v18 }
 0x2d5   : > { %3506 = vmatpush.bf16.msrb.mxu2 %v3419_v12  ;;  %v2651_v2 = vpop.f32.mrf.mxu3  ;;  %v11537_v12 = vld [vmem:[#allocation15_spill] sm:$0xff] }
 0x2d6   : > { %v2934_v52 = vpop.f32.mrf.mxu0  ;;  %v11538_v2 = vld [vmem:[#allocation14_spill] sm:$0xff] }
 0x2d7   : > { %v2745_v16 = vpop.f32.mrf.mxu2  ;;  %v2786_v62 = vpop.f32.mrf.mxu1 }
 0x2d8   : > { %v2815_v30 = vadd.f32 %v2745_v16, %v2667_v9 }
 0x2da   : > { %7441 = vmatmul.msk.bf16.vlgmr.msrb.gmra.mxu3 %vm517_vm2, %v10615_v18 }
 0x2db   : > { %3540 = vmatpush.bf16.msrb.mxu3 %v9183_v47  ;;  %v3531_v47 = vsel %vm521_vm1, %v3526_v36, 0 }
 0x2dd   : > { %v2758_v14 = vpop.f32.mrf.mxu3 }
 0x2de   : > { %v2816_v49 = vadd.f32 %v2758_v14, %v10595_v3  ;;  %v3041_v34 = vpop.f32.mrf.mxu0 }
 0x2df   : > { %v2747_v22 = vpop.f32.mrf.mxu2  ;;  %v2893_v42 = vpop.f32.mrf.mxu1 }
 0x2e0   : > { %v2963_v0 = vadd.f32 %v2893_v42, %v2815_v30 }
 0x2e1   : > { %7456 = vmatmul.msk.bf16.vlgmr.msrb.gmra.mxu0 %vm517_vm2, %v10674_v60 }
 0x2e2   : > { %v10700_v18 = vadd.f32 %v3041_v34, %v2963_v0  ;;  %7448 = vmatmul.msk.bf16.vlgmr.msrb.gmra.mxu1 %vm517_vm2, %v10638_v8  ;;  %3727 = vmatpush.bf16.msrb.mxu0 %v3640_v5  ;;  %v10772_v34 = vld [vmem:[%s11517_s1 + $0x60] sm:$0xf]  ;;  %v3743_v5 = vpop.permute.xlu1 %3742 }
 0x2e3   : > { %3618 = vmatpush.bf16.msrb.mxu1 %v3531_v47  ;;  %v11541_v47 = vld [vmem:[#allocation17_spill] sm:$0xff] }
 0x2e4   : > { %7445 = vmatmul.msk.bf16.vlgmr.msra.gmra.mxu2 %vm517_vm2, %v10638_v8 }
 0x2e5   : > { %3579 = vmatpush.bf16.msra.mxu2 %v9138_v32  ;;  %v2760_v53 = vpop.f32.mrf.mxu3 }
 0x2e6   : > { %v3043_v3 = vpop.f32.mrf.mxu0 }
 0x2e7   : > { %v2797_v11 = vpop.f32.mrf.mxu2  ;;  %v2895_v43 = vpop.f32.mrf.mxu1 }
 0x2e8   : > { %v2819_v21 = vadd.f32 %v2797_v11, %v2671_v58 }
 0x2ea   : > { %7446 = vmatmul.msk.bf16.vlgmr.msra.gmra.mxu3 %vm517_vm2, %v10638_v8 }
 0x2eb   : > { %3592 = vmatpush.bf16.msra.mxu3 %v9216_v57 }
 0x2ed   : > { %v2810_v13 = vpop.f32.mrf.mxu3 }
 0x2ee   : > { %v2820_v7 = vadd.f32 %v2810_v13, %v10621_v26  ;;  %v3093_v50 = vpop.f32.mrf.mxu0 }
 0x2ef   : > { %v2799_v38 = vpop.f32.mrf.mxu2  ;;  %v2945_v32 = vpop.f32.mrf.mxu1 }
 0x2f0   : > { %v2967_v24 = vadd.f32 %v2945_v32, %v2819_v21  ;;  %v11542_v21 = vld [vmem:[#allocation9_spill] sm:$0xff] }
 0x2f1   : > { %7461 = vmatmul.msk.bf16.vlgmr.msra.gmra.mxu0 %vm517_vm2, %v10714_v20  ;;  %v3744_v43 = vsel %vm915_vm4, %v11542_v21, %v3743_v5  ;;  %v7508_v21 = vld [vmem:[#allocation2 + $0x30] sm:$0xf] }
 0x2f2   : > { %v10718_v15 = vadd.f32 %v3093_v50, %v2967_v24  ;;  %7453 = vmatmul.msk.bf16.vlgmr.msra.gmra.mxu1 %vm517_vm2, %v10674_v60  ;;  %3797 = vmatpush.bf16.msra.mxu0 %v9385_v55 }
 0x2f3   : > { %3688 = vmatpush.bf16.msra.mxu1 %v9337_v37  ;;  %v11533_v37 = vld [vmem:[#allocation11_spill] sm:$0xff] }
 0x2f4   : > { %7449 = vmatmul.msk.bf16.vlgmr.msrb.gmra.mxu2 %vm517_vm2, %v10638_v8 }
 0x2f5   : > { %3649 = vmatpush.bf16.msrb.mxu2 %v9309_v23  ;;  %v2812_v57 = vpop.f32.mrf.mxu3 }
 0x2f6   : > { %v3095_v39 = vpop.f32.mrf.mxu0 }
 0x2f7   : > { %v2906_v26 = vpop.f32.mrf.mxu2  ;;  %v2947_v33 = vpop.f32.mrf.mxu1 }
 0x2f8   : > { %v2964_v28 = vadd.f32 %v2906_v26, %v2816_v49  ;;  %v11544_v33 = vld [vmem:[#allocation20_spill] sm:$0xff] }
 0x2fa   : > { %7451 = vmatmul.msk.bf16.vlgmr.msrb.gmra.mxu3 %vm517_vm2, %v10674_v60 }
 0x2fb   : > { %3662 = vmatpush.bf16.msrb.mxu3 %v9251_v1  ;;  %v11532_v1 = vld [vmem:[#allocation12_spill] sm:$0xff] }
 0x2fd   : > { %v2919_v48 = vpop.f32.mrf.mxu3 }
 0x2fe   : > { %v2965_v55 = vadd.f32 %v2919_v48, %v10643_v4  ;;  %v3202_v9 = vpop.f32.mrf.mxu0 }
 0x2ff   : > { %v2908_v46 = vpop.f32.mrf.mxu2  ;;  %v3054_v8 = vpop.f32.mrf.mxu1 }
 0x300   : > { %v3112_v56 = vadd.f32 %v3054_v8, %v2964_v28  ;;  %v11545_v8 = vld [vmem:[#allocation13_spill] sm:$0xff] }
 0x301   : > { %7465 = vmatmul.msk.bf16.vlgmr.msrb.gmra.mxu0 %vm517_vm2, %v10714_v20 }
 0x302   : > { %v10733_v23 = vadd.f32 %v3202_v9, %v3112_v56  ;;  %7457 = vmatmul.msk.bf16.vlgmr.msrb.gmra.mxu1 %vm517_vm2, %v10674_v60  ;;  %3867 = vmatpush.bf16.msrb.mxu0 %v9444_v25  ;;  %v3852_v56 = vpop.permute.xlu2 %3851 }
 0x303   : > { %3758 = vmatpush.bf16.msrb.mxu1 %v11532_v1 }
 0x304   : > { %7454 = vmatmul.msk.bf16.vlgmr.msra.gmra.mxu2 %vm517_vm2, %v10674_v60 }
 0x305   : > { %3701 = vmatpush.bf16.msra.mxu2 %v11533_v37  ;;  %v2921_v4 = vpop.f32.mrf.mxu3 }
 0x306   : > { %v3204_v44 = vpop.f32.mrf.mxu0 }
 0x307   : > { %v2958_v31 = vpop.f32.mrf.mxu2  ;;  %v3056_v6 = vpop.f32.mrf.mxu1 }
 0x308   : > { %v2968_v63 = vadd.f32 %v2958_v31, %v2820_v7  ;;  %v3749_v7 = vsel %vm521_vm1, %v3744_v43, 0  ;;  %v8448_v43 = vld [vmem:[#allocation2 + $0x34] sm:$0xf0] }
 0x30a   : > { %7455 = vmatmul.msk.bf16.vlgmr.msra.gmra.mxu3 %vm517_vm2, %v10674_v60  ;;  %v3958_v60 = vld [vmem:[%s11535_s2] sm:$0xff] }
 0x30b   : > { %3714 = vmatpush.bf16.msra.mxu3 %v11534_v45  ;;  %3961 = vperm.xlu0 %8728, %v3958_v60   ;;  %v7540_v60 = vld [vmem:[#allocation2 + $0x70] sm:$0xf] }
 0x30d   : > { %v3028_v61 = vpop.f32.mrf.mxu3 }
 0x30e   : > { %v3110_v25 = vadd.f32 %v3028_v61, %v10658_v17  ;;  %v3254_v35 = vpop.f32.mrf.mxu0  ;;  %v11536_v17 = vld [vmem:[#allocation19_spill] sm:$0xff] }
 0x30f   : > { %v2960_v51 = vpop.f32.mrf.mxu2  ;;  %v3106_v58 = vpop.f32.mrf.mxu1 }
 0x310   : > { %v3116_v19 = vadd.f32 %v3106_v58, %v2968_v63  ;;  %v11546_v63 = vld [vmem:[#allocation16_spill] sm:$0xff] }
 0x311   : > { %7470 = vmatmul.msk.bf16.vlgmr.msra.gmra.mxu0 %vm517_vm2, %v10749_v29  ;;  %v3853_v6 = vsel %vm1063_vm5, %v11546_v63, %v3852_v56  ;;  %v7484_v56 = vld [vmem:[#allocation2] sm:$0xf]  ;;  %v8472_v63 = vld [vmem:[#allocation2 + $0xf4] sm:$0xf0] }
 0x312   : > { %v10756_v41 = vadd.f32 %v3254_v35, %v3116_v19  ;;  %7462 = vmatmul.msk.bf16.vlgmr.msra.gmra.mxu1 %vm517_vm2, %v10714_v20  ;;  %3919 = vmatpush.bf16.msra.mxu0 %v11536_v17  ;;  %v3858_v51 = vsel %vm521_vm1, %v3853_v6, 0  ;;  %v8456_v17 = vld [vmem:[#allocation2 + $0x74] sm:$0xf0] }
 0x313   : > { %3810 = vmatpush.bf16.msra.mxu1 %v11537_v12 }
 0x314   : > { %7459 = vmatmul.msk.bf16.vlgmr.msrb.gmra.mxu2 %vm517_vm2, %v10714_v20 }
 0x315   : > { %3771 = vmatpush.bf16.msrb.mxu2 %v11538_v2  ;;  %v3030_v16 = vpop.f32.mrf.mxu3 }
 0x316   : > { %v3256_v30 = vpop.f32.mrf.mxu0 }
 0x317   : > { %v3067_v52 = vpop.f32.mrf.mxu2  ;;  %v3108_v27 = vpop.f32.mrf.mxu1 }
 0x318   : > { %v3113_v62 = vadd.f32 %v3067_v52, %v2965_v55  ;;  %v7541_v52 = vor.u32 %v8456_v17, %v7540_v60  ;;  %v7532_v27 = vld [vmem:[#allocation2 + $0x60] sm:$0xf]  ;;  %v8470_v17 = vld [vmem:[#allocation2 + $0xe4] sm:$0xf0] }
 0x319   : > { %v7596_v60 = vld [vmem:[#allocation2 + $0xe0] sm:$0xf] }
 0x31a   : > { %7460 = vmatmul.msk.bf16.vlgmr.msrb.gmra.mxu3 %vm517_vm2, %v10714_v20 }
 0x31b   : > { %3784 = vmatpush.bf16.msrb.mxu3 %v11539_v54  ;;  %v8454_v54 = vld [vmem:[#allocation2 + $0x64] sm:$0xf0] }
 0x31d   : > { %v3080_v14 = vpop.f32.mrf.mxu3 }
 0x31e   : > { %v3114_v22 = vadd.f32 %v3080_v14, %v10680_v40  ;;  %v3363_v49 = vpop.f32.mrf.mxu0  ;;  %v11540_v40 = vld [vmem:[#allocation18_spill] sm:$0xff] }
 0x31f   : > { %v3069_v10 = vpop.f32.mrf.mxu2  ;;  %v3215_v36 = vpop.f32.mrf.mxu1 }
 0x320   : > { %v3261_v42 = vadd.f32 %v3215_v36, %v3113_v62  ;;  %v7533_v10 = vor.u32 %v8454_v54, %v7532_v27  ;;  %v8468_v54 = vld [vmem:[#allocation2 + $0xd4] sm:$0xf0] }
 0x321   : > { %7475 = vmatmul.msk.bf16.vlgmr.msrb.gmra.mxu0 %vm517_vm2, %v10772_v34 }
 0x322   : > { %v10776_v0 = vadd.f32 %v3363_v49, %v3261_v42  ;;  %7467 = vmatmul.msk.bf16.vlgmr.msrb.gmra.mxu1 %vm517_vm2, %v10749_v29 }
 0x323   : > { %3880 = vmatpush.bf16.msrb.mxu1 %v11540_v40 }
 0x324   : > { %7463 = vmatmul.msk.bf16.vlgmr.msra.gmra.mxu2 %vm517_vm2, %v10714_v20 }
 0x325   : > { %3823 = vmatpush.bf16.msra.mxu2 %v11541_v47  ;;  %v3082_v53 = vpop.f32.mrf.mxu3  ;;  %v7516_v47 = vld [vmem:[#allocation2 + $0x40] sm:$0xf] }
 0x326   : > { %v3365_v3 = vpop.f32.mrf.mxu0  ;;  %v8450_v53 = vld [vmem:[#allocation2 + $0x44] sm:$0xf0] }
 0x327   : > { %v3176_v11 = vpop.f32.mrf.mxu2  ;;  %v3217_v38 = vpop.f32.mrf.mxu1 }
 0x328   : > { %v3258_v13 = vadd.f32 %v3176_v11, %v3110_v25  ;;  %v7517_v11 = vor.u32 %v8450_v53, %v7516_v47  ;;  %v8466_v47 = vld [vmem:[#allocation2 + $0xc4] sm:$0xf0]  ;;  %v7764_v53 = vld [vmem:[#allocation2 + $0x230] sm:$0xf] }
 0x32a   : > { %7464 = vmatmul.msk.bf16.vlgmr.msra.gmra.mxu3 %vm517_vm2, %v10714_v20  ;;  %v11543_v20 = vld [vmem:[#allocation21_spill] sm:$0xff] }
 0x32b   : > { %3836 = vmatpush.bf16.msra.mxu3 %v3749_v7 }
 0x32d   : > { %v3189_v50 = vpop.f32.mrf.mxu3 }
 0x32e   : > { %v3259_v24 = vadd.f32 %v3189_v50, %v10700_v18  ;;  %v3430_v57 = vpop.f32.mrf.mxu0  ;;  %v7509_v50 = vor.u32 %v8448_v43, %v7508_v21  ;;  %v7572_v21 = vld [vmem:[#allocation2 + $0xb0] sm:$0xf]  ;;  %v8464_v43 = vld [vmem:[#allocation2 + $0xb4] sm:$0xf0] }
 0x32f   : > { %v3178_v32 = vpop.f32.mrf.mxu2  ;;  %v3324_v26 = vpop.f32.mrf.mxu1 }
 0x330   : > { %v3406_v39 = vadd.f32 %v3324_v26, %v3258_v13  ;;  %v8446_v26 = vld [vmem:[#allocation2 + $0x24] sm:$0xf0] }
 0x331   : > { %7479 = vmatmul.msk.bf16.vlgmr.msra.gmra.mxu0 %vm517_vm2, %v10772_v34 }
 0x332   : > { %v10792_v28 = vadd.f32 %v3430_v57, %v3406_v39  ;;  %7471 = vmatmul.msk.bf16.vlgmr.msra.gmra.mxu1 %vm517_vm2, %v10749_v29  ;;  %v7500_v57 = vld [vmem:[#allocation2 + $0x20] sm:$0xf] }
 0x333   : > { %3932 = vmatpush.bf16.msra.mxu1 %v11543_v20  ;;  %v7501_v20 = vor.u32 %v8446_v26, %v7500_v57  ;;  %v8510_v57 = vld [vmem:[#allocation2 + $0x224] sm:$0xf0] }
 0x334   : > { %7468 = vmatmul.msk.bf16.vlgmr.msrb.gmra.mxu2 %vm517_vm2, %v10749_v29 }
 0x335   : > { %3893 = vmatpush.bf16.msrb.mxu2 %v11544_v33  ;;  %v3191_v48 = vpop.f32.mrf.mxu3 }
 0x336   : > { %v3432_v46 = vpop.f32.mrf.mxu0  ;;  %v7492_v48 = vld [vmem:[#allocation2 + $0x10] sm:$0xf] }
 0x337   : > { %v3228_v18 = vpop.f32.mrf.mxu2  ;;  %v3326_v9 = vpop.f32.mrf.mxu1 }
 0x338   : > { %v3262_v55 = vadd.f32 %v3228_v18, %v3114_v22  ;;  %v7524_v22 = vld [vmem:[#allocation2 + $0x50] sm:$0xf]  ;;  %v8444_v18 = vld [vmem:[#allocation2 + $0x14] sm:$0xf0] }
 0x33a   : > { %7469 = vmatmul.msk.bf16.vlgmr.msrb.gmra.mxu3 %vm517_vm2, %v10749_v29 }
 0x33b   : > { %3906 = vmatpush.bf16.msrb.mxu3 %v11545_v8 }
 0x33d   : > { %v3241_v1 = vpop.f32.mrf.mxu3 }
 0x33e   : > { %v3263_v4 = vadd.f32 %v3241_v1, %v10718_v15  ;;  %v3482_v31 = vpop.f32.mrf.mxu0  ;;  %v8442_v1 = vld [vmem:[#allocation2 + $0x4] sm:$0xf0] }
 0x33f   : > { %v3230_v37 = vpop.f32.mrf.mxu2  ;;  %v3376_v44 = vpop.f32.mrf.mxu1 }
 0x340   : > { %v3410_v45 = vadd.f32 %v3376_v44, %v3262_v55  ;;  %v7796_v37 = vld [vmem:[#allocation2 + $0x270] sm:$0xf] }
 0x341   : > { %v7604_v44 = vld [vmem:[#allocation2 + $0xf0] sm:$0xf] }
 0x342   : > { %v10806_v61 = vadd.f32 %v3482_v31, %v3410_v45  ;;  %7476 = vmatmul.msk.bf16.vlgmr.msrb.gmra.mxu1 %vm517_vm2, %v10772_v34  ;;  %v8520_v31 = vld [vmem:[#allocation2 + $0x274] sm:$0xf0]  ;;  %v7605_v45 = vor.u32 %v8472_v63, %v7604_v44 }
 0x343   : > { %v7797_v6 = vor.u32 %v8520_v31, %v7796_v37  ;;  %v7556_v37 = vld [vmem:[#allocation2 + $0x90] sm:$0xf] }
 0x344   : > { %7472 = vmatmul.msk.bf16.vlgmr.msra.gmra.mxu2 %vm517_vm2, %v10749_v29  ;;  %4663 = vmatpush.bf16.msrb.mxu0 %v7605_v45 }
 0x345   : > { %3945 = vmatpush.bf16.msra.mxu2 %v3858_v51  ;;  %v3243_v25 = vpop.f32.mrf.mxu3 }
 0x346   : > { %v3484_v15 = vpop.f32.mrf.mxu0 }
 0x347   : > { %v3337_v35 = vpop.f32.mrf.mxu2  ;;  %v3378_v19 = vpop.f32.mrf.mxu1  ;;  %v7788_v15 = vld [vmem:[#allocation2 + $0x260] sm:$0xf] }
 0x348   : > { %v3407_v58 = vadd.f32 %v3337_v35, %v3259_v24 }
 0x34a   : > { %7473 = vmatmul.msk.bf16.vlgmr.msra.gmra.mxu3 %vm517_vm2, %v10749_v29 }
 0x34b   : > { %4650 = vmatpush.bf16.msra.mxu3 %v7541_v52  ;;  %v7780_v52 = vld [vmem:[#allocation2 + $0x250] sm:$0xf] }
 0x34d   : > { %v3350_v59 = vpop.f32.mrf.mxu3 }
 0x34e   : > { %v3408_v2 = vadd.f32 %v3350_v59, %v10733_v23  ;;  %v3555_v16 = vpop.f32.mrf.mxu0  ;;  %v8452_v23 = vld [vmem:[#allocation2 + $0x54] sm:$0xf0] }
 0x34f   : > { %v3339_v12 = vpop.f32.mrf.mxu2  ;;  %v3443_v30 = vpop.f32.mrf.mxu1  ;;  %4651 = vmatpush.bf16.msra.mxu3 %v7533_v10  ;;  %v7525_v42 = vor.u32 %v8452_v23, %v7524_v22  ;;  %v7772_v23 = vld [vmem:[#allocation2 + $0x240] sm:$0xf] }
 0x350   : > { %v3513_v62 = vadd.f32 %v3443_v30, %v3407_v58  ;;  %v8518_v58 = vld [vmem:[#allocation2 + $0x264] sm:$0xf0]  ;;  %v8516_v30 = vld [vmem:[#allocation2 + $0x254] sm:$0xf0] }
 0x351   : > { %v7789_v59 = vor.u32 %v8518_v58, %v7788_v15  ;;  %v7781_v27 = vor.u32 %v8516_v30, %v7780_v52  ;;  %v7860_v52 = vld [vmem:[#allocation2 + $0x2f0] sm:$0xf]  ;;  %v8536_v30 = vld [vmem:[#allocation2 + $0x2f4] sm:$0xf0] }
 0x352   : > { %v10816_v14 = vadd.f32 %v3555_v16, %v3513_v62  ;;  %7480 = vmatmul.msk.bf16.vlgmr.msra.gmra.mxu1 %vm517_vm2, %v10772_v34  ;;  %v7588_v62 = vld [vmem:[#allocation2 + $0xd0] sm:$0xf] }
 0x353   : > { %4652 = vmatpush.bf16.msra.mxu3 %v7525_v42 }
 0x354   : > { %7477 = vmatmul.msk.bf16.vlgmr.msrb.gmra.mxu2 %vm517_vm2, %v10772_v34 }
 0x355   : > { %v3352_v29 = vpop.f32.mrf.mxu3 }
 0x356   : > { %v3557_v36 = vpop.f32.mrf.mxu0 }
 0x357   : > { %v3389_v49 = vpop.f32.mrf.mxu2  ;;  %v3445_v5 = vpop.f32.mrf.mxu1  ;;  %4653 = vmatpush.bf16.msra.mxu3 %v7517_v11 }
 0x358   : > { %v3411_v40 = vadd.f32 %v3389_v49, %v3263_v4  ;;  %v7485_v4 = vor.u32 %v8442_v1, %v7484_v56  ;;  %v8514_v49 = vld [vmem:[#allocation2 + $0x244] sm:$0xf0]  ;;  %v7580_v5 = vld [vmem:[#allocation2 + $0xc0] sm:$0xf]  ;;  %v8508_v1 = vld [vmem:[#allocation2 + $0x214] sm:$0xf0] }
 0x359   : > { %v7581_v11 = vor.u32 %v8466_v47, %v7580_v5  ;;  %v7644_v5 = vld [vmem:[#allocation2 + $0x140] sm:$0xf]  ;;  %v8482_v47 = vld [vmem:[#allocation2 + $0x144] sm:$0xf0] }
 0x35a   : > { %7478 = vmatmul.msk.bf16.vlgmr.msrb.gmra.mxu3 %vm517_vm2, %v10772_v34 }
 0x35b   : > { %4654 = vmatpush.bf16.msra.mxu3 %v7509_v50 }
 0x35d   : > { %v3402_v3 = vpop.f32.mrf.mxu3 }
 0x35e   : > { %v3412_v38 = vadd.f32 %v3402_v3, %v10756_v41  ;;  %v3607_v7 = vpop.f32.mrf.mxu0  ;;  %v7493_v41 = vor.u32 %v8444_v18, %v7492_v48  ;;  %v8512_v3 = vld [vmem:[#allocation2 + $0x234] sm:$0xf0]  ;;  %v8462_v48 = vld [vmem:[#allocation2 + $0xa4] sm:$0xf0] }
 0x35f   : > { %v3391_v13 = vpop.f32.mrf.mxu2  ;;  %v3495_v32 = vpop.f32.mrf.mxu1  ;;  %4655 = vmatpush.bf16.msra.mxu3 %v7501_v20 }
 0x360   : > { %v3517_v24 = vadd.f32 %v3495_v32, %v3411_v40  ;;  %v7773_v40 = vor.u32 %v8514_v49, %v7772_v23  ;;  %v7765_v13 = vor.u32 %v8512_v3, %v7764_v53  ;;  %v8534_v23 = vld [vmem:[#allocation2 + $0x2e4] sm:$0xf0]  ;;  %v7724_v53 = vld [vmem:[#allocation2 + $0x1e0] sm:$0xf]  ;;  %v7645_v3 = vor.u32 %v8482_v47, %v7644_v5  ;;  %v7812_v47 = vld [vmem:[#allocation2 + $0x290] sm:$0xf] }
 0x362   : > { %v10825_v39 = vadd.f32 %v3607_v7, %v3517_v24  ;;  %v7573_v7 = vor.u32 %v8464_v43, %v7572_v21  ;;  %v8502_v21 = vld [vmem:[#allocation2 + $0x1e4] sm:$0xf0] }
 0x363   : > { %4656 = vmatpush.bf16.msra.mxu3 %v7493_v41  ;;  %v7668_v41 = vld [vmem:[#allocation2 + $0x170] sm:$0xf] }
 0x364   : > { %7481 = vmatmul.msk.bf16.vlgmr.msra.gmra.mxu2 %vm517_vm2, %v10772_v34 }
 0x365   : > { %v3404_v33 = vpop.f32.mrf.mxu3 }
 0x366   : > { %v3609_v55 = vpop.f32.mrf.mxu0  ;;  %v7564_v33 = vld [vmem:[#allocation2 + $0xa0] sm:$0xf] }
 0x367   : > { %v3456_v46 = vpop.f32.mrf.mxu2  ;;  %v3497_v8 = vpop.f32.mrf.mxu1  ;;  %4657 = vmatpush.bf16.msra.mxu3 %v7485_v4  ;;  %v8460_v4 = vld [vmem:[#allocation2 + $0x94] sm:$0xf0] }
 0x368   : > { %v3514_v9 = vadd.f32 %v3456_v46, %v3408_v2  ;;  %v7597_v2 = vor.u32 %v8470_v17, %v7596_v60  ;;  %v7565_v46 = vor.u32 %v8462_v48, %v7564_v33  ;;  %v7748_v8 = vld [vmem:[#allocation2 + $0x210] sm:$0xf]  ;;  %v7557_v44 = vor.u32 %v8460_v4, %v7556_v37  ;;  %v7548_v60 = vld [vmem:[#allocation2 + $0x80] sm:$0xf]  ;;  %v8458_v17 = vld [vmem:[#allocation2 + $0x84] sm:$0xf0] }
 0x369   : > { %v7749_v31 = vor.u32 %v8508_v1, %v7748_v8  ;;  %v8500_v48 = vld [vmem:[#allocation2 + $0x1d4] sm:$0xf0]  ;;  %v7628_v37 = vld [vmem:[#allocation2 + $0x120] sm:$0xf]  ;;  %v8478_v4 = vld [vmem:[#allocation2 + $0x124] sm:$0xf0] }
 0x36a   : > { %4664 = vmatpush.bf16.msrb.mxu0 %v7597_v2  ;;  %v7549_v2 = vor.u32 %v8458_v17, %v7548_v60  ;;  %v8496_v60 = vld [vmem:[#allocation2 + $0x1b4] sm:$0xf0] }
 0x36b   : > { %4702 = vmatpush.bf16.msrb.mxu3 %v7797_v6 }
 0x36d   : > { %v3469_v34 = vpop.f32.mrf.mxu3 }
 0x36e   : > { %v10830_v25 = vadd.f32 %v3469_v34, %v10776_v0  ;;  %v3677_v35 = vpop.f32.mrf.mxu0  ;;  %v7589_v0 = vor.u32 %v8468_v54, %v7588_v62  ;;  %v7660_v34 = vld [vmem:[#allocation2 + $0x160] sm:$0xf]  ;;  %v7652_v62 = vld [vmem:[#allocation2 + $0x150] sm:$0xf]  ;;  %v7861_v54 = vor.u32 %v8536_v30, %v7860_v52  ;;  %v8526_v52 = vld [vmem:[#allocation2 + $0x2a4] sm:$0xf0] }
 0x36f   : > { %v3458_v51 = vpop.f32.mrf.mxu2  ;;  %v3568_v19 = vpop.f32.mrf.mxu1  ;;  %4703 = vmatpush.bf16.msrb.mxu3 %v7789_v59  ;;  %v8506_v59 = vld [vmem:[#allocation2 + $0x204] sm:$0xf0] }
 0x370   : > { %v3626_v12 = vadd.f32 %v3568_v19, %v3514_v9  ;;  %4665 = vmatpush.bf16.msrb.mxu0 %v7589_v0  ;;  %v8488_v9 = vld [vmem:[#allocation2 + $0x174] sm:$0xf0]  ;;  %v8486_v51 = vld [vmem:[#allocation2 + $0x164] sm:$0xf0] }
 0x371   : > { %v7669_v56 = vor.u32 %v8488_v9, %v7668_v41  ;;  %v7661_v19 = vor.u32 %v8486_v51, %v7660_v34  ;;  %v8530_v41 = vld [vmem:[#allocation2 + $0x2c4] sm:$0xf0]  ;;  %v7828_v34 = vld [vmem:[#allocation2 + $0x2b0] sm:$0xf]  ;;  %v8528_v51 = vld [vmem:[#allocation2 + $0x2b4] sm:$0xf0] }
 0x372   : > { %v10832_v16 = vadd.f32 %v3677_v35, %v3626_v12  ;;  %v7740_v35 = vld [vmem:[#allocation2 + $0x200] sm:$0xf] }
 0x373   : > { %4704 = vmatpush.bf16.msrb.mxu3 %v7781_v27  ;;  %4676 = vmatpush.bf16.msrb.mxu1 %v7669_v56  ;;  %v7741_v12 = vor.u32 %v8506_v59, %v7740_v35  ;;  %v8484_v27 = vld [vmem:[#allocation2 + $0x154] sm:$0xf0]  ;;  %v7829_v35 = vor.u32 %v8528_v51, %v7828_v34  ;;  %v8455_v51 = vld [vmem:[#allocation2 + $0x74] sm:$0xf] }
 0x374   : > { %4666 = vmatpush.bf16.msrb.mxu0 %v7581_v11  ;;  %v7653_v0 = vor.u32 %v8484_v27, %v7652_v62  ;;  %v8548_v34 = vld [vmem:[#allocation2 + $0x354] sm:$0xf0] }
 0x375   : > { %v3471_v10 = vpop.f32.mrf.mxu3 }
 0x376   : > { %v3679_v22 = vpop.f32.mrf.mxu0  ;;  %v7732_v10 = vld [vmem:[#allocation2 + $0x1f0] sm:$0xf] }
 0x377   : > { %v3508_v29 = vpop.f32.mrf.mxu2  ;;  %v3570_v42 = vpop.f32.mrf.mxu1  ;;  %4705 = vmatpush.bf16.msrb.mxu3 %v7773_v40  ;;  %4677 = vmatpush.bf16.msrb.mxu1 %v7661_v19  ;;  %v7700_v19 = vld [vmem:[#allocation2 + $0x1b0] sm:$0xf] }
 0x378   : > { %v3518_v36 = vadd.f32 %v3508_v29, %v3412_v38  ;;  %4667 = vmatpush.bf16.msrb.mxu0 %v7573_v7  ;;  %v7756_v38 = vld [vmem:[#allocation2 + $0x220] sm:$0xf]  ;;  %v8504_v29 = vld [vmem:[#allocation2 + $0x1f4] sm:$0xf0]  ;;  %v7844_v7 = vld [vmem:[#allocation2 + $0x2d0] sm:$0xf]  ;;  %v7701_v17 = vor.u32 %v8496_v60, %v7700_v19 }
 0x379   : > { %v7757_v20 = vor.u32 %v8510_v57, %v7756_v38  ;;  %v7733_v22 = vor.u32 %v8504_v29, %v7732_v10  ;;  %v7636_v57 = vld [vmem:[#allocation2 + $0x130] sm:$0xf]  ;;  %v7612_v10 = vld [vmem:[#allocation2 + $0x100] sm:$0xf]  ;;  %v8474_v29 = vld [vmem:[#allocation2 + $0x104] sm:$0xf0] }
 0x37a   : > { %v7590_v60 = vld [vmem:[#allocation2 + $0xd8] sm:$0xf0] }
 0x37b   : > { %4706 = vmatpush.bf16.msrb.mxu3 %v7765_v13  ;;  %4678 = vmatpush.bf16.msrb.mxu1 %v7653_v0  ;;  %v7725_v13 = vor.u32 %v8502_v21, %v7724_v53 }
 0x37c   : > { %4668 = vmatpush.bf16.msrb.mxu0 %v7565_v46  ;;  %4689 = vmatpush.bf16.msrb.mxu2 %v7733_v22  ;;  %v7836_v46 = vld [vmem:[#allocation2 + $0x2c0] sm:$0xf] }
 0x37d   : > { %v10834_v50 = vpop.f32.mrf.mxu3  ;;  %v7837_v8 = vor.u32 %v8530_v41, %v7836_v46  ;;  %v7692_v22 = vld [vmem:[#allocation2 + $0x1a0] sm:$0xf]  ;;  %v10847_v53 = vpop.permute.xlu0 %3961 }
 0x37e   : > { %v3729_v24 = vpop.f32.mrf.mxu0 }
 0x37f   : > { %v3510_v32 = vpop.f32.mrf.mxu2  ;;  %v3620_v26 = vpop.f32.mrf.mxu1  ;;  %4707 = vmatpush.bf16.msrb.mxu3 %v7757_v20  ;;  %4679 = vmatpush.bf16.msrb.mxu1 %v7645_v3  ;;  %v7716_v20 = vld [vmem:[#allocation2 + $0x1d0] sm:$0xf]  ;;  %v8524_v3 = vld [vmem:[#allocation2 + $0x294] sm:$0xf0] }
 0x380   : > { %v3630_v18 = vadd.f32 %v3620_v26, %v3518_v36  ;;  %4669 = vmatpush.bf16.msrb.mxu0 %v7557_v44  ;;  %v8532_v32 = vld [vmem:[#allocation2 + $0x2d4] sm:$0xf0]  ;;  %4690 = vmatpush.bf16.msrb.mxu2 %v7725_v13  ;;  %v7813_v13 = vor.u32 %v8524_v3, %v7812_v47 }
 0x381   : > { %v8480_v26 = vld [vmem:[#allocation2 + $0x134] sm:$0xf0] }
 0x382   : > { %v10836_v55 = vadd.f32 %v3729_v24, %v3630_v18  ;;  %v7845_v24 = vor.u32 %v8532_v32, %v7844_v7  ;;  %v7637_v33 = vor.u32 %v8480_v26, %v7636_v57  ;;  %v7717_v18 = vor.u32 %v8500_v48, %v7716_v20  ;;  %v7684_v7 = vld [vmem:[#allocation2 + $0x190] sm:$0xf]  ;;  %v8492_v32 = vld [vmem:[#allocation2 + $0x194] sm:$0xf0]  ;;  %v7916_v57 = vld [vmem:[#allocation2 + $0x360] sm:$0xf] }
 0x383   : > { %4708 = vmatpush.bf16.msrb.mxu3 %v7749_v31  ;;  %v7708_v31 = vld [vmem:[#allocation2 + $0x1c0] sm:$0xf]  ;;  %v8550_v26 = vld [vmem:[#allocation2 + $0x364] sm:$0xf0] }
 0x384   : > { %4670 = vmatpush.bf16.msrb.mxu0 %v7549_v2  ;;  %4680 = vmatpush.bf16.msrb.mxu1 %v7637_v33  ;;  %v7820_v2 = vld [vmem:[#allocation2 + $0x2a0] sm:$0xf]  ;;  %v7917_v33 = vor.u32 %v8550_v26, %v7916_v57  ;;  %v7518_v26 = vld [vmem:[#allocation2 + $0x48] sm:$0xf0] }
 0x385   : > { %v3544_v63 = vpop.f32.mrf.mxu3  ;;  %4691 = vmatpush.bf16.msrb.mxu2 %v7717_v18  ;;  %v7821_v62 = vor.u32 %v8526_v52, %v7820_v2  ;;  %v7804_v48 = vld [vmem:[#allocation2 + $0x280] sm:$0xf]  ;;  %v8522_v18 = vld [vmem:[#allocation2 + $0x284] sm:$0xf0]  ;;  %v8453_v2 = vld [vmem:[#allocation2 + $0x64] sm:$0xf] }
 0x386   : > { %v3731_v45 = vpop.f32.mrf.mxu0  ;;  %v7629_v63 = vor.u32 %v8478_v4, %v7628_v37  ;;  %v7598_v4 = vld [vmem:[#allocation2 + $0xe8] sm:$0xf0] }
 0x387   : > { %v3581_v6 = vpop.f32.mrf.mxu2  ;;  %v3622_v58 = vpop.f32.mrf.mxu1  ;;  %4709 = vmatpush.bf16.msrb.mxu3 %v7741_v12  ;;  %v3624_v12 = vadd.f32 %v10834_v50, %v10792_v28 }
 0x388   : > { %v3627_v15 = vadd.f32 %v3581_v6, %v10830_v25  ;;  %4715 = vmatpush.bf16.msra.mxu0 %v7861_v54  ;;  %v7852_v25 = vld [vmem:[#allocation2 + $0x2e0] sm:$0xf]  ;;  %v8498_v6 = vld [vmem:[#allocation2 + $0x1c4] sm:$0xf0]  ;;  %4681 = vmatpush.bf16.msrb.mxu1 %v7629_v63  ;;  %v8476_v58 = vld [vmem:[#allocation2 + $0x114] sm:$0xf0] }
 0x389   : > { %v7853_v36 = vor.u32 %v8534_v23, %v7852_v25  ;;  %v7709_v45 = vor.u32 %v8498_v6, %v7708_v31  ;;  %v7613_v23 = vor.u32 %v8474_v29, %v7612_v10  ;;  %v7676_v31 = vld [vmem:[#allocation2 + $0x180] sm:$0xf] }
 0x38b   : > { %4692 = vmatpush.bf16.msrb.mxu2 %v7709_v45  ;;  %v7908_v45 = vld [vmem:[#allocation2 + $0x350] sm:$0xf] }
 0x38c   : > { %4716 = vmatpush.bf16.msra.mxu0 %v7853_v36  ;;  %v8494_v36 = vld [vmem:[#allocation2 + $0x1a4] sm:$0xf0] }
 0x38d   : > { %v10839_v49 = vpop.f32.mrf.mxu3  ;;  %v7693_v50 = vor.u32 %v8494_v36, %v7692_v22  ;;  %v7582_v36 = vld [vmem:[#allocation2 + $0xc8] sm:$0xf0] }
 0x38e   : > { %v3799_v40 = vpop.f32.mrf.mxu0  ;;  %v3628_v52 = vadd.f32 %v10839_v49, %v10806_v61  ;;  %v7526_v49 = vld [vmem:[#allocation2 + $0x58] sm:$0xf0] }
 0x38f   : > { %v3583_v42 = vpop.f32.mrf.mxu2  ;;  %v3690_v11 = vpop.f32.mrf.mxu1  ;;  %4693 = vmatpush.bf16.msrb.mxu2 %v7701_v17  ;;  %v7900_v17 = vld [vmem:[#allocation2 + $0x340] sm:$0xf] }
 0x390   : > { %v3736_v43 = vadd.f32 %v3690_v11, %v3627_v15  ;;  %4717 = vmatpush.bf16.msra.mxu0 %v7845_v24  ;;  %v7620_v15 = vld [vmem:[#allocation2 + $0x110] sm:$0xf]  ;;  %v8471_v11 = vld [vmem:[#allocation2 + $0xf4] sm:$0xf]  ;;  %v7685_v24 = vor.u32 %v8492_v32, %v7684_v7  ;;  %v8542_v7 = vld [vmem:[#allocation2 + $0x324] sm:$0xf0] }
 0x391   : > { %v7621_v59 = vor.u32 %v8476_v58, %v7620_v15  ;;  %v7924_v42 = vld [vmem:[#allocation2 + $0x370] sm:$0xf]  ;;  %v7542_v15 = vld [vmem:[#allocation2 + $0x78] sm:$0xf0]  ;;  %v8449_v32 = vld [vmem:[#allocation2 + $0x44] sm:$0xf] }
 0x392   : > { %v10841_v38 = vadd.f32 %v3799_v40, %v3736_v43  ;;  %v8552_v40 = vld [vmem:[#allocation2 + $0x374] sm:$0xf0]  ;;  %v7606_v43 = vld [vmem:[#allocation2 + $0xf8] sm:$0xf0]  ;;  %v7545_v19 = vor.u32 %v8455_v51, %v7542_v15  ;;  %v8538_v15 = vld [vmem:[#allocation2 + $0x304] sm:$0xf0] }
 0x393   : > { %4682 = vmatpush.bf16.msrb.mxu1 %v7621_v59  ;;  %v7925_v5 = vor.u32 %v8552_v40, %v7924_v42  ;;  %4694 = vmatpush.bf16.msrb.mxu2 %v7693_v50  ;;  %v7609_v41 = vor.u32 %v8471_v11, %v7606_v43  ;;  %v8467_v59 = vld [vmem:[#allocation2 + $0xd4] sm:$0xf]  ;;  %v7892_v40 = vld [vmem:[#allocation2 + $0x330] sm:$0xf]  ;;  %v7574_v43 = vld [vmem:[#allocation2 + $0xb8] sm:$0xf0] }
 0x394   : > { %4718 = vmatpush.bf16.msra.mxu0 %v7837_v8  ;;  %v7805_v8 = vor.u32 %v8522_v18, %v7804_v48  ;;  %v8451_v50 = vld [vmem:[#allocation2 + $0x54] sm:$0xf]  ;;  %v7521_v48 = vor.u32 %v8449_v32, %v7518_v26  ;;  %v7558_v51 = vld [vmem:[#allocation2 + $0x98] sm:$0xf0] }
 0x395   : > { %v3596_v9 = vpop.f32.mrf.mxu3  ;;  %v7529_v11 = vor.u32 %v8451_v50, %v7526_v49  ;;  %v7854_v49 = vld [vmem:[#allocation2 + $0x2e8] sm:$0xf0] }
 0x396   : > { %v3801_v1 = vpop.f32.mrf.mxu0  ;;  %v8469_v9 = vld [vmem:[#allocation2 + $0xe4] sm:$0xf] }
 0x397   : > { %v3651_v56 = vpop.f32.mrf.mxu2  ;;  %v3692_v44 = vpop.f32.mrf.mxu1  ;;  %4683 = vmatpush.bf16.msrb.mxu1 %v7613_v23  ;;  %4695 = vmatpush.bf16.msrb.mxu2 %v7685_v24  ;;  %v7601_v58 = vor.u32 %v8469_v9, %v7598_v4  ;;  %v8465_v23 = vld [vmem:[#allocation2 + $0xc4] sm:$0xf]  ;;  %v7566_v9 = vld [vmem:[#allocation2 + $0xa8] sm:$0xf0]  ;;  %v8540_v4 = vld [vmem:[#allocation2 + $0x314] sm:$0xf0] }
 0x398   : > { %4719 = vmatpush.bf16.msra.mxu0 %v7829_v35  ;;  %v3733_v27 = vadd.f32 %v3651_v56, %v3624_v12  ;;  %v8490_v44 = vld [vmem:[#allocation2 + $0x184] sm:$0xf0]  ;;  %v7909_v35 = vor.u32 %v8548_v34, %v7908_v45  ;;  %v7585_v47 = vor.u32 %v8465_v23, %v7582_v36  ;;  %v8459_v34 = vld [vmem:[#allocation2 + $0x94] sm:$0xf]  ;;  %v7494_v23 = vld [vmem:[#allocation2 + $0x18] sm:$0xf0] }
 0x399   : > { %v7677_v6 = vor.u32 %v8490_v44, %v7676_v31  ;;  %v8546_v12 = vld [vmem:[#allocation2 + $0x344] sm:$0xf0]  ;;  %v8447_v31 = vld [vmem:[#allocation2 + $0x34] sm:$0xf] }
 0x39b   : > { %4728 = vmatpush.bf16.msra.mxu1 %v7925_v5  ;;  %4696 = vmatpush.bf16.msrb.mxu2 %v7677_v6 }
 0x39c   : > { %4720 = vmatpush.bf16.msra.mxu0 %v7821_v62  ;;  %v7901_v62 = vor.u32 %v8546_v12, %v7900_v17  ;;  %v7561_v12 = vor.u32 %v8459_v34, %v7558_v51 }
 0x39d   : > { %v10845_v30 = vpop.f32.mrf.mxu3 }
 0x39e   : > { %v3869_v0 = vpop.f32.mrf.mxu0 }
 0x39f   : > { %v3653_v54 = vpop.f32.mrf.mxu2  ;;  %v3760_v25 = vpop.f32.mrf.mxu1  ;;  %4729 = vmatpush.bf16.msra.mxu1 %v7917_v33  ;;  %4741 = vmatpush.bf16.msra.mxu2 %v7545_v19  ;;  %v3734_v19 = vadd.f32 %v10845_v30, %v10816_v14  ;;  %v8487_v14 = vld [vmem:[#allocation2 + $0x174] sm:$0xf]  ;;  %v7670_v30 = vld [vmem:[#allocation2 + $0x178] sm:$0xf0] }
 0x3a0   : > { %v3842_v28 = vadd.f32 %v3760_v25, %v3733_v27  ;;  %4721 = vmatpush.bf16.msra.mxu0 %v7813_v13  ;;  %v7534_v27 = vld [vmem:[#allocation2 + $0x68] sm:$0xf0]  ;;  %v7884_v13 = vld [vmem:[#allocation2 + $0x320] sm:$0xf] }
 0x3a1   : > { %v7537_v10 = vor.u32 %v8453_v2, %v7534_v27  ;;  %v7885_v57 = vor.u32 %v8542_v7, %v7884_v13  ;;  %v8457_v27 = vld [vmem:[#allocation2 + $0x84] sm:$0xf] }
 0x3a2   : > { %v3951_v21 = vadd.f32 %v3869_v0, %v3842_v28  ;;  %v7593_v0 = vor.u32 %v8467_v59, %v7590_v60  ;;  %v8544_v28 = vld [vmem:[#allocation2 + $0x334] sm:$0xf0]  ;;  %v7502_v60 = vld [vmem:[#allocation2 + $0x28] sm:$0xf0] }
 0x3a3   : > { %4730 = vmatpush.bf16.msra.mxu1 %v7909_v35  ;;  %4742 = vmatpush.bf16.msra.mxu2 %v7537_v10  ;;  %v7893_v61 = vor.u32 %v8544_v28, %v7892_v40  ;;  %v7868_v35 = vld [vmem:[#allocation2 + $0x300] sm:$0xf]  ;;  %v8535_v10 = vld [vmem:[#allocation2 + $0x2f4] sm:$0xf] }
 0x3a4   : > { %v3964_v20 = vadd.f32 %v10847_v53, %v3951_v21  ;;  %4722 = vmatpush.bf16.msra.mxu0 %v7805_v8  ;;  %v8463_v21 = vld [vmem:[#allocation2 + $0xb4] sm:$0xf]  ;;  %v7869_v59 = vor.u32 %v8538_v15, %v7868_v35  ;;  %v7830_v15 = vld [vmem:[#allocation2 + $0x2b8] sm:$0xf0] }
 0x3a5   : > { %v3666_v46 = vpop.f32.mrf.mxu3  ;;  %v7577_v33 = vor.u32 %v8463_v21, %v7574_v43  ;;  %v8485_v21 = vld [vmem:[#allocation2 + $0x164] sm:$0xf]  ;;  %v7662_v43 = vld [vmem:[#allocation2 + $0x168] sm:$0xf0]  ;;  %v8527_v35 = vld [vmem:[#allocation2 + $0x2b4] sm:$0xf] }
 0x3a6   : > { %v10850_v1 = vpack.c.bf16 %v3964_v20, %v3964_v20  ;;  %v3871_v37 = vpop.f32.mrf.mxu0  ;;  %v7665_v26 = vor.u32 %v8485_v21, %v7662_v43  ;;  %v7806_v21 = vld [vmem:[#allocation2 + $0x288] sm:$0xf0]  ;;  %v8473_v43 = vld [vmem:[#allocation2 + $0x104] sm:$0xf] }
 0x3a7   : > { %v3703_v56 = vpop.f32.mrf.mxu2  ;;  %v3762_v63 = vpop.f32.mrf.mxu1  ;;  %4731 = vmatpush.bf16.msra.mxu1 %v7901_v62  ;;  %4743 = vmatpush.bf16.msra.mxu2 %v7529_v11  ;;  %v7876_v37 = vld [vmem:[#allocation2 + $0x310] sm:$0xf]  ;;  %v7486_v11 = vld [vmem:[#allocation2 + $0x8] sm:$0xf0] }
 0x3a8   : > { %4658 = vmatmul.bf16.vlgmr.msra.gmra.mxu3 %v10850_v1  ;;  %v3737_v29 = vadd.f32 %v3703_v56, %v3628_v52  ;;  %v7877_v44 = vor.u32 %v8540_v4, %v7876_v37  ;;  %v7510_v63 = vld [vmem:[#allocation2 + $0x38] sm:$0xf0]  ;;  %v8481_v4 = vld [vmem:[#allocation2 + $0x144] sm:$0xf] }
 0x3a9   : > { %4754 = vmatpush.bf16.msra.mxu3 %v7609_v41  ;;  %v8461_v41 = vld [vmem:[#allocation2 + $0xa4] sm:$0xf]  ;;  %v7513_v45 = vor.u32 %v8447_v31, %v7510_v63  ;;  %v7646_v31 = vld [vmem:[#allocation2 + $0x148] sm:$0xf0] }
 0x3aa   : > { %v7569_v6 = vor.u32 %v8461_v41, %v7566_v9  ;;  %v7649_v51 = vor.u32 %v8481_v4, %v7646_v31  ;;  %v8549_v31 = vld [vmem:[#allocation2 + $0x364] sm:$0xf] }
 0x3ab   : > { %4732 = vmatpush.bf16.msra.mxu1 %v7893_v61  ;;  %4744 = vmatpush.bf16.msra.mxu2 %v7521_v48  ;;  %v7673_v61 = vor.u32 %v8487_v14, %v7670_v30  ;;  %v8483_v48 = vld [vmem:[#allocation2 + $0x154] sm:$0xf]  ;;  %v7734_v14 = vld [vmem:[#allocation2 + $0x1f8] sm:$0xf0] }
 0x3ac   : > { %v8523_v30 = vld [vmem:[#allocation2 + $0x294] sm:$0xf] }
 0x3ad   : > { %4755 = vmatpush.bf16.msra.mxu3 %v7601_v58  ;;  %v10855_v54 = vpop.f32.mrf.mxu3  ;;  %v8445_v58 = vld [vmem:[#allocation2 + $0x24] sm:$0xf] }
 0x3ae   : > { %v3921_v25 = vpop.f32.mrf.mxu0  ;;  %v7505_v2 = vor.u32 %v8445_v58, %v7502_v60  ;;  %v3738_v37 = vadd.f32 %v10855_v54, %v10825_v39  ;;  %v7833_v39 = vor.u32 %v8527_v35, %v7830_v15  ;;  %v7710_v35 = vld [vmem:[#allocation2 + $0x1c8] sm:$0xf0] }
 0x3af   : > { %v3705_v22 = vpop.f32.mrf.mxu2  ;;  %v3812_v42 = vpop.f32.mrf.mxu1  ;;  %4733 = vmatpush.bf16.msra.mxu1 %v7885_v57  ;;  %4745 = vmatpush.bf16.msra.mxu2 %v7513_v45 }
 0x3b0   : > { %v3846_v5 = vadd.f32 %v3812_v42, %v3737_v29  ;;  %v7862_v22 = vld [vmem:[#allocation2 + $0x2f8] sm:$0xf0] }
 0x3b1   : > { %4756 = vmatpush.bf16.msra.mxu3 %v7593_v0  ;;  %v7550_v0 = vld [vmem:[#allocation2 + $0x88] sm:$0xf0]  ;;  %v7865_v50 = vor.u32 %v8535_v10, %v7862_v22 }
 0x3b2   : > { %v3955_v3 = vadd.f32 %v3921_v25, %v3846_v5  ;;  %v8443_v25 = vld [vmem:[#allocation2 + $0x14] sm:$0xf]  ;;  %v7553_v40 = vor.u32 %v8457_v27, %v7550_v0  ;;  %v8533_v5 = vld [vmem:[#allocation2 + $0x2e4] sm:$0xf]  ;;  %v7630_v27 = vld [vmem:[#allocation2 + $0x128] sm:$0xf0] }
 0x3b3   : > { %4734 = vmatpush.bf16.msra.mxu1 %v7877_v44  ;;  %4746 = vmatpush.bf16.msra.mxu2 %v7505_v2  ;;  %v7497_v42 = vor.u32 %v8443_v25, %v7494_v23  ;;  %v7822_v2 = vld [vmem:[#allocation2 + $0x2a8] sm:$0xf0]  ;;  %v8503_v25 = vld [vmem:[#allocation2 + $0x1f4] sm:$0xf] }
 0x3b4   : > { %v3968_v24 = vadd.f32 %v10847_v53, %v3955_v3 }
 0x3b5   : > { %4757 = vmatpush.bf16.msra.mxu3 %v7585_v47  ;;  %v3718_v20 = vpop.f32.mrf.mxu3  ;;  %v8441_v47 = vld [vmem:[#allocation2 + $0x4] sm:$0xf] }
 0x3b6   : > { %v10858_v18 = vpack.c.bf16 %v3968_v24, %v3968_v24  ;;  %v3923_v8 = vpop.f32.mrf.mxu0  ;;  %v7489_v13 = vor.u32 %v8441_v47, %v7486_v11  ;;  %v7857_v24 = vor.u32 %v8533_v5, %v7854_v49  ;;  %v8531_v20 = vld [vmem:[#allocation2 + $0x2d4] sm:$0xf]  ;;  %v7726_v11 = vld [vmem:[#allocation2 + $0x1e8] sm:$0xf0] }
 0x3b7   : > { %v3773_v46 = vpop.f32.mrf.mxu2  ;;  %v3814_v56 = vpop.f32.mrf.mxu1  ;;  %4735 = vmatpush.bf16.msra.mxu1 %v7869_v59  ;;  %4747 = vmatpush.bf16.msra.mxu2 %v7497_v42  ;;  %v8529_v8 = vld [vmem:[#allocation2 + $0x2c4] sm:$0xf]  ;;  %v7638_v59 = vld [vmem:[#allocation2 + $0x138] sm:$0xf0] }
 0x3b8   : > { %4710 = vmatmul.bf16.vlgmr.msrb.gmra.mxu3 %v10858_v18  ;;  %v3843_v52 = vadd.f32 %v3773_v46, %v3734_v19  ;;  %v7654_v46 = vld [vmem:[#allocation2 + $0x158] sm:$0xf0]  ;;  %v7838_v56 = vld [vmem:[#allocation2 + $0x2c8] sm:$0xf0]  ;;  %v8479_v19 = vld [vmem:[#allocation2 + $0x134] sm:$0xf] }
 0x3b9   : > { %4758 = vmatpush.bf16.msra.mxu3 %v7577_v33  ;;  %v7846_v33 = vld [vmem:[#allocation2 + $0x2d8] sm:$0xf0]  ;;  %v7657_v9 = vor.u32 %v8483_v48, %v7654_v46  ;;  %v7841_v45 = vor.u32 %v8529_v8, %v7838_v56  ;;  %v7641_v54 = vor.u32 %v8479_v19, %v7638_v59  ;;  %v8519_v48 = vld [vmem:[#allocation2 + $0x274] sm:$0xf] }
 0x3ba   : > { %v7849_v41 = vor.u32 %v8531_v20, %v7846_v33  ;;  %v7814_v42 = vld [vmem:[#allocation2 + $0x298] sm:$0xf0] }
 0x3bb   : > { %4748 = vmatpush.bf16.msra.mxu2 %v7489_v13  ;;  %v7614_v13 = vld [vmem:[#allocation2 + $0x108] sm:$0xf0]  ;;  %v7798_v46 = vld [vmem:[#allocation2 + $0x278] sm:$0xf0] }
 0x3bc   : > { %v7718_v8 = vld [vmem:[#allocation2 + $0x1d8] sm:$0xf0]  ;;  %v7801_v4 = vor.u32 %v8519_v48, %v7798_v46 }
 0x3bd   : > { %4759 = vmatpush.bf16.msra.mxu3 %v7569_v6  ;;  %v10863_v17 = vpop.f32.mrf.mxu3  ;;  %v7878_v48 = vld [vmem:[#allocation2 + $0x318] sm:$0xf0] }
 0x3be   : > { %v3844_v0 = vadd.f32 %v10863_v17, %v10832_v16  ;;  %v7737_v16 = vor.u32 %v8503_v25, %v7734_v14  ;;  %v7817_v17 = vor.u32 %v8523_v30, %v7814_v42  ;;  %v8493_v30 = vld [vmem:[#allocation2 + $0x1a4] sm:$0xf]  ;;  %v7694_v42 = vld [vmem:[#allocation2 + $0x1a8] sm:$0xf0] }
 0x3bf   : > { %v3775_v62 = vpop.f32.mrf.mxu2  ;;  %v3882_v29 = vpop.f32.mrf.mxu1 }
 0x3c0   : > { %v3952_v36 = vadd.f32 %v3882_v29, %v3843_v52  ;;  %v8477_v62 = vld [vmem:[#allocation2 + $0x124] sm:$0xf] }
 0x3c1   : > { %4760 = vmatpush.bf16.msra.mxu3 %v7561_v12  ;;  %v8525_v12 = vld [vmem:[#allocation2 + $0x2a4] sm:$0xf] }
 0x3c2   : > { %v3965_v28 = vadd.f32 %v10847_v53, %v3952_v36  ;;  %v7825_v22 = vor.u32 %v8525_v12, %v7822_v2  ;;  %v7633_v36 = vor.u32 %v8477_v62, %v7630_v27  ;;  %v8515_v2 = vld [vmem:[#allocation2 + $0x254] sm:$0xf]  ;;  %v7782_v62 = vld [vmem:[#allocation2 + $0x258] sm:$0xf0] }
 0x3c4   : > { %v3972_v3 = vpack.c.bf16 %v3965_v28, %v3965_v28  ;;  %v8475_v28 = vld [vmem:[#allocation2 + $0x114] sm:$0xf] }
 0x3c5   : > { %4761 = vmatpush.bf16.msra.mxu3 %v7553_v40  ;;  %v3788_v7 = vpop.f32.mrf.mxu3 }
 0x3c6   : > { %4671 = vmatmul.bf16.vlgmr.msrb.gmra.mxu0 %v3972_v3 }
 0x3c7   : > { %v3825_v32 = vpop.f32.mrf.mxu2  ;;  %4767 = vmatpush.bf16.msrb.mxu0 %v7673_v61  ;;  %v3884_v57 = vpop.f32.mrf.mxu1  ;;  %v8501_v61 = vld [vmem:[#allocation2 + $0x1e4] sm:$0xf] }
 0x3c8   : > { %4762 = vmatmul.bf16.vlgmr.msra.gmra.mxu3 %v3972_v3  ;;  %v3847_v63 = vadd.f32 %v3825_v32, %v3738_v37  ;;  %v8521_v3 = vld [vmem:[#allocation2 + $0x284] sm:$0xf]  ;;  %v8551_v32 = vld [vmem:[#allocation2 + $0x374] sm:$0xf]  ;;  %v7729_v20 = vor.u32 %v8501_v61, %v7726_v11  ;;  %v7766_v61 = vld [vmem:[#allocation2 + $0x238] sm:$0xf0] }
 0x3c9   : > { %4806 = vmatpush.bf16.msrb.mxu3 %v7865_v50  ;;  %v7622_v50 = vld [vmem:[#allocation2 + $0x118] sm:$0xf0]  ;;  %v7809_v33 = vor.u32 %v8521_v3, %v7806_v21  ;;  %v8541_v21 = vld [vmem:[#allocation2 + $0x324] sm:$0xf] }
 0x3ca   : > { %v7625_v47 = vor.u32 %v8475_v28, %v7622_v50  ;;  %v8543_v50 = vld [vmem:[#allocation2 + $0x334] sm:$0xf] }
 0x3cb   : > { %4768 = vmatpush.bf16.msrb.mxu0 %v7665_v26 }
 0x3cd   : > { %4807 = vmatpush.bf16.msrb.mxu3 %v7857_v24  ;;  %v10868_v44 = vpop.f32.mrf.mxu3  ;;  %v7926_v24 = vld [vmem:[#allocation2 + $0x378] sm:$0xf0] }
 0x3ce   : > { %v7929_v37 = vor.u32 %v8551_v32, %v7926_v24  ;;  %v7758_v32 = vld [vmem:[#allocation2 + $0x228] sm:$0xf0]  ;;  %v8489_v24 = vld [vmem:[#allocation2 + $0x184] sm:$0xf] }
 0x3cf   : > { %v3827_v6 = vpop.f32.mrf.mxu2  ;;  %4769 = vmatpush.bf16.msrb.mxu0 %v7657_v9  ;;  %v3934_v34 = vpop.f32.mrf.mxu1  ;;  %v8499_v9 = vld [vmem:[#allocation2 + $0x1d4] sm:$0xf] }
 0x3d0   : > { %v3956_v58 = vadd.f32 %v3934_v34, %v3847_v63  ;;  %v7918_v63 = vld [vmem:[#allocation2 + $0x368] sm:$0xf0] }
 0x3d1   : > { %4808 = vmatpush.bf16.msrb.mxu3 %v7849_v41  ;;  %v7617_v41 = vor.u32 %v8473_v43, %v7614_v13  ;;  %v7790_v34 = vld [vmem:[#allocation2 + $0x268] sm:$0xf0]  ;;  %v7921_v15 = vor.u32 %v8549_v31, %v7918_v63  ;;  %v8505_v31 = vld [vmem:[#allocation2 + $0x204] sm:$0xf] }
 0x3d2   : > { %v3969_v60 = vadd.f32 %v10847_v53, %v3956_v58  ;;  %v3848_v58 = vadd.f32 %v10868_v44, %v10836_v55  ;;  %v7785_v44 = vor.u32 %v8515_v2, %v7782_v62  ;;  %v7886_v43 = vld [vmem:[#allocation2 + $0x328] sm:$0xf0] }
 0x3d3   : > { %4770 = vmatpush.bf16.msrb.mxu0 %v7649_v51  ;;  %v8497_v51 = vld [vmem:[#allocation2 + $0x1c4] sm:$0xf]  ;;  %v7742_v63 = vld [vmem:[#allocation2 + $0x208] sm:$0xf0] }
 0x3d4   : > { %v10871_v52 = vpack.c.bf16 %v3969_v60, %v3969_v60  ;;  %v8547_v60 = vld [vmem:[#allocation2 + $0x354] sm:$0xf]  ;;  %v7713_v12 = vor.u32 %v8497_v51, %v7710_v35 }
 0x3d5   : > { %4809 = vmatpush.bf16.msrb.mxu3 %v7841_v45  ;;  %v3840_v10 = vpop.f32.mrf.mxu3  ;;  %v8517_v45 = vld [vmem:[#allocation2 + $0x264] sm:$0xf] }
 0x3d6   : > { %4723 = vmatmul.bf16.vlgmr.msra.gmra.mxu0 %v10871_v52  ;;  %v7793_v59 = vor.u32 %v8517_v45, %v7790_v34  ;;  %v7702_v10 = vld [vmem:[#allocation2 + $0x1b8] sm:$0xf0] }
 0x3d7   : > { %v3895_v29 = vpop.f32.mrf.mxu2  ;;  %4771 = vmatpush.bf16.msrb.mxu0 %v7641_v54  ;;  %v3936_v40 = vpop.f32.mrf.mxu1 }
 0x3d8   : > { %v3953_v23 = vadd.f32 %v3895_v29, %v3844_v0  ;;  %v8495_v0 = vld [vmem:[#allocation2 + $0x1b4] sm:$0xf] }
 0x3d9   : > { %4810 = vmatpush.bf16.msrb.mxu3 %v7833_v39  ;;  %v7910_v39 = vld [vmem:[#allocation2 + $0x358] sm:$0xf0]  ;;  %v7705_v25 = vor.u32 %v8495_v0, %v7702_v10 }
 0x3da   : > { %v3966_v5 = vadd.f32 %v10847_v53, %v3953_v23  ;;  %v7913_v29 = vor.u32 %v8547_v60, %v7910_v39  ;;  %v8513_v23 = vld [vmem:[#allocation2 + $0x244] sm:$0xf] }
 0x3db   : > { %4772 = vmatpush.bf16.msrb.mxu0 %v7633_v36  ;;  %v7774_v36 = vld [vmem:[#allocation2 + $0x248] sm:$0xf0] }
 0x3dc   : > { %v3973_v49 = vpack.c.bf16 %v3966_v5, %v3966_v5  ;;  %v7777_v28 = vor.u32 %v8513_v23, %v7774_v36  ;;  %v7894_v5 = vld [vmem:[#allocation2 + $0x338] sm:$0xf0] }
 0x3dd   : > { %4811 = vmatpush.bf16.msrb.mxu3 %v7825_v22  ;;  %v3908_v7 = vpop.f32.mrf.mxu3  ;;  %v7902_v22 = vld [vmem:[#allocation2 + $0x348] sm:$0xf0]  ;;  %v7897_v11 = vor.u32 %v8543_v50, %v7894_v5 }
 0x3de   : > { %4684 = vmatmul.bf16.vlgmr.msrb.gmra.mxu1 %v3973_v49  ;;  %v3954_v26 = vadd.f32 %v3908_v7, %v10841_v38  ;;  %v7721_v38 = vor.u32 %v8499_v9, %v7718_v8  ;;  %v8509_v7 = vld [vmem:[#allocation2 + $0x224] sm:$0xf]  ;;  %v7750_v9 = vld [vmem:[#allocation2 + $0x218] sm:$0xf0] }
 0x3df   : > { %v3897_v57 = vpop.f32.mrf.mxu2  ;;  %4780 = vmatpush.bf16.msrb.mxu1 %v7737_v16  ;;  %4773 = vmatpush.bf16.msrb.mxu0 %v7625_v47  ;;  %v7697_v16 = vor.u32 %v8493_v30, %v7694_v42  ;;  %v7686_v47 = vld [vmem:[#allocation2 + $0x198] sm:$0xf0] }
 0x3e0   : > { %v3967_v56 = vadd.f32 %v10847_v53, %v3954_v26  ;;  %v7678_v57 = vld [vmem:[#allocation2 + $0x188] sm:$0xf0]  ;;  %v7889_v26 = vor.u32 %v8541_v21, %v7886_v43 }
 0x3e1   : > { %4812 = vmatpush.bf16.msrb.mxu3 %v7817_v17  ;;  %v8511_v17 = vld [vmem:[#allocation2 + $0x234] sm:$0xf]  ;;  %v7681_v46 = vor.u32 %v8489_v24, %v7678_v57 }
 0x3e2   : > { %v10879_v6 = vpack.c.bf16 %v3967_v56, %v3967_v56  ;;  %v7769_v3 = vor.u32 %v8511_v17, %v7766_v61 }
 0x3e3   : > { %4781 = vmatpush.bf16.msrb.mxu1 %v7729_v20  ;;  %4774 = vmatpush.bf16.msrb.mxu0 %v7617_v41  ;;  %v7761_v20 = vor.u32 %v8509_v7, %v7758_v32  ;;  %v8507_v41 = vld [vmem:[#allocation2 + $0x214] sm:$0xf] }
 0x3e4   : > { %4697 = vmatmul.bf16.vlgmr.msrb.gmra.mxu2 %v10879_v6  ;;  %v7753_v56 = vor.u32 %v8507_v41, %v7750_v9 }
 0x3e5   : > { %4813 = vmatpush.bf16.msrb.mxu3 %v7809_v33  ;;  %v3910_v19 = vpop.f32.mrf.mxu3  ;;  %4793 = vmatpush.bf16.msrb.mxu2 %v7801_v4  ;;  %v8539_v33 = vld [vmem:[#allocation2 + $0x314] sm:$0xf]  ;;  %v7870_v4 = vld [vmem:[#allocation2 + $0x308] sm:$0xf0] }
 0x3e6   : > { %4775 = vmatmul.bf16.vlgmr.msrb.gmra.mxu0 %v3973_v49  ;;  %v8491_v49 = vld [vmem:[#allocation2 + $0x194] sm:$0xf]  ;;  %v7881_v8 = vor.u32 %v8539_v33, %v7878_v48 }
 0x3e7   : > { %4819 = vmatpush.bf16.msra.mxu0 %v7929_v37  ;;  %v3947_v54 = vpop.f32.mrf.mxu2  ;;  %4782 = vmatpush.bf16.msrb.mxu1 %v7721_v38  ;;  %v7689_v13 = vor.u32 %v8491_v49, %v7686_v47  ;;  %v8537_v37 = vld [vmem:[#allocation2 + $0x304] sm:$0xf]  ;;  %v7745_v38 = vor.u32 %v8505_v31, %v7742_v63 }
 0x3e8   : > { %4814 = vmatmul.bf16.vlgmr.msrb.gmra.mxu3 %v10871_v52  ;;  %v3957_v27 = vadd.f32 %v3947_v54, %v3848_v58  ;;  %v8545_v52 = vld [vmem:[#allocation2 + $0x344] sm:$0xf] }
 0x3e9   : > { %4794 = vmatpush.bf16.msrb.mxu2 %v7793_v59  ;;  %v7905_v40 = vor.u32 %v8545_v52, %v7902_v22 }
 0x3ea   : > { %v3970_v55 = vadd.f32 %v10847_v53, %v3957_v27 }
 0x3eb   : > { %4820 = vmatpush.bf16.msra.mxu0 %v7921_v15  ;;  %4783 = vmatpush.bf16.msrb.mxu1 %v7713_v12 }
 0x3ec   : > { %v3977_v14 = vpack.c.bf16 %v3970_v55, %v3970_v55 }
 0x3ed   : > { %4795 = vmatpush.bf16.msrb.mxu2 %v7785_v44 }
 0x3ee   : > { %4736 = vmatmul.bf16.vlgmr.msra.gmra.mxu1 %v3977_v14 }
 0x3ef   : > { %4821 = vmatpush.bf16.msra.mxu0 %v7913_v29  ;;  %4784 = vmatpush.bf16.msrb.mxu1 %v7705_v25  ;;  %v3949_v53 = vpop.f32.mrf.mxu2 }
 0x3f1   : > { %4796 = vmatpush.bf16.msrb.mxu2 %v7777_v28 }
 0x3f3   : > { %4822 = vmatpush.bf16.msra.mxu0 %v7905_v40  ;;  %4785 = vmatpush.bf16.msrb.mxu1 %v7697_v16 }
 0x3f4   : > { %4749 = vmatmul.bf16.vlgmr.msra.gmra.mxu2 %v10850_v1  ;;  %v7873_v1 = vor.u32 %v8537_v37, %v7870_v4 }
 0x3f5   : > { %4797 = vmatpush.bf16.msrb.mxu2 %v7769_v3 }
 0x3f7   : > { %4823 = vmatpush.bf16.msra.mxu0 %v7897_v11  ;;  %4786 = vmatpush.bf16.msrb.mxu1 %v7689_v13 }
 0x3f9   : > { %4798 = vmatpush.bf16.msrb.mxu2 %v7761_v20 }
 0x3fb   : > { %4824 = vmatpush.bf16.msra.mxu0 %v7889_v26  ;;  %4787 = vmatpush.bf16.msrb.mxu1 %v7681_v46 }
 0x3fd   : > { %4799 = vmatpush.bf16.msrb.mxu2 %v7753_v56 }
 0x3fe   : > { %4788 = vmatmul.bf16.vlgmr.msrb.gmra.mxu1 %v10879_v6 }
 0x3ff   : > { %4825 = vmatpush.bf16.msra.mxu0 %v7881_v8 }
 0x401   : > { %4800 = vmatpush.bf16.msrb.mxu2 %v7745_v38 }
 0x403   : > { %4826 = vmatpush.bf16.msra.mxu0 %v7873_v1 }
 0x404   : > { %4801 = vmatmul.bf16.vlgmr.msrb.gmra.mxu2 %v10858_v18 }
 0x406   : > { %4827 = vmatmul.bf16.vlgmr.msra.gmra.mxu0 %v3977_v14 }
 0x42b   : > { %v4659_v45 = vpop.f32.mrf.mxu3 }
 0x433   : > { %v4661_v34 = vpop.f32.mrf.mxu3 }
 0x43b   : > { %v4711_v51 = vpop.f32.mrf.mxu3 }
 0x443   : > { %v4672_v35 = vpop.f32.mrf.mxu0  ;;  %v4713_v15 = vpop.f32.mrf.mxu3 }
 0x444   : > { %v4673_v2 = vadd.f32 %v4672_v35, %v4659_v45 }
 0x44b   : > { %v4674_v58 = vpop.f32.mrf.mxu0  ;;  %v4763_v19 = vpop.f32.mrf.mxu3 }
 0x453   : > { %v4724_v59 = vpop.f32.mrf.mxu0  ;;  %v4765_v60 = vpop.f32.mrf.mxu3 }
 0x45b   : > { %v4685_v39 = vpop.f32.mrf.mxu1  ;;  %v4726_v54 = vpop.f32.mrf.mxu0 }
 0x45c   : > { %v4686_v62 = vadd.f32 %v4685_v39, %v4673_v2  ;;  %v8555_v54 = vld [vmem:[%s11483_s4 + $0x10] sm:$0xff] }
 0x463   : > { %v4687_v12 = vpop.f32.mrf.mxu1  ;;  %v4776_v6 = vpop.f32.mrf.mxu0 }
 0x467   : > { %v4698_v27 = vpop.f32.mrf.mxu2 }
 0x468   : > { %v4699_v0 = vadd.f32 %v4698_v27, %v4686_v62 }
 0x46a   : > { %v4712_v29 = vadd.f32 %v4711_v51, %v4699_v0 }
 0x46b   : > { %v4815_v10 = vpop.f32.mrf.mxu3  ;;  %v4737_v18 = vpop.f32.mrf.mxu1 }
 0x46c   : > { %v4778_v55 = vpop.f32.mrf.mxu0  ;;  %v4725_v25 = vadd.f32 %v4724_v59, %v4712_v29 }
 0x46e   : > { %v4738_v36 = vadd.f32 %v4737_v18, %v4725_v25 }
 0x46f   : > { %v4700_v44 = vpop.f32.mrf.mxu2 }
 0x470   : > { %v7930_v30 = vmul.f32 -1.442695, %v4738_v36 }
 0x472   : > { %8730 = vpow2.f32 %v7930_v30 }
 0x473   : > { %v4817_v52 = vpop.f32.mrf.mxu3  ;;  %v4739_v22 = vpop.f32.mrf.mxu1 }
 0x474   : > { %v6232_v52 = vld [vmem:[%s11484_s5 + $0x8] sm:$0xff]  ;;  %v8557_v22 = vld [vmem:[%s11483_s4 + $0x20] sm:$0xff] }
 0x477   : > { %v4750_v23 = vpop.f32.mrf.mxu2 }
 0x478   : > { %v4764_v42 = vadd.f32 %v4763_v19, %v4750_v23  ;;  %v8731_v53 = vpop.eup %8730 }
 0x479   : > { %v4838_v47 = vadd.f32 1.0, %v8731_v53 }
 0x47a   : > { %v4777_v50 = vadd.f32 %v4776_v6, %v4764_v42 }
 0x47b   : > { %v4789_v14 = vpop.f32.mrf.mxu1  ;;  %8732 = vrcp.f32 %v4838_v47  ;;  %vm4845_vm13 = vweird.f32 %v4838_v47  ;;  %v4851_v41 = vand.u32 2147483648, %v4838_v47  ;;  %v4849_v8 = vand.u32 2147483647, %v4838_v47 }
 0x47c   : > { %v4790_v16 = vadd.f32 %v4789_v14, %v4777_v50 }
 0x47d   : > { %v4852_v63 = vor.u32 1.1754944e-38, %v4851_v41  ;;  %vm4850_vm9 = vcmp.eq.f32.partialorder %v4849_v8, 8.507059e+37 }
 0x47f   : > { %v4752_v40 = vpop.f32.mrf.mxu2 }
 0x481   : > { %v8733_v13 = vpop.eup %8732 }
 0x482   : > { %v4841_v32 = vmul.f32 %v8733_v13, %v4838_v47  ;;  %vm4846_vm12 = vweird.f32 %v8733_v13 }
 0x483   : > { %v4828_v28 = vpop.f32.mrf.mxu0  ;;  %v4791_v5 = vpop.f32.mrf.mxu1  ;;  %vm4847_vm15 = vmor %vm4845_vm13, %vm4846_vm12  ;;  %vm5364_vm12 = vcmask 900096   ;;  %vm5529_vm13 = vcmask 801792  }
 0x484   : > { %v4842_v57 = vsub.f32 1.0, %v4841_v32 }
 0x486   : > { %v4843_v26 = vmul.f32 %v8733_v13, %v4842_v57  ;;  %v8556_v57 = vld [vmem:[%s11483_s4 + $0x18] sm:$0xff] }
 0x487   : > { %v4802_v17 = vpop.f32.mrf.mxu2 }
 0x488   : > { %v4803_v61 = vadd.f32 %v4802_v17, %v4790_v16  ;;  %v4844_v48 = vadd.f32 %v8733_v13, %v4843_v26 }
 0x48a   : > { %v4816_v11 = vadd.f32 %v4815_v10, %v4803_v61  ;;  %v4848_v4 = vsel %vm4847_vm15, %v8733_v13, %v4844_v48  ;;  %v8554_v10 = vld [vmem:[%s11483_s4 + $0x8] sm:$0xff]  ;;  %v8553_v61 = vld [vmem:[%s11483_s4] sm:$0xff]  ;;  %vm5584_vm15 = vcmask 793600  }
 0x48b   : > { %v4830_v49 = vpop.f32.mrf.mxu0  ;;  %v4853_v45 = vsel %vm4850_vm9, %v4852_v63, %v4848_v4  ;;  %vm5803_vm9 = vcmask 687104  }
 0x48c   : > { %v4829_v3 = vadd.f32 %v4828_v28, %v4816_v11  ;;  %v8559_v11 = vld [vmem:[%s11483_s4 + $0x30] sm:$0xff] }
 0x48e   : > { %v7931_v21 = vmul.f32 -1.442695, %v4829_v3 }
 0x48f   : > { %v4804_v43 = vpop.f32.mrf.mxu2 }
 0x490   : > { %8734 = vpow2.f32 %v7931_v21 }
 0x496   : > { %v8735_v7 = vpop.eup %8734 }
 0x497   : > { %v4839_v24 = vadd.f32 1.0, %v8735_v7 }
 0x499   : > { %8736 = vrcp.f32 %v4839_v24  ;;  %v4866_v9 = vand.u32 2147483648, %v4839_v24  ;;  %v4864_v37 = vand.u32 2147483647, %v4839_v24  ;;  %vm4860_vm7 = vweird.f32 %v4839_v24 }
 0x49b   : > { %v4867_v1 = vor.u32 1.1754944e-38, %v4866_v9  ;;  %vm4865_vm10 = vcmp.eq.f32.partialorder %v4864_v37, 8.507059e+37  ;;  %v8561_v37 = vld [vmem:[%s11483_s4 + $0x40] sm:$0xff] }
 0x49f   : > { %v8737_v20 = vpop.eup %8736 }
 0x4a0   : > { %v4856_v33 = vmul.f32 %v8737_v20, %v4839_v24  ;;  %vm4861_vm14 = vweird.f32 %v8737_v20 }
 0x4a1   : > { %vm4862_vm8 = vmor %vm4860_vm7, %vm4861_vm14  ;;  %vm5474_vm14 = vcmask 809984   ;;  %vm5693_vm7 = vcmask 703488  }
 0x4a2   : > { %v4857_v46 = vsub.f32 1.0, %v4856_v33 }
 0x4a4   : > { %v4858_v56 = vmul.f32 %v8737_v20, %v4857_v46 }
 0x4a6   : > { %v4859_v31 = vadd.f32 %v8737_v20, %v4858_v56 }
 0x4a8   : > { %v4863_v38 = vsel %vm4862_vm8, %v8737_v20, %v4859_v31  ;;  %vm5858_vm8 = vcmask 678912  }
 0x4a9   : > { %v4868_v34 = vsel %vm4865_vm10, %v4867_v1, %v4863_v38  ;;  %vm5968_vm10 = vcmask 588800  }
 0x4aa   : > { %v4870_v51 = vpack.c.bf16 %v4868_v34, %v4853_v45 }
 0x4ac   : > { %v4882_v35 = vunpack.c.l.b16 %v4870_v51  ;;  %v4883_v15 = vunpack.c.h.b16 %v4870_v51  ;;  %v8558_v51 = vld [vmem:[%s11483_s4 + $0x28] sm:$0xff] }
 0x4ae   : > { %v10889_v58 = vpack.c.b16 %v4882_v35, %v4882_v35  ;;  %v10891_v19 = vpack.c.b16 %v4883_v15, %v4883_v15 }
 0x4b0   : > { %5034 = vrot.lane.b32.xlu0 %v10891_v19, %s8857_s30  ;;  %4888 = vrot.lane.b32.xlu1 %v10891_v19, %s8855_s22  ;;  %v4940_v18 = vsel %vm521_vm1, %v10891_v19, 0  ;;  %v4937_v44 = vsel %vm521_vm1, %v10889_v58, 0 }
 0x4b1   : > { %4886 = vrot.lane.b32.xlu2 %v10889_v58, %s8855_s22  ;;  %s8877_s22 = smov 114  }
 0x4b8   : > { %5032 = vrot.lane.b32.xlu0 %v10889_v58, %s8857_s30  ;;  %4978 = vrot.lane.b32.xlu1 %v10889_v58, %s8856_s24  ;;  %s8878_s30 = smov 110  }
 0x4b9   : > { %4980 = vrot.lane.b32.xlu2 %v10891_v19, %s8856_s24  ;;  %s8879_s24 = smov 112  }
 0x4c0   : > { %5197 = vrot.lane.b32.xlu0 %v10891_v19, %s8875_s3  ;;  %5086 = vrot.lane.b32.xlu1 %v10889_v58, %s8858_s15 }
 0x4c1   : > { %5088 = vrot.lane.b32.xlu2 %v10891_v19, %s8858_s15  ;;  %s8880_s15 = smov 98  }
 0x4c8   : > { %5305 = vrot.lane.b32.xlu0 %v10889_v58, %s8876_s21  ;;  %5142 = vrot.lane.b32.xlu1 %v10891_v19, %s8877_s22 }
 0x4c9   : > { %5195 = vrot.lane.b32.xlu2 %v10889_v58, %s8875_s3  ;;  %s8883_s3 = smov 86  }
 0x4d0   : > { %5362 = vrot.lane.b32.xlu0 %v10891_v19, %s8878_s30  ;;  %5140 = vrot.lane.b32.xlu1 %v10889_v58, %s8877_s22  ;;  %s8885_s22 = smov 83  }
 0x4d1   : > { %5252 = vrot.lane.b32.xlu2 %v10891_v19, %s8879_s24 }
 0x4d8   : > { %5360 = vrot.lane.b32.xlu0 %v10889_v58, %s8878_s30  ;;  %5307 = vrot.lane.b32.xlu1 %v10891_v19, %s8876_s21  ;;  %s8884_s21 = smov 97   ;;  %s8886_s30 = smov 85  }
 0x4d9   : > { %5250 = vrot.lane.b32.xlu2 %v10889_v58, %s8879_s24  ;;  %s8887_s24 = smov 72  }
 0x4e0   : > { %5527 = vrot.lane.b32.xlu0 %v10891_v19, %s8880_s15  ;;  %5415 = vrot.lane.b32.xlu1 %v10889_v58, %s8881_s16 }
 0x4e1   : > { %5417 = vrot.lane.b32.xlu2 %v10891_v19, %s8881_s16  ;;  %s8889_s16 = smov 71  }
 0x4e8   : > { %5635 = vrot.lane.b32.xlu0 %v10889_v58, %s11547_s23  ;;  %5472 = vrot.lane.b32.xlu1 %v10891_v19, %s8882_s20 }
 0x4e9   : > { %5525 = vrot.lane.b32.xlu2 %v10889_v58, %s8880_s15  ;;  %s8888_s15 = smov 84  }
 0x4f0   : > { %5691 = vrot.lane.b32.xlu0 %v10891_v19, %s8883_s3  ;;  %5470 = vrot.lane.b32.xlu1 %v10889_v58, %s8882_s20  ;;  %s8804_s20 = scalar_lea.hbm %s11492_s13, 2 }
 0x4f1   : > { %5582 = vrot.lane.b32.xlu2 %v10891_v19, %s8884_s21 }
 0x4f8   : > { %5689 = vrot.lane.b32.xlu0 %v10889_v58, %s8883_s3  ;;  %5637 = vrot.lane.b32.xlu1 %v10891_v19, %s11547_s23  ;;  %s8890_s23 = smov 82   ;;  %s8893_s3 = smov 69  }
 0x4f9   : > { %5580 = vrot.lane.b32.xlu2 %v10889_v58, %s8884_s21  ;;  %s8891_s21 = smov 68  }
 0x500   : > { %5856 = vrot.lane.b32.xlu0 %v10891_v19, %s8885_s22  ;;  %5744 = vrot.lane.b32.xlu1 %v10889_v58, %s8886_s30 }
 0x501   : > { %5746 = vrot.lane.b32.xlu2 %v10891_v19, %s8886_s30 }
 0x508   : > { %5964 = vrot.lane.b32.xlu0 %v10889_v58, %s8887_s24  ;;  %5801 = vrot.lane.b32.xlu1 %v10891_v19, %s8888_s15 }
 0x509   : > { %5854 = vrot.lane.b32.xlu2 %v10889_v58, %s8885_s22  ;;  %s8892_s22 = smov 70  }
 0x50b   : > { %v4887_v59 = vpop.permute.xlu2 %4886 }
 0x510   : > { %6021 = vrot.lane.b32.xlu0 %v10891_v19, %s8889_s16  ;;  %5799 = vrot.lane.b32.xlu1 %v10889_v58, %s8888_s15 }
 0x511   : > { %5911 = vrot.lane.b32.xlu2 %v10891_v19, %s8890_s23 }
 0x513   : > { %v4981_v60 = vpop.permute.xlu2 %4980 }
 0x514   : > { %v4990_v39 = vsel %vm521_vm1, %v4981_v60, 0 }
 0x515   : > { %5013 = vmatpush.bf16.msrb.mxu0 %v4990_v39  ;;  %v8563_v39 = vld [vmem:[%s11483_s4 + $0x50] sm:$0xff] }
 0x518   : > { %6019 = vrot.lane.b32.xlu0 %v10889_v58, %s8889_s16  ;;  %5966 = vrot.lane.b32.xlu1 %v10891_v19, %s8887_s24  ;;  %s448_s16 = sand.u32 1, %s8842_s26  }
 0x519   : > { %5909 = vrot.lane.b32.xlu2 %v10889_v58, %s8890_s23  ;;  %7953 = vmatmul.msk.bf16.vlgmr.msrb.gmra.mxu0 %vm517_vm2, %v8555_v54  ;;  %s449_s0 = scalar_lea.vmem [#allocation5], %s448_s16  ;;  %s7197_s15 = scalar_lea.sflag [#allocation4], %s448_s16 }
 0x51a   : > { %s7207_s30 = sshll.u32 %s449_s0, 4  ;;  %s7208_s30 = int_to_ptr.vmem [resolvable:$true] %s7207_s30 }
 0x51b   : > { %v5089_v12 = vpop.permute.xlu2 %5088 }
 0x51c   : > { %v5098_v6 = vsel %vm521_vm1, %v5089_v12, 0 }
 0x51d   : > { %5121 = vmatpush.bf16.msra.mxu0 %v5098_v6 }
 0x520   : > { %6186 = vrot.lane.b32.xlu0 %v10891_v19, %s8891_s21  ;;  %6074 = vrot.lane.b32.xlu1 %v10889_v58, %s8892_s22 }
 0x521   : > { %6076 = vrot.lane.b32.xlu2 %v10891_v19, %s8892_s22 }
 0x522   : > { %v5035_v2 = vpop.permute.xlu0 %5034  ;;  %v4889_v62 = vpop.permute.xlu1 %4888 }
 0x523   : > { %v4890_v27 = vsel %vm509_vm0, %v4887_v59, %v4889_v62  ;;  %v4898_v0 = vsel %vm521_vm1, %v4889_v62, 0  ;;  %v5196_v55 = vpop.permute.xlu2 %5195  ;;  %v5044_v25 = vsel %vm521_vm1, %v5035_v2, 0  ;;  %vm5199_vm0 = vcmask 924672  }
 0x524   : > { %v4895_v29 = vsel %vm521_vm1, %v4890_v27, 0  ;;  %4921 = vmatpush.bf16.msra.mxu2 %v4898_v0  ;;  %v8560_v27 = vld [vmem:[%s11483_s4 + $0x38] sm:$0xff] }
 0x525   : > { %4907 = vmatpush.bf16.msra.mxu1 %v4895_v29 }
 0x527   : > { %7939 = vmatmul.msk.bf16.vlgmr.msra.gmra.mxu2 %vm517_vm2, %v8554_v10 }
 0x528   : > { %4963 = vmatpush.bf16.msrb.mxu2 %v4940_v18  ;;  %6240 = vperm.xlu0 %8728, %v6232_v52   ;;  %v8565_v52 = vld [vmem:[%s11483_s4 + $0x60] sm:$0xff] }
 0x529   : > { %4949 = vmatpush.bf16.msrb.mxu1 %v4937_v44  ;;  %6131 = vrot.lane.b32.xlu1 %v10891_v19, %s8893_s3 }
 0x52a   : > { %6184 = vrot.lane.b32.xlu2 %v10889_v58, %s8891_s21  ;;  %7938 = vmatmul.msk.bf16.vlgmr.msra.gmra.mxu1 %vm517_vm2, %v8554_v10  ;;  %v5033_v23 = vpop.permute.xlu0 %5032  ;;  %v4979_v36 = vpop.permute.xlu1 %4978 }
 0x52b   : > { %7969 = vmatmul.msk.bf16.vlgmr.msra.gmra.mxu0 %vm517_vm2, %v8557_v22  ;;  %v5036_v14 = vsel %vm915_vm4, %v5033_v23, %v5035_v2  ;;  %v4982_v30 = vsel %vm767_vm3, %v4979_v36, %v4981_v60  ;;  %v5253_v28 = vpop.permute.xlu2 %5252  ;;  %vm5144_vm3 = vcmask 932864   ;;  %vm5254_vm4 = vcmask 916480  }
 0x52c   : > { %5067 = vmatpush.bf16.msra.mxu2 %v5044_v25  ;;  %v5041_v42 = vsel %vm521_vm1, %v5036_v14, 0  ;;  %v4987_v40 = vsel %vm521_vm1, %v4982_v30, 0  ;;  %v5263_v33 = vsel %vm521_vm1, %v5253_v28, 0 }
 0x52d   : > { %4999 = vmatpush.bf16.msra.mxu3 %v4987_v40  ;;  %5053 = vmatpush.bf16.msra.mxu1 %v5041_v42  ;;  %v8562_v42 = vld [vmem:[%s11483_s4 + $0x48] sm:$0xff] }
 0x530   : > { %7952 = vmatmul.msk.bf16.vlgmr.msra.gmra.mxu3 %vm517_vm2, %v8555_v54 }
 0x531   : > { %6129 = vrot.lane.b32.xlu1 %v10889_v58, %s8893_s3  ;;  %s7205_s3 = scalar_lea.hbm %s11492_s13, %s8986_s29 }
 0x532   : > { %v5198_v50 = vpop.permute.xlu0 %5197  ;;  %v5087_v5 = vpop.permute.xlu1 %5086  ;;  %s7209_s24 = sshll.u32 %s7205_s3, 4  ;;  %s7210_s24 = int_to_ptr.hbm [resolvable:$true] %s7209_s24 }
 0x533   : > { %v5200_v53 = vsel %vm5199_vm0, %v5196_v55, %v5198_v50  ;;  %v5208_v16 = vsel %vm521_vm1, %v5198_v50, 0  ;;  %v5090_v17 = vsel %vm1063_vm5, %v5087_v5, %v5089_v12  ;;  %v5251_v3 = vpop.permute.xlu2 %5250  ;;  %vm5309_vm5 = vcmask 908288   ;;  %s8798_s1 = sshra.s32 %s7210_s24, 4  ;;  %s8799_s1 = int_to_ptr.hbm [resolvable:$true] %s8798_s1 }
 0x534   : > { %v5205_v49 = vsel %vm521_vm1, %v5200_v53, 0  ;;  %v5095_v47 = vsel %vm521_vm1, %v5090_v17, 0  ;;  %5231 = vmatpush.bf16.msrb.mxu0 %v5208_v16  ;;  %v5255_v48 = vsel %vm5254_vm4, %v5251_v3, %v5253_v28  ;;  %v8567_v53 = vld [vmem:[%s11483_s4 + $0x70] sm:$0xff]  ;;  %v8564_v3 = vld [vmem:[%s11483_s4 + $0x58] sm:$0xff]  ;;  %vm5913_vm0 = vcmask 670720   ;;  %s8800_s2 = scalar_lea.hbm %s8799_s1, 1  ;;  %p8805_p3 = scmp.lt.s32.totalorder %s8799_s1, %s11492_s13 }
 0x535   : > { %5107 = vmatpush.bf16.msrb.mxu3 %v5095_v47  ;;  %v5260_v46 = vsel %vm521_vm1, %v5255_v48, 0  ;;  %vm6023_vm4 = vcmask 580608   ;;  %p8801_p0 = scmp.ne.s32.totalorder %s8799_s1, %s8800_s2  ;;  %p8806_p4 = scmp.lt.s32.totalorder %s8804_s20, %s8800_s2 }
 0x537   : > { %7945 = vmatmul.msk.bf16.vlgmr.msrb.gmra.mxu2 %vm517_vm2, %v8553_v61  ;;  %p8802_p1 = pnand %p8801_p0, %p9003_p5  ;;  %p8807_p7 = por %p8806_p4, %p8805_p3 }
 0x539   : > { %5217 = vmatpush.bf16.msra.mxu3 %v5205_v49  ;;  %p8803_p2 = pneg %p8802_p1 }
 0x53a   : > { %7944 = vmatmul.msk.bf16.vlgmr.msrb.gmra.mxu1 %vm517_vm2, %v8553_v61  ;;  %v5306_v21 = vpop.permute.xlu0 %5305  ;;  %v5143_v43 = vpop.permute.xlu1 %5142 }
 0x53b   : > { %7985 = vmatmul.msk.bf16.vlgmr.msrb.gmra.mxu0 %vm517_vm2, %v8559_v11  ;;  %v5153_v13 = vsel %vm521_vm1, %v5143_v43, 0  ;;  %v5418_v26 = vpop.permute.xlu2 %5417  ;;  %p8808_p8 = pnand %p8807_p7, %p8803_p2 }
 0x53c   : > { %5176 = vmatpush.bf16.msrb.mxu2 %v5153_v13  ;;  %v5428_v4 = vsel %vm521_vm1, %v5418_v26, 0 }
 0x540   : > { %7968 = vmatmul.msk.bf16.vlgmr.msrb.gmra.mxu3 %vm517_vm2, %v8557_v22 }
 0x542   : > { %v5363_v7 = vpop.permute.xlu0 %5362  ;;  %v5141_v32 = vpop.permute.xlu1 %5140 }
 0x543   : > { %v5145_v24 = vsel %vm5144_vm3, %v5141_v32, %v5143_v43  ;;  %v5526_v63 = vpop.permute.xlu2 %5525  ;;  %v5373_v15 = vsel %vm521_vm1, %v5363_v7, 0  ;;  %v8569_v32 = vld [vmem:[%s11483_s4 + $0x80] sm:$0xff]  ;;  %vm6078_vm3 = vcmask 572416  }
 0x544   : > { %v5150_v20 = vsel %vm521_vm1, %v5145_v24, 0 }
 0x545   : > { %5162 = vmatpush.bf16.msrb.mxu1 %v5150_v20 }
 0x547   : > { %7961 = vmatmul.msk.bf16.vlgmr.msra.gmra.mxu2 %vm517_vm2, %v8556_v57 }
 0x548   : > { %5286 = vmatpush.bf16.msra.mxu2 %v5263_v33 }
 0x54a   : > { %7960 = vmatmul.msk.bf16.vlgmr.msra.gmra.mxu1 %vm517_vm2, %v8556_v57  ;;  %v5361_v41 = vpop.permute.xlu0 %5360  ;;  %v5308_v9 = vpop.permute.xlu1 %5307 }
 0x54b   : > { %5272 = vmatpush.bf16.msra.mxu1 %v5260_v46  ;;  %v5310_v8 = vsel %vm5309_vm5, %v5306_v21, %v5308_v9  ;;  %v5318_v56 = vsel %vm521_vm1, %v5308_v9, 0  ;;  %v5365_v58 = vsel %vm5364_vm12, %v5361_v41, %v5363_v7  ;;  %v5583_v19 = vpop.permute.xlu2 %5582  ;;  %v8566_v46 = vld [vmem:[%s11483_s4 + $0x68] sm:$0xff]  ;;  %vm6188_vm5 = vcmask 556032  }
 0x54c   : > { %v5315_v31 = vsel %vm521_vm1, %v5310_v8, 0  ;;  %5341 = vmatpush.bf16.msra.mxu0 %v5318_v56  ;;  %v5370_v59 = vsel %vm521_vm1, %v5365_v58, 0  ;;  %v5593_v40 = vsel %vm521_vm1, %v5583_v19, 0  ;;  %vm6320_vm12 = vcmask 97280  }
 0x54d   : > { %5327 = vmatpush.bf16.msrb.mxu3 %v5315_v31 }
 0x54f   : > { %8001 = vmatmul.msk.bf16.vlgmr.msra.gmra.mxu0 %vm517_vm2, %v8561_v37 }
 0x550   : > { %5451 = vmatpush.bf16.msrb.mxu0 %v5428_v4  ;;  %7984 = vmatmul.msk.bf16.vlgmr.msra.gmra.mxu3 %vm517_vm2, %v8559_v11  ;;  %v8571_v4 = vld [vmem:[%s11483_s4 + $0x90] sm:$0xff] }
 0x552   : > { %v5528_v1 = vpop.permute.xlu0 %5527  ;;  %v5416_v38 = vpop.permute.xlu1 %5415 }
 0x553   : > { %v5538_v45 = vsel %vm521_vm1, %v5528_v1, 0  ;;  %v5420_v34 = vsel %vm5419_vm11, %v5416_v38, %v5418_v26  ;;  %v5530_v54 = vsel %vm5529_vm13, %v5526_v63, %v5528_v1  ;;  %v5581_v2 = vpop.permute.xlu2 %5580  ;;  %vm6133_vm11 = vcmask 564224  }
 0x554   : > { %v5425_v35 = vsel %vm521_vm1, %v5420_v34, 0  ;;  %5561 = vmatpush.bf16.msra.mxu0 %v5538_v45  ;;  %v5535_v6 = vsel %vm521_vm1, %v5530_v54, 0  ;;  %v5585_v28 = vsel %vm5584_vm15, %v5581_v2, %v5583_v19  ;;  %v8573_v54 = vld [vmem:[%s11483_s4 + $0xa0] sm:$0xff]  ;;  %vm6426_vm13 = vcmask 1044480  }
 0x555   : > { %5437 = vmatpush.bf16.msra.mxu3 %v5425_v35  ;;  %v5590_v50 = vsel %vm521_vm1, %v5585_v28, 0 }
 0x557   : > { %7977 = vmatmul.msk.bf16.vlgmr.msrb.gmra.mxu2 %vm517_vm2, %v8558_v51 }
 0x558   : > { %5396 = vmatpush.bf16.msrb.mxu2 %v5373_v15 }
 0x55a   : > { %7976 = vmatmul.msk.bf16.vlgmr.msrb.gmra.mxu1 %vm517_vm2, %v8558_v51  ;;  %v5473_v60 = vpop.permute.xlu1 %5472  ;;  %v5636_v12 = vpop.permute.xlu0 %5635  ;;  %v8568_v51 = vld [vmem:[%s11483_s4 + $0x78] sm:$0xff] }
 0x55b   : > { %5382 = vmatpush.bf16.msrb.mxu1 %v5370_v59  ;;  %v5483_v0 = vsel %vm521_vm1, %v5473_v60, 0  ;;  %v5747_v22 = vpop.permute.xlu2 %5746 }
 0x55c   : > { %v5757_v23 = vsel %vm521_vm1, %v5747_v22, 0 }
 0x55f   : > { %8017 = vmatmul.msk.bf16.vlgmr.msrb.gmra.mxu0 %vm517_vm2, %v8563_v39 }
 0x560   : > { %8000 = vmatmul.msk.bf16.vlgmr.msrb.gmra.mxu3 %vm517_vm2, %v8561_v37 }
 0x561   : > { %5547 = vmatpush.bf16.msrb.mxu3 %v5535_v6 }
 0x562   : > { %v5471_v62 = vpop.permute.xlu1 %5470  ;;  %v5692_v29 = vpop.permute.xlu0 %5691 }
 0x563   : > { %v5475_v10 = vsel %vm5474_vm14, %v5471_v62, %v5473_v60  ;;  %v5855_v61 = vpop.permute.xlu2 %5854  ;;  %v5702_v21 = vsel %vm521_vm1, %v5692_v29, 0 }
 0x564   : > { %v5480_v18 = vsel %vm521_vm1, %v5475_v10, 0 }
 0x567   : > { %7993 = vmatmul.msk.bf16.vlgmr.msra.gmra.mxu2 %vm517_vm2, %v8560_v27 }
 0x568   : > { %5506 = vmatpush.bf16.msra.mxu2 %v5483_v0 }
 0x56a   : > { %7992 = vmatmul.msk.bf16.vlgmr.msra.gmra.mxu1 %vm517_vm2, %v8560_v27  ;;  %v5638_v55 = vpop.permute.xlu1 %5637  ;;  %v5690_v14 = vpop.permute.xlu0 %5689 }
 0x56b   : > { %5492 = vmatpush.bf16.msra.mxu1 %v5480_v18  ;;  %v5647_v44 = vsel %vm521_vm1, %v5638_v55, 0  ;;  %v5639_v25 = vsel %vm1211_vm6, %v5636_v12, %v5638_v55  ;;  %vm5748_vm6 = vcmask 695296   ;;  %v5694_v43 = vsel %vm5693_vm7, %v5690_v14, %v5692_v29  ;;  %v5912_v13 = vpop.permute.xlu2 %5911  ;;  %v8570_v18 = vld [vmem:[%s11483_s4 + $0x88] sm:$0xff] }
 0x56c   : > { %5670 = vmatpush.bf16.msrb.mxu0 %v5647_v44  ;;  %v5644_v36 = vsel %vm521_vm1, %v5639_v25, 0  ;;  %v5699_v7 = vsel %vm521_vm1, %v5694_v43, 0  ;;  %v5922_v35 = vsel %vm521_vm1, %v5912_v13, 0  ;;  %vm6422_vm7 = vcmask 203776  }
 0x56f   : > { %8033 = vmatmul.msk.bf16.vlgmr.msra.gmra.mxu0 %vm517_vm2, %v8565_v52 }
 0x570   : > { %5780 = vmatpush.bf16.msra.mxu0 %v5757_v23  ;;  %8016 = vmatmul.msk.bf16.vlgmr.msra.gmra.mxu3 %vm517_vm2, %v8563_v39 }
 0x571   : > { %5656 = vmatpush.bf16.msra.mxu3 %v5644_v36 }
 0x572   : > { %v5745_v30 = vpop.permute.xlu1 %5744  ;;  %v5857_v16 = vpop.permute.xlu0 %5856 }
 0x573   : > { %v5749_v17 = vsel %vm5748_vm6, %v5745_v30, %v5747_v22  ;;  %v5867_v49 = vsel %vm521_vm1, %v5857_v16, 0  ;;  %v5859_v57 = vsel %vm5858_vm8, %v5855_v61, %v5857_v16  ;;  %v5910_v48 = vpop.permute.xlu2 %5909 }
 0x574   : > { %v5754_v47 = vsel %vm521_vm1, %v5749_v17, 0  ;;  %v5864_v33 = vsel %vm521_vm1, %v5859_v57, 0  ;;  %v5914_v15 = vsel %vm5913_vm0, %v5910_v48, %v5912_v13 }
 0x575   : > { %v5919_v59 = vsel %vm521_vm1, %v5914_v15, 0 }
 0x577   : > { %8009 = vmatmul.msk.bf16.vlgmr.msrb.gmra.mxu2 %vm517_vm2, %v8562_v42 }
 0x578   : > { %5616 = vmatpush.bf16.msrb.mxu2 %v5593_v40 }
 0x57a   : > { %8008 = vmatmul.msk.bf16.vlgmr.msrb.gmra.mxu1 %vm517_vm2, %v8562_v42  ;;  %v5802_v5 = vpop.permute.xlu1 %5801  ;;  %v5965_v26 = vpop.permute.xlu0 %5964 }
 0x57b   : > { %5602 = vmatpush.bf16.msrb.mxu1 %v5590_v50  ;;  %v5812_v41 = vsel %vm521_vm1, %v5802_v5, 0  ;;  %v6077_v31 = vpop.permute.xlu2 %6076 }
 0x57c   : > { %v6087_v1 = vsel %vm521_vm1, %v6077_v31, 0 }
 0x57f   : > { %8049 = vmatmul.msk.bf16.vlgmr.msrb.gmra.mxu0 %vm517_vm2, %v8567_v53 }
 0x580   : > { %5890 = vmatpush.bf16.msrb.mxu0 %v5867_v49  ;;  %8032 = vmatmul.msk.bf16.vlgmr.msrb.gmra.mxu3 %vm517_vm2, %v8565_v52 }
 0x581   : > { %5766 = vmatpush.bf16.msrb.mxu3 %v5754_v47 }
 0x582   : > { %v5800_v11 = vpop.permute.xlu1 %5799  ;;  %v6022_v56 = vpop.permute.xlu0 %6021 }
 0x583   : > { %v5804_v9 = vsel %vm5803_vm9, %v5800_v11, %v5802_v5  ;;  %v6032_v55 = vsel %vm521_vm1, %v6022_v56, 0  ;;  %v8572_v11 = vld [vmem:[%s11483_s4 + $0x98] sm:$0xff] }
 0x584   : > { %v5809_v37 = vsel %vm521_vm1, %v5804_v9, 0  ;;  %v6185_v28 = vpop.permute.xlu2 %6184 }
 0x587   : > { %8025 = vmatmul.msk.bf16.vlgmr.msra.gmra.mxu2 %vm517_vm2, %v8564_v3 }
 0x588   : > { %5725 = vmatpush.bf16.msra.mxu2 %v5702_v21 }
 0x58a   : > { %8024 = vmatmul.msk.bf16.vlgmr.msra.gmra.mxu1 %vm517_vm2, %v8564_v3  ;;  %v5967_v24 = vpop.permute.xlu1 %5966  ;;  %v6020_v34 = vpop.permute.xlu0 %6019 }
 0x58b   : > { %5711 = vmatpush.bf16.msra.mxu1 %v5699_v7  ;;  %v5977_v20 = vsel %vm521_vm1, %v5967_v24, 0  ;;  %v5969_v63 = vsel %vm5968_vm10, %v5965_v26, %v5967_v24  ;;  %v6024_v44 = vsel %vm6023_vm4, %v6020_v34, %v6022_v56  ;;  %v8574_v56 = vld [vmem:[%s11483_s4 + $0xa8] sm:$0xff] }
 0x58c   : > { %v5974_v45 = vsel %vm521_vm1, %v5969_v63, 0  ;;  %v6029_v23 = vsel %vm521_vm1, %v6024_v44, 0 }
 0x58f   : > { %8065 = vmatmul.msk.bf16.vlgmr.msra.gmra.mxu0 %vm517_vm2, %v8569_v32 }
 0x590   : > { %6000 = vmatpush.bf16.msra.mxu0 %v5977_v20  ;;  %8048 = vmatmul.msk.bf16.vlgmr.msra.gmra.mxu3 %vm517_vm2, %v8567_v53  ;;  %v8575_v53 = vld [vmem:[%s11483_s4 + $0xb0] sm:$0xff] }
 0x591   : > { %5876 = vmatpush.bf16.msra.mxu3 %v5864_v33 }
 0x592   : > { %v6075_v60 = vpop.permute.xlu1 %6074  ;;  %v6187_v12 = vpop.permute.xlu0 %6186 }
 0x593   : > { %v6079_v6 = vsel %vm6078_vm3, %v6075_v60, %v6077_v31  ;;  %v6197_v2 = vsel %vm521_vm1, %v6187_v12, 0  ;;  %v6189_v50 = vsel %vm6188_vm5, %v6185_v28, %v6187_v12 }
 0x594   : > { %v6084_v0 = vsel %vm521_vm1, %v6079_v6, 0  ;;  %v6194_v17 = vsel %vm521_vm1, %v6189_v50, 0 }
 0x596   : > { %v11077_v8 = vpop.f32.mrf.mxu0 }
 0x597   : > { %8041 = vmatmul.msk.bf16.vlgmr.msrb.gmra.mxu2 %vm517_vm2, %v8566_v46 }
 0x598   : > { %5835 = vmatpush.bf16.msrb.mxu2 %v5812_v41 }
 0x59a   : > { %8040 = vmatmul.msk.bf16.vlgmr.msrb.gmra.mxu1 %vm517_vm2, %v8566_v46  ;;  %v8577_v46 = vld [vmem:[%s11483_s4 + $0xc0] sm:$0xff] }
 0x59b   : > { %5821 = vmatpush.bf16.msrb.mxu1 %v5809_v37  ;;  %v6132_v36 = vpop.permute.xlu1 %6131 }
 0x59c   : > { %v6142_v21 = vsel %vm521_vm1, %v6132_v36, 0 }
 0x59e   : > { %v11086_v38 = vpop.f32.mrf.mxu0 }
 0x59f   : > { %8081 = vmatmul.msk.bf16.vlgmr.msrb.gmra.mxu0 %vm517_vm2, %v8571_v4 }
 0x5a0   : > { %6110 = vmatpush.bf16.msrb.mxu0 %v6087_v1  ;;  %8064 = vmatmul.msk.bf16.vlgmr.msrb.gmra.mxu3 %vm517_vm2, %v8569_v32 }
 0x5a1   : > { %5986 = vmatpush.bf16.msrb.mxu3 %v5974_v45 }
 0x5a3   : > { %v6130_v3 = vpop.permute.xlu1 %6129 }
 0x5a4   : > { %v6134_v43 = vsel %vm6133_vm11, %v6130_v3, %v6132_v36 }
 0x5a5   : > { %v6139_v32 = vsel %vm521_vm1, %v6134_v43, 0 }
 0x5a7   : > { %v4909_v58 = vpop.f32.mrf.mxu1  ;;  %8057 = vmatmul.msk.bf16.vlgmr.msra.gmra.mxu2 %vm517_vm2, %v8568_v51 }
 0x5a8   : > { %v11095_v19 = vpop.f32.mrf.mxu0  ;;  %5945 = vmatpush.bf16.msra.mxu2 %v5922_v35 }
 0x5aa   : > { %8056 = vmatmul.msk.bf16.vlgmr.msra.gmra.mxu1 %vm517_vm2, %v8568_v51  ;;  %v4923_v39 = vpop.f32.mrf.mxu2 }
 0x5ab   : > { %5931 = vmatpush.bf16.msra.mxu1 %v5919_v59  ;;  %v8576_v59 = vld [vmem:[%s11483_s4 + $0xb8] sm:$0xff] }
 0x5af   : > { %v11103_v62 = vpop.f32.mrf.mxu1  ;;  %8097 = vmatmul.msk.bf16.vlgmr.msra.gmra.mxu0 %vm517_vm2, %v8573_v54 }
 0x5b0   : > { %v11106_v27 = vpop.f32.mrf.mxu0  ;;  %6220 = vmatpush.bf16.msra.mxu0 %v6197_v2  ;;  %8080 = vmatmul.msk.bf16.vlgmr.msra.gmra.mxu3 %vm517_vm2, %v8571_v4 }
 0x5b1   : > { %6096 = vmatpush.bf16.msra.mxu3 %v6084_v0 }
 0x5b2   : > { %v11110_v10 = vpop.f32.mrf.mxu2 }
 0x5b3   : > { %v5001_v29 = vpop.f32.mrf.mxu3 }
 0x5b7   : > { %v4951_v52 = vpop.f32.mrf.mxu1  ;;  %8073 = vmatmul.msk.bf16.vlgmr.msrb.gmra.mxu2 %vm517_vm2, %v8570_v18 }
 0x5b8   : > { %v4952_v22 = vadd.f32 %v4951_v52, %v4909_v58  ;;  %6055 = vmatpush.bf16.msrb.mxu2 %v6032_v55  ;;  %v5233_v25 = vpop.f32.mrf.mxu0  ;;  %v6231_v55 = vld [vmem:[%s11484_s5] sm:$0xff] }
 0x5b9   : > { %6235 = vperm.xlu2 %8729, %v6231_v55  }
 0x5ba   : > { %v5020_v14 = vadd.f32 %v5001_v29, %v4952_v22  ;;  %8072 = vmatmul.msk.bf16.vlgmr.msrb.gmra.mxu1 %vm517_vm2, %v8570_v18  ;;  %v4965_v30 = vpop.f32.mrf.mxu2 }
 0x5bb   : > { %6041 = vmatpush.bf16.msrb.mxu1 %v6029_v23  ;;  %v4966_v42 = vadd.f32 %v4965_v30, %v4923_v39  ;;  %v11119_v40 = vpop.f32.mrf.mxu3 }
 0x5bd   : > { %v5021_v5 = vadd.f32 %v11077_v8, %v4966_v42 }
 0x5bf   : > { %v4953_v16 = vpop.f32.mrf.mxu1  ;;  %8113 = vmatmul.msk.bf16.vlgmr.msrb.gmra.mxu0 %vm517_vm2, %v8575_v53 }
 0x5c0   : > { %8096 = vmatmul.msk.bf16.vlgmr.msrb.gmra.mxu3 %vm517_vm2, %v8573_v54  ;;  %v11128_v49 = vpop.f32.mrf.mxu0  ;;  %v4954_v44 = vadd.f32 %v4953_v16, %v11103_v62 }
 0x5c1   : > { %6206 = vmatpush.bf16.msrb.mxu3 %v6194_v17 }
 0x5c2   : > { %v4967_v61 = vpop.f32.mrf.mxu2  ;;  %v5022_v36 = vadd.f32 %v11119_v40, %v4954_v44 }
 0x5c3   : > { %v5109_v47 = vpop.f32.mrf.mxu3  ;;  %v4968_v23 = vadd.f32 %v4967_v61, %v11110_v10 }
 0x5c5   : > { %v5023_v28 = vadd.f32 %v11086_v38, %v4968_v23 }
 0x5c7   : > { %v5055_v13 = vpop.f32.mrf.mxu1  ;;  %8089 = vmatmul.msk.bf16.vlgmr.msra.gmra.mxu2 %vm517_vm2, %v8572_v11 }
 0x5c8   : > { %v5074_v7 = vadd.f32 %v5055_v13, %v5020_v14  ;;  %6165 = vmatpush.bf16.msra.mxu2 %v6142_v21 }
 0x5ca   : > { %v5128_v24 = vadd.f32 %v5109_v47, %v5074_v7  ;;  %8088 = vmatmul.msk.bf16.vlgmr.msra.gmra.mxu1 %vm517_vm2, %v8572_v11  ;;  %v5069_v57 = vpop.f32.mrf.mxu2 }
 0x5cb   : > { %6151 = vmatpush.bf16.msra.mxu1 %v6139_v32  ;;  %v5075_v26 = vadd.f32 %v5069_v57, %v5021_v5  ;;  %v5111_v20 = vpop.f32.mrf.mxu3 }
 0x5cc   : > { %v5343_v33 = vpop.f32.mrf.mxu0 }
 0x5cd   : > { %v5129_v48 = vadd.f32 %v11095_v19, %v5075_v26 }
 0x5cf   : > { %v5057_v41 = vpop.f32.mrf.mxu1  ;;  %8129 = vmatmul.msk.bf16.vlgmr.msra.gmra.mxu0 %vm517_vm2, %v8577_v46 }
 0x5d0   : > { %8112 = vmatmul.msk.bf16.vlgmr.msra.gmra.mxu3 %vm517_vm2, %v8575_v53  ;;  %v5076_v30 = vadd.f32 %v5057_v41, %v5022_v36 }
 0x5d2   : > { %v5071_v9 = vpop.f32.mrf.mxu2  ;;  %v5130_v11 = vadd.f32 %v5111_v20, %v5076_v30  ;;  %v8585_v30 = vld [vmem:[%s11485_s6 + $0x38] sm:$0xff] }
 0x5d3   : > { %v5219_v8 = vpop.f32.mrf.mxu3  ;;  %v5077_v53 = vadd.f32 %v5071_v9, %v5023_v28 }
 0x5d4   : > { %v11146_v37 = vpop.f32.mrf.mxu0 }
 0x5d5   : > { %v5131_v21 = vadd.f32 %v11106_v27, %v5077_v53  ;;  %v8583_v53 = vld [vmem:[%s11485_s6 + $0x28] sm:$0xff] }
 0x5d7   : > { %v5164_v4 = vpop.f32.mrf.mxu1  ;;  %8105 = vmatmul.msk.bf16.vlgmr.msrb.gmra.mxu2 %vm517_vm2, %v8574_v56 }
 0x5d8   : > { %v5183_v31 = vadd.f32 %v5164_v4, %v5128_v24 }
 0x5da   : > { %v5238_v63 = vadd.f32 %v5219_v8, %v5183_v31  ;;  %8104 = vmatmul.msk.bf16.vlgmr.msrb.gmra.mxu1 %vm517_vm2, %v8574_v56  ;;  %v5178_v1 = vpop.f32.mrf.mxu2 }
 0x5db   : > { %v5184_v45 = vadd.f32 %v5178_v1, %v5129_v48  ;;  %v5221_v34 = vpop.f32.mrf.mxu3  ;;  %6328 = vmatpush.bf16.msrb.mxu1 %v8585_v30 }
 0x5dc   : > { %v5453_v35 = vpop.f32.mrf.mxu0 }
 0x5dd   : > { %v5239_v51 = vadd.f32 %v5233_v25, %v5184_v45 }
 0x5df   : > { %v5166_v15 = vpop.f32.mrf.mxu1 }
 0x5e0   : > { %8128 = vmatmul.msk.bf16.vlgmr.msrb.gmra.mxu3 %vm517_vm2, %v8577_v46  ;;  %v5185_v16 = vadd.f32 %v5166_v15, %v5130_v11 }
 0x5e2   : > { %v5180_v58 = vpop.f32.mrf.mxu2  ;;  %v5240_v61 = vadd.f32 %v5221_v34, %v5185_v16  ;;  %v8581_v16 = vld [vmem:[%s11485_s6 + $0x18] sm:$0xff] }
 0x5e3   : > { %v5329_v19 = vpop.f32.mrf.mxu3  ;;  %v5186_v10 = vadd.f32 %v5180_v58, %v5131_v21 }
 0x5e4   : > { %v5455_v54 = vpop.f32.mrf.mxu0 }
 0x5e5   : > { %v5241_v32 = vadd.f32 %v11128_v49, %v5186_v10 }
 0x5e7   : > { %v5274_v60 = vpop.f32.mrf.mxu1  ;;  %8121 = vmatmul.msk.bf16.vlgmr.msra.gmra.mxu2 %vm517_vm2, %v8576_v59 }
 0x5e8   : > { %v5293_v39 = vadd.f32 %v5274_v60, %v5238_v63 }
 0x5ea   : > { %v5348_v12 = vadd.f32 %v5329_v19, %v5293_v39  ;;  %8120 = vmatmul.msk.bf16.vlgmr.msra.gmra.mxu1 %vm517_vm2, %v8576_v59  ;;  %v5288_v6 = vpop.f32.mrf.mxu2  ;;  %vm6324_vm2 = vcmask 1045504  }
 0x5eb   : > { %v5294_v2 = vadd.f32 %v5288_v6, %v5239_v51  ;;  %v5331_v0 = vpop.f32.mrf.mxu3 }
 0x5ec   : > { %v5563_v22 = vpop.f32.mrf.mxu0 }
 0x5ed   : > { %v5349_v29 = vadd.f32 %v5343_v33, %v5294_v2 }
 0x5ef   : > { %v5276_v18 = vpop.f32.mrf.mxu1 }
 0x5f0   : > { %v5295_v7 = vadd.f32 %v5276_v18, %v5240_v61  ;;  %v8580_v61 = vld [vmem:[%s11485_s6 + $0x10] sm:$0xff] }
 0x5f2   : > { %v5290_v52 = vpop.f32.mrf.mxu2  ;;  %v5350_v26 = vadd.f32 %v5331_v0, %v5295_v7 }
 0x5f3   : > { %v5439_v25 = vpop.f32.mrf.mxu3  ;;  %v5296_v24 = vadd.f32 %v5290_v52, %v5241_v32 }
 0x5f4   : > { %v5565_v3 = vpop.f32.mrf.mxu0 }
 0x5f5   : > { %v5351_v41 = vadd.f32 %v11146_v37, %v5296_v24 }
 0x5f7   : > { %v5384_v14 = vpop.f32.mrf.mxu1 }
 0x5f8   : > { %v5403_v42 = vadd.f32 %v5384_v14, %v5348_v12 }
 0x5fa   : > { %v5458_v50 = vadd.f32 %v5439_v25, %v5403_v42  ;;  %v5398_v5 = vpop.f32.mrf.mxu2 }
 0x5fb   : > { %v5404_v17 = vadd.f32 %v5398_v5, %v5349_v29  ;;  %v5441_v47 = vpop.f32.mrf.mxu3 }
 0x5fc   : > { %v5672_v38 = vpop.f32.mrf.mxu0 }
 0x5fd   : > { %v5459_v62 = vadd.f32 %v5453_v35, %v5404_v17 }
 0x5ff   : > { %v5386_v43 = vpop.f32.mrf.mxu1 }
 0x600   : > { %v5405_v48 = vadd.f32 %v5386_v43, %v5350_v26 }
 0x602   : > { %v5400_v40 = vpop.f32.mrf.mxu2  ;;  %v5460_v4 = vadd.f32 %v5441_v47, %v5405_v48 }
 0x603   : > { %v5549_v13 = vpop.f32.mrf.mxu3  ;;  %v5406_v8 = vadd.f32 %v5400_v40, %v5351_v41  ;;  %v8164_v41 = vld [vmem:[%s11485_s6 + $0x40] sm:$0xf] }
 0x604   : > { %v11166_v1 = vpop.f32.mrf.mxu0 }
 0x605   : > { %v5461_v49 = vadd.f32 %v5455_v54, %v5406_v8 }
 0x607   : > { %v5494_v57 = vpop.f32.mrf.mxu1 }
 0x608   : > { %v5513_v33 = vadd.f32 %v5494_v57, %v5458_v50  ;;  %v8584_v50 = vld [vmem:[%s11485_s6 + $0x30] sm:$0xff]  ;;  %v8578_v57 = vld [vmem:[%s11485_s6] sm:$0xff] }
 0x609   : > { %6329 = vmatpush.bf16.msrb.mxu1 %v8584_v50 }
 0x60a   : > { %v5568_v20 = vadd.f32 %v5549_v13, %v5513_v33  ;;  %v5508_v46 = vpop.f32.mrf.mxu2  ;;  %v8579_v13 = vld [vmem:[%s11485_s6 + $0x8] sm:$0xff] }
 0x60b   : > { %v5514_v9 = vadd.f32 %v5508_v46, %v5459_v62  ;;  %v5551_v27 = vpop.f32.mrf.mxu3 }
 0x60c   : > { %v11168_v37 = vpop.f32.mrf.mxu0 }
 0x60d   : > { %v5569_v56 = vadd.f32 %v5563_v22, %v5514_v9  ;;  %6330 = vmatpush.bf16.msrb.mxu1 %v8583_v53  ;;  %v8586_v9 = vld [vmem:[%s11485_s6 + $0x40] sm:$0x30] }
 0x60f   : > { %v5496_v31 = vpop.f32.mrf.mxu1 }
 0x610   : > { %v5515_v63 = vadd.f32 %v5496_v31, %v5460_v4 }
 0x612   : > { %v5570_v45 = vadd.f32 %v5551_v27, %v5515_v63  ;;  %v5510_v34 = vpop.f32.mrf.mxu2 }
 0x613   : > { %v5516_v51 = vadd.f32 %v5510_v34, %v5461_v49  ;;  %v5658_v35 = vpop.f32.mrf.mxu3 }
 0x614   : > { %v11170_v18 = vpop.f32.mrf.mxu0 }
 0x615   : > { %v5571_v15 = vadd.f32 %v5565_v3, %v5516_v51  ;;  %v8582_v3 = vld [vmem:[%s11485_s6 + $0x20] sm:$0xff] }
 0x616   : > { %6331 = vmatpush.bf16.msrb.mxu1 %v8582_v3 }
 0x617   : > { %v5604_v58 = vpop.f32.mrf.mxu1 }
 0x618   : > { %v5623_v19 = vadd.f32 %v5604_v58, %v5568_v20 }
 0x61a   : > { %v5677_v59 = vadd.f32 %v5658_v35, %v5623_v19  ;;  %v5618_v60 = vpop.f32.mrf.mxu2  ;;  %6332 = vmatpush.bf16.msrb.mxu1 %v8581_v16 }
 0x61b   : > { %v5624_v39 = vadd.f32 %v5618_v60, %v5569_v56  ;;  %v5660_v12 = vpop.f32.mrf.mxu3  ;;  %v8165_v56 = vor.u32 %v8586_v9, %v8164_v41  ;;  %v8188_v41 = vld [vmem:[%s11486_s7 + $0x8] sm:$0xf]  ;;  %v8588_v9 = vld [vmem:[%s11486_s7 + $0x8] sm:$0x10] }
 0x61c   : > { %v11172_v52 = vpop.f32.mrf.mxu0 }
 0x61d   : > { %v5678_v6 = vadd.f32 %v5672_v38, %v5624_v39  ;;  %v6326_v49 = vsel %vm6324_vm2, %v8165_v56, 0  ;;  %v8189_v56 = vor.u32 %v8588_v9, %v8188_v41 }
 0x61e   : > { %6333 = vmatpush.bf16.msrb.mxu1 %v8580_v61  ;;  %6349 = vmatpush.bf16.msrb.mxu2 %v6326_v49  ;;  %v8179_v49 = vld [vmem:[%s11486_s7 + $0x18] sm:$0xf] }
 0x61f   : > { %v5606_v2 = vpop.f32.mrf.mxu1 }
 0x620   : > { %v5625_v7 = vadd.f32 %v5606_v2, %v5570_v45 }
 0x622   : > { %v5620_v0 = vpop.f32.mrf.mxu2  ;;  %6334 = vmatpush.bf16.msrb.mxu1 %v8579_v13  ;;  %v5679_v33 = vadd.f32 %v5660_v12, %v5625_v7 }
 0x623   : > { %v5768_v29 = vpop.f32.mrf.mxu3  ;;  %v5626_v26 = vadd.f32 %v5620_v0, %v5571_v15 }
 0x624   : > { %v11174_v14 = vpop.f32.mrf.mxu0 }
 0x625   : > { %v5680_v4 = vadd.f32 %v11166_v1, %v5626_v26 }
 0x626   : > { %6335 = vmatpush.bf16.msrb.mxu1 %v8578_v57 }
 0x627   : > { %v5713_v54 = vpop.f32.mrf.mxu1 }
 0x628   : > { %v5732_v24 = vadd.f32 %v5713_v54, %v5677_v59 }
 0x62a   : > { %v5727_v55 = vpop.f32.mrf.mxu2  ;;  %v5787_v27 = vadd.f32 %v5768_v29, %v5732_v24 }
 0x62b   : > { %v5770_v44 = vpop.f32.mrf.mxu3  ;;  %v5733_v20 = vadd.f32 %v5727_v55, %v5678_v6 }
 0x62c   : > { %v6002_v47 = vpop.f32.mrf.mxu0 }
 0x62d   : > { %v5788_v45 = vadd.f32 %v11168_v37, %v5733_v20 }
 0x62f   : > { %v5715_v22 = vpop.f32.mrf.mxu1 }
 0x630   : > { %v5734_v8 = vadd.f32 %v5715_v22, %v5679_v33 }
 0x632   : > { %v5729_v25 = vpop.f32.mrf.mxu2  ;;  %v5789_v35 = vadd.f32 %v5770_v44, %v5734_v8 }
 0x633   : > { %v5878_v23 = vpop.f32.mrf.mxu3  ;;  %v5735_v34 = vadd.f32 %v5729_v25, %v5680_v4 }
 0x634   : > { %v6004_v10 = vpop.f32.mrf.mxu0 }
 0x635   : > { %v5790_v59 = vadd.f32 %v11170_v18, %v5735_v34  ;;  %v8201_v34 = vld [vmem:[%s11486_s7 + $0x28] sm:$0xf] }
 0x637   : > { %v5823_v36 = vpop.f32.mrf.mxu1 }
 0x638   : > { %v5842_v31 = vadd.f32 %v5823_v36, %v5787_v27  ;;  %v8894_v27 = vmov 65535  }
 0x639   : > { %v6427_v8 = vsel %vm521_vm1, 4294967295, %v8894_v27 }
 0x63a   : > { %v5837_v42 = vpop.f32.mrf.mxu2  ;;  %v5897_v58 = vadd.f32 %v5878_v23, %v5842_v31  ;;  %v11218_v4 = vsel %vm6426_vm13, %v6427_v8, 0  ;;  %v8266_v8 = vld [vmem:[%s11486_s7 + $0x78] sm:$0xf] }
 0x63b   : > { %v5880_v28 = vpop.f32.mrf.mxu3  ;;  %v5843_v15 = vadd.f32 %v5837_v42, %v5788_v45  ;;  %v6460_v31 = vand.u32 %v8189_v56, %v11218_v4  ;;  %v8590_v45 = vld [vmem:[%s11486_s7 + $0x18] sm:$0x10] }
 0x63c   : > { %v6112_v48 = vpop.f32.mrf.mxu0 }
 0x63d   : > { %v5898_v1 = vadd.f32 %v11172_v52, %v5843_v15  ;;  %6468 = vmatpush.bf16.msrb.mxu0 %v6460_v31  ;;  %v8592_v15 = vld [vmem:[%s11486_s7 + $0x28] sm:$0x10] }
 0x63f   : > { %v5825_v5 = vpop.f32.mrf.mxu1 }
 0x640   : > { %v5844_v19 = vadd.f32 %v5825_v5, %v5789_v35  ;;  %v8180_v35 = vor.u32 %v8590_v45, %v8179_v49  ;;  %v8305_v49 = vld [vmem:[%s11486_s7 + $0xa8] sm:$0xf]  ;;  %v8608_v45 = vld [vmem:[%s11486_s7 + $0xa8] sm:$0x10] }
 0x642   : > { %v5839_v17 = vpop.f32.mrf.mxu2  ;;  %v5899_v2 = vadd.f32 %v5880_v28, %v5844_v19  ;;  %v8202_v19 = vor.u32 %v8592_v15, %v8201_v34 }
 0x643   : > { %v5988_v11 = vpop.f32.mrf.mxu3  ;;  %v5845_v6 = vadd.f32 %v5839_v17, %v5790_v59  ;;  %v8240_v59 = vld [vmem:[%s11486_s7 + $0x58] sm:$0xf] }
 0x644   : > { %v6114_v12 = vpop.f32.mrf.mxu0 }
 0x645   : > { %v5900_v55 = vadd.f32 %v11174_v14, %v5845_v6  ;;  %v6496_v6 = vand.u32 %v8202_v19, %v11218_v4  ;;  %v8306_v19 = vor.u32 %v8608_v45, %v8305_v49 }
 0x647   : > { %v5933_v62 = vpop.f32.mrf.mxu1  ;;  %6504 = vmatpush.bf16.msra.mxu2 %v6496_v6  ;;  %v8603_v6 = vld [vmem:[%s11486_s7 + $0x80] sm:$0xff] }
 0x648   : > { %v5952_v39 = vadd.f32 %v5933_v62, %v5897_v58 }
 0x64a   : > { %v5947_v21 = vpop.f32.mrf.mxu2  ;;  %v6007_v54 = vadd.f32 %v5988_v11, %v5952_v39 }
 0x64b   : > { %v5990_v43 = vpop.f32.mrf.mxu3  ;;  %v5953_v29 = vadd.f32 %v5947_v21, %v5898_v1 }
 0x64c   : > { %v6222_v53 = vpop.f32.mrf.mxu0 }
 0x64d   : > { %v6008_v25 = vadd.f32 %v6002_v47, %v5953_v29  ;;  %v6236_v47 = vpop.permute.xlu2 %6235  ;;  %v8589_v29 = vld [vmem:[%s11486_s7 + $0x10] sm:$0xff] }
 0x64f   : > { %v5935_v40 = vpop.f32.mrf.mxu1 }
 0x650   : > { %v5954_v37 = vadd.f32 %v5935_v40, %v5899_v2 }
 0x652   : > { %v5949_v32 = vpop.f32.mrf.mxu2  ;;  %v6009_v30 = vadd.f32 %v5990_v43, %v5954_v37  ;;  %v6241_v43 = vpop.permute.xlu0 %6240  ;;  %v8597_v37 = vld [vmem:[%s11486_s7 + $0x50] sm:$0xff] }
 0x653   : > { %v6098_v38 = vpop.f32.mrf.mxu3  ;;  %v5955_v23 = vadd.f32 %v5949_v32, %v5900_v55 }
 0x654   : > { %v6224_v26 = vpop.f32.mrf.mxu0 }
 0x655   : > { %v6010_v52 = vadd.f32 %v6004_v10, %v5955_v23 }
 0x657   : > { %v6043_v46 = vpop.f32.mrf.mxu1 }
 0x658   : > { %v6062_v44 = vadd.f32 %v6043_v46, %v6007_v54  ;;  %v8591_v54 = vld [vmem:[%s11486_s7 + $0x20] sm:$0xff] }
 0x659   : > { %6505 = vmatpush.bf16.msra.mxu2 %v8591_v54 }
 0x65a   : > { %v6057_v63 = vpop.f32.mrf.mxu2  ;;  %v6117_v42 = vadd.f32 %v6098_v38, %v6062_v44  ;;  %v8227_v44 = vld [vmem:[%s11486_s7 + $0x48] sm:$0xf] }
 0x65b   : > { %v6100_v51 = vpop.f32.mrf.mxu3  ;;  %v6063_v18 = vadd.f32 %v6057_v63, %v6008_v25  ;;  %v8596_v25 = vld [vmem:[%s11486_s7 + $0x48] sm:$0x10] }
 0x65d   : > { %v6118_v28 = vadd.f32 %v6112_v48, %v6063_v18 }
 0x65f   : > { %v6045_v60 = vpop.f32.mrf.mxu1 }
 0x660   : > { %v6064_v50 = vadd.f32 %v6045_v60, %v6009_v30  ;;  %v8598_v60 = vld [vmem:[%s11486_s7 + $0x58] sm:$0x10] }
 0x661   : > { %v8241_v1 = vor.u32 %v8598_v60, %v8240_v59  ;;  %v8344_v59 = vld [vmem:[%s11486_s7 + $0xd8] sm:$0xf]  ;;  %v8614_v60 = vld [vmem:[%s11486_s7 + $0xd8] sm:$0x10] }
 0x662   : > { %v6059_v0 = vpop.f32.mrf.mxu2  ;;  %v6119_v62 = vadd.f32 %v6100_v51, %v6064_v50  ;;  %v8587_v51 = vld [vmem:[%s11486_s7] sm:$0xff]  ;;  %v8214_v50 = vld [vmem:[%s11486_s7 + $0x38] sm:$0xf] }
 0x663   : > { %v6208_v22 = vpop.f32.mrf.mxu3  ;;  %v6065_v3 = vadd.f32 %v6059_v0, %v6010_v52  ;;  %6469 = vmatpush.bf16.msrb.mxu0 %v8587_v51  ;;  %v6607_v0 = vand.u32 %v8241_v1, %v11218_v4  ;;  %v8253_v52 = vld [vmem:[%s11486_s7 + $0x68] sm:$0xf] }
 0x665   : > { %v6120_v40 = vadd.f32 %v6114_v12, %v6065_v3  ;;  %v6430_v12 = vand.u32 %v8180_v35, %v11218_v4  ;;  %6615 = vmatpush.bf16.msra.mxu1 %v6607_v0  ;;  %v8600_v3 = vld [vmem:[%s11486_s7 + $0x68] sm:$0x10] }
 0x667   : > { %v6153_v36 = vpop.f32.mrf.mxu1  ;;  %6438 = vmatpush.bf16.msra.mxu3 %v6430_v12 }
 0x668   : > { %v6172_v17 = vadd.f32 %v6153_v36, %v6117_v42  ;;  %v8228_v36 = vor.u32 %v8596_v25, %v8227_v44 }
 0x669   : > { %6616 = vmatpush.bf16.msra.mxu1 %v8597_v37 }
 0x66a   : > { %v6167_v5 = vpop.f32.mrf.mxu2  ;;  %v6227_v14 = vadd.f32 %v6208_v22, %v6172_v17  ;;  %v6570_v42 = vand.u32 %v8228_v36, %v11218_v4  ;;  %v8595_v17 = vld [vmem:[%s11486_s7 + $0x40] sm:$0xff] }
 0x66b   : > { %v6173_v11 = vadd.f32 %v6167_v5, %v6118_v28  ;;  %v6210_v21 = vpop.f32.mrf.mxu3  ;;  %6439 = vmatpush.bf16.msra.mxu3 %v8589_v29 }
 0x66c   : > { %v6243_v24 = vadd.f32 %v6236_v47, %v6227_v14  ;;  %6578 = vmatpush.bf16.msra.mxu0 %v6570_v42 }
 0x66d   : > { %v6228_v32 = vadd.f32 %v6222_v53, %v6173_v11  ;;  %v8594_v53 = vld [vmem:[%s11486_s7 + $0x38] sm:$0x10]  ;;  %v8254_v11 = vor.u32 %v8600_v3, %v8253_v52  ;;  %v8613_v52 = vld [vmem:[%s11486_s7 + $0xd0] sm:$0xff]  ;;  %v8318_v3 = vld [vmem:[%s11486_s7 + $0xb8] sm:$0xf] }
 0x66e   : > { %v8215_v28 = vor.u32 %v8594_v53, %v8214_v50  ;;  %v8607_v50 = vld [vmem:[%s11486_s7 + $0xa0] sm:$0xff]  ;;  %v8612_v53 = vld [vmem:[%s11486_s7 + $0xc8] sm:$0x10] }
 0x66f   : > { %v6155_v16 = vpop.f32.mrf.mxu1  ;;  %v6244_v48 = vadd.f32 %v6236_v47, %v6228_v32  ;;  %v6644_v14 = vand.u32 %v8254_v11, %v11218_v4  ;;  %v8357_v11 = vld [vmem:[%s11486_s7 + $0xe8] sm:$0xf] }
 0x670   : > { %v6174_v61 = vadd.f32 %v6155_v16, %v6119_v62  ;;  %v6533_v62 = vand.u32 %v8215_v28, %v11218_v4  ;;  %v8292_v16 = vld [vmem:[%s11486_s7 + $0x98] sm:$0xf]  ;;  %6579 = vmatpush.bf16.msra.mxu0 %v8595_v17 }
 0x672   : > { %v6229_v13 = vadd.f32 %v6210_v21, %v6174_v61  ;;  %v6169_v7 = vpop.f32.mrf.mxu2  ;;  %v8606_v21 = vld [vmem:[%s11486_s7 + $0x98] sm:$0x10]  ;;  %6541 = vmatpush.bf16.msrb.mxu3 %v6533_v62 }
 0x673   : > { %v6175_v38 = vadd.f32 %v6169_v7, %v6120_v40  ;;  %v8293_v61 = vor.u32 %v8606_v21, %v8292_v16  ;;  %v8593_v40 = vld [vmem:[%s11486_s7 + $0x30] sm:$0xff]  ;;  %v8599_v7 = vld [vmem:[%s11486_s7 + $0x60] sm:$0xff]  ;;  %v8610_v62 = vld [vmem:[%s11486_s7 + $0xb8] sm:$0x10] }
 0x674   : > { %v6245_v57 = vadd.f32 %v6241_v43, %v6229_v13  ;;  %v8616_v16 = vld [vmem:[%s11486_s7 + $0xe8] sm:$0x10] }
 0x675   : > { %v6230_v10 = vadd.f32 %v6224_v26, %v6175_v38  ;;  %v6759_v13 = vand.u32 %v8293_v61, %v11218_v4 }
 0x676   : > { %v6247_v33 = vpack.c.bf16 %v6245_v57, %v6243_v24  ;;  %6542 = vmatpush.bf16.msrb.mxu3 %v8593_v40  ;;  %v8605_v24 = vld [vmem:[%s11486_s7 + $0x90] sm:$0xff]  ;;  %v8319_v40 = vor.u32 %v8610_v62, %v8318_v3 }
 0x677   : > { %v6246_v20 = vadd.f32 %v6241_v43, %v6230_v10  ;;  %v8625_v3 = vld [vmem:[%s11488_s9 + $0x30] sm:$0xff] }
 0x678   : > { %6336 = vmatmul.bf16.vlgmr.msrb.gmra.mxu1 %v6247_v33  ;;  %v8279_v33 = vld [vmem:[%s11486_s7 + $0x88] sm:$0xf] }
 0x679   : > { %v6248_v46 = vpack.c.bf16 %v6246_v20, %v6244_v48  ;;  %6767 = vmatpush.bf16.msrb.mxu1 %v6759_v13  ;;  %v8604_v48 = vld [vmem:[%s11486_s7 + $0x88] sm:$0x10]  ;;  %v8611_v13 = vld [vmem:[%s11486_s7 + $0xc0] sm:$0xff] }
 0x67b   : > { %8166 = vmatmul.msk.bf16.vlgmr.msrb.gmra.mxu2 %vm6320_vm12, %v6248_v46  ;;  %v8280_v46 = vor.u32 %v8604_v48, %v8279_v33  ;;  %v8370_v33 = vld [vmem:[%s11486_s7 + $0xf8] sm:$0xf]  ;;  %v8618_v48 = vld [vmem:[%s11486_s7 + $0xf8] sm:$0x10] }
 0x67c   : > { %6652 = vmatpush.bf16.msrb.mxu2 %v6644_v14 }
 0x67d   : > { %6768 = vmatpush.bf16.msrb.mxu1 %v8605_v24  ;;  %v6717_v51 = vand.u32 %v8280_v46, %v11218_v4 }
 0x680   : > { %6653 = vmatpush.bf16.msrb.mxu2 %v8599_v7 }
 0x6f5   : > { %v6337_v63 = vpop.f32.mrf.mxu1 }
 0x6fd   : > { %v6339_v55 = vpop.f32.mrf.mxu1 }
 0x6fe   : > { %v6351_v58 = vpop.f32.mrf.mxu2 }
 0x6ff   : > { %v6352_v39 = vadd.f32 %v6351_v58, %v6337_v63  ;;  %v8602_v63 = vld [vmem:[%s11486_s7 + $0x78] sm:$0x10] }
 0x700   : > { %v8267_v58 = vor.u32 %v8602_v63, %v8266_v8  ;;  %v8617_v8 = vld [vmem:[%s11486_s7 + $0xf0] sm:$0xff] }
 0x701   : > { %v8167_v2 = vmul.f32 -1.442695, %v6352_v39 }
 0x702   : > { %v6681_v37 = vand.u32 %v8267_v58, %v11218_v4 }
 0x703   : > { %8738 = vpow2.f32 %v8167_v2  ;;  %v8345_v2 = vor.u32 %v8614_v60, %v8344_v59 }
 0x705   : > { %v6907_v36 = vand.u32 %v8345_v2, %v11218_v4 }
 0x706   : > { %v6353_v22 = vpop.f32.mrf.mxu2 }
 0x707   : > { %v6354_v23 = vadd.f32 %v6353_v22, %v6339_v55  ;;  %v6796_v55 = vand.u32 %v8306_v19, %v11218_v4 }
 0x709   : > { %v8739_v30 = vpop.eup %8738  ;;  %v8168_v18 = vmul.f32 -1.442695, %v6354_v23 }
 0x70a   : > { %v6362_v5 = vadd.f32 1.0, %v8739_v30 }
 0x70b   : > { %8740 = vpow2.f32 %v8168_v18  ;;  %v8601_v18 = vld [vmem:[%s11486_s7 + $0x70] sm:$0xff] }
 0x70c   : > { %8742 = vrcp.f32 %v6362_v5  ;;  %v6373_v26 = vand.u32 2147483647, %v6362_v5  ;;  %v6375_v10 = vand.u32 2147483648, %v6362_v5  ;;  %vm6369_vm14 = vweird.f32 %v6362_v5 }
 0x70e   : > { %vm6374_vm6 = vcmp.eq.f32.partialorder %v6373_v26, 8.507059e+37  ;;  %v6376_v27 = vor.u32 1.1754944e-38, %v6375_v10  ;;  %v8609_v26 = vld [vmem:[%s11486_s7 + $0xb0] sm:$0xff]  ;;  %v8615_v10 = vld [vmem:[%s11486_s7 + $0xe0] sm:$0xff] }
 0x711   : > { %v8741_v47 = vpop.eup %8740 }
 0x712   : > { %v8743_v43 = vpop.eup %8742  ;;  %v6363_v32 = vadd.f32 1.0, %v8741_v47  ;;  %v8358_v47 = vor.u32 %v8616_v16, %v8357_v11  ;;  %v8624_v16 = vld [vmem:[%s11488_s9 + $0x28] sm:$0xff] }
 0x713   : > { %v6365_v38 = vmul.f32 %v8743_v43, %v6362_v5  ;;  %vm6370_vm1 = vweird.f32 %v8743_v43  ;;  %v8331_v5 = vld [vmem:[%s11486_s7 + $0xc8] sm:$0xf] }
 0x714   : > { %8744 = vrcp.f32 %v6363_v32  ;;  %vm6371_vm15 = vmor %vm6369_vm14, %vm6370_vm1  ;;  %v6390_v1 = vand.u32 2147483648, %v6363_v32  ;;  %vm6384_vm9 = vweird.f32 %v6363_v32  ;;  %v6388_v29 = vand.u32 2147483647, %v6363_v32 }
 0x715   : > { %v6366_v57 = vsub.f32 1.0, %v6365_v38  ;;  %v8332_v17 = vor.u32 %v8612_v53, %v8331_v5  ;;  %v8626_v53 = vld [vmem:[%s11488_s9 + $0x38] sm:$0xff] }
 0x716   : > { %v6391_v23 = vor.u32 1.1754944e-38, %v6390_v1  ;;  %vm6389_vm0 = vcmp.eq.f32.partialorder %v6388_v29, 8.507059e+37 }
 0x717   : > { %v6367_v20 = vmul.f32 %v8743_v43, %v6366_v57  ;;  %v6870_v21 = vand.u32 %v8332_v17, %v11218_v4 }
 0x719   : > { %v6368_v41 = vadd.f32 %v8743_v43, %v6367_v20  ;;  %v8371_v20 = vor.u32 %v8618_v48, %v8370_v33  ;;  %v6997_v48 = vld [vmem:[%s11487_s8] sm:$0x1] }
 0x71a   : > { %v8745_v9 = vpop.eup %8744 }
 0x71b   : > { %v6372_v56 = vsel %vm6371_vm15, %v8743_v43, %v6368_v41  ;;  %v6380_v31 = vmul.f32 %v8745_v9, %v6363_v32  ;;  %vm6385_vm8 = vweird.f32 %v8745_v9  ;;  %v6833_v43 = vand.u32 %v8319_v40, %v11218_v4  ;;  %v8623_v40 = vld [vmem:[%s11488_s9 + $0x20] sm:$0xff] }
 0x71c   : > { %v6377_v34 = vsel %vm6374_vm6, %v6376_v27, %v6372_v56  ;;  %vm6386_vm10 = vmor %vm6384_vm9, %vm6385_vm8  ;;  %v6944_v32 = vand.u32 %v8358_v47, %v11218_v4  ;;  %v6981_v46 = vand.u32 %v8371_v20, %v11218_v4 }
 0x71d   : > { %v6381_v35 = vsub.f32 1.0, %v6380_v31  ;;  %v6394_v15 = vpack.c.bf16 %v6377_v34, %v6377_v34 }
 0x71f   : > { %v6382_v39 = vmul.f32 %v8745_v9, %v6381_v35  ;;  %v6406_v12 = vunpack.c.l.b16 %v6394_v15  ;;  %8190 = vmatmul.msk.bf16.vlgmr.msrb.gmra.mxu0 %vm6422_vm7, %v6394_v15 }
 0x720   : > { %6725 = vmatpush.bf16.msrb.mxu0 %v6717_v51 }
 0x721   : > { %v6383_v0 = vadd.f32 %v8745_v9, %v6382_v39  ;;  %v6407_v54 = vpack.c.b16 %v6406_v12, %v6406_v12 }
 0x723   : > { %v6387_v22 = vsel %vm6386_vm10, %v8745_v9, %v6383_v0  ;;  %v6409_v44 = vshrl.u32 %v6407_v54, 16  ;;  %v6480_v25 = vrot.slane %v6407_v54, 1  ;;  %v6554_v61 = vrot.slane %v6407_v54, 2 }
 0x724   : > { %6726 = vmatpush.bf16.msrb.mxu0 %v8603_v6  ;;  %v6392_v42 = vsel %vm6389_vm0, %v6391_v23, %v6387_v22  ;;  %v6628_v24 = vrot.slane %v6407_v54, 3 }
 0x725   : > { %8181 = vmatmul.msk.bf16.vlgmr.msra.gmra.mxu3 %vm6422_vm7, %v6409_v44  ;;  %8203 = vmatmul.msk.bf16.vlgmr.msra.gmra.mxu2 %vm6422_vm7, %v6480_v25  ;;  %v6591_v30 = vrot.slane %v6409_v44, 2  ;;  %v6395_v28 = vpack.c.bf16 %v6392_v42, %v6392_v42  ;;  %v6517_v38 = vrot.slane %v6409_v44, 1  ;;  %v6665_v41 = vrot.slane %v6409_v44, 3 }
 0x726   : > { %6689 = vmatpush.bf16.msra.mxu3 %v6681_v37  ;;  %6804 = vmatpush.bf16.msra.mxu2 %v6796_v55 }
 0x727   : > { %8242 = vmatmul.msk.bf16.vlgmr.msra.gmra.mxu1 %vm6422_vm7, %v6591_v30  ;;  %v6739_v14 = vunpack.c.l.b16 %v6395_v28 }
 0x728   : > { %6915 = vmatpush.bf16.msra.mxu1 %v6907_v36 }
 0x729   : > { %v6740_v7 = vpack.c.b16 %v6739_v14, %v6739_v14 }
 0x72a   : > { %6690 = vmatpush.bf16.msra.mxu3 %v8601_v18  ;;  %6805 = vmatpush.bf16.msra.mxu2 %v8607_v50 }
 0x72b   : > { %v6742_v57 = vshrl.u32 %v6740_v7, 16  ;;  %v6780_v9 = vrot.slane %v6740_v7, 1  ;;  %v6854_v56 = vrot.slane %v6740_v7, 2  ;;  %v6928_v4 = vrot.slane %v6740_v7, 3 }
 0x72c   : > { %6916 = vmatpush.bf16.msra.mxu1 %v8613_v52 }
 0x72d   : > { %v6891_v27 = vrot.slane %v6742_v57, 2  ;;  %v6817_v31 = vrot.slane %v6742_v57, 1  ;;  %v6965_v63 = vrot.slane %v6742_v57, 3 }
 0x72f   : > { %8229 = vmatmul.msk.bf16.vlgmr.msra.gmra.mxu0 %vm6422_vm7, %v6554_v61 }
 0x730   : > { %6878 = vmatpush.bf16.msra.mxu0 %v6870_v21 }
 0x734   : > { %6879 = vmatpush.bf16.msra.mxu0 %v8611_v13  ;;  %v8622_v13 = vld [vmem:[%s11488_s9 + $0x18] sm:$0xff] }
 0x735   : > { %8216 = vmatmul.msk.bf16.vlgmr.msrb.gmra.mxu3 %vm6422_vm7, %v6517_v38  ;;  %8255 = vmatmul.msk.bf16.vlgmr.msrb.gmra.mxu2 %vm6422_vm7, %v6628_v24  ;;  %v8621_v38 = vld [vmem:[%s11488_s9 + $0x10] sm:$0xff] }
 0x736   : > { %6841 = vmatpush.bf16.msrb.mxu3 %v6833_v43  ;;  %6952 = vmatpush.bf16.msrb.mxu2 %v6944_v32 }
 0x737   : > { %8294 = vmatmul.msk.bf16.vlgmr.msrb.gmra.mxu1 %vm6422_vm7, %v6742_v57  ;;  %v8620_v57 = vld [vmem:[%s11488_s9 + $0x8] sm:$0xff] }
 0x73a   : > { %6842 = vmatpush.bf16.msrb.mxu3 %v8609_v26  ;;  %6953 = vmatpush.bf16.msrb.mxu2 %v8615_v10  ;;  %v8619_v10 = vld [vmem:[%s11488_s9] sm:$0xff] }
 0x73f   : > { %8281 = vmatmul.msk.bf16.vlgmr.msrb.gmra.mxu0 %vm6422_vm7, %v6395_v28 }
 0x740   : > { %7084 = vmatpush.bf16.msrb.mxu0 %v8626_v53 }
 0x744   : > { %7085 = vmatpush.bf16.msrb.mxu0 %v8625_v3 }
 0x745   : > { %8268 = vmatmul.msk.bf16.vlgmr.msra.gmra.mxu3 %vm6422_vm7, %v6665_v41  ;;  %8307 = vmatmul.msk.bf16.vlgmr.msra.gmra.mxu2 %vm6422_vm7, %v6780_v9 }
 0x746   : > { %6989 = vmatpush.bf16.msra.mxu3 %v6981_v46 }
 0x747   : > { %8346 = vmatmul.msk.bf16.vlgmr.msra.gmra.mxu1 %vm6422_vm7, %v6891_v27 }
 0x748   : > { %7086 = vmatpush.bf16.msrb.mxu0 %v8624_v16 }
 0x74a   : > { %6990 = vmatpush.bf16.msra.mxu3 %v8617_v8 }
 0x74c   : > { %7087 = vmatpush.bf16.msrb.mxu0 %v8623_v40 }
 0x74f   : > { %8333 = vmatmul.msk.bf16.vlgmr.msra.gmra.mxu0 %vm6422_vm7, %v6854_v56 }
 0x750   : > { %7088 = vmatpush.bf16.msrb.mxu0 %v8622_v13 }
 0x754   : > { %7089 = vmatpush.bf16.msrb.mxu0 %v8621_v38 }
 0x755   : > { %8320 = vmatmul.msk.bf16.vlgmr.msrb.gmra.mxu3 %vm6422_vm7, %v6817_v31  ;;  %8359 = vmatmul.msk.bf16.vlgmr.msrb.gmra.mxu2 %vm6422_vm7, %v6928_v4 }
 0x758   : > { %7090 = vmatpush.bf16.msrb.mxu0 %v8620_v57 }
 0x75c   : > { %7091 = vmatpush.bf16.msrb.mxu0 %v8619_v10 }
 0x765   : > { %8372 = vmatmul.msk.bf16.vlgmr.msra.gmra.mxu3 %vm6422_vm7, %v6965_v63 }
 0x79c   : > { %v6471_v49 = vpop.f32.mrf.mxu0 }
 0x7a4   : > { %v6473_v45 = vpop.f32.mrf.mxu0  ;;  %v6618_v34 = vpop.f32.mrf.mxu1 }
 0x7a8   : > { %v6441_v51 = vpop.f32.mrf.mxu3  ;;  %v6507_v35 = vpop.f32.mrf.mxu2 }
 0x7a9   : > { %v6472_v6 = vadd.f32 %v6471_v49, %v6441_v51 }
 0x7ab   : > { %v6511_v29 = vadd.f32 %v6507_v35, %v6472_v6  ;;  %v8628_v6 = vld [vmem:[%s11490_s11 + $0x8] sm:$0xff] }
 0x7ac   : > { %v6581_v15 = vpop.f32.mrf.mxu0  ;;  %v6620_v58 = vpop.f32.mrf.mxu1 }
 0x7b0   : > { %v6443_v19 = vpop.f32.mrf.mxu3  ;;  %v6509_v59 = vpop.f32.mrf.mxu2 }
 0x7b1   : > { %v8634_v19 = vld [vmem:[%s11490_s11 + $0x38] sm:$0xff]  ;;  %v8633_v59 = vld [vmem:[%s11490_s11 + $0x30] sm:$0xff] }
 0x7b2   : > { %7182 = vmatpush.bf16.msrb.mxu1 %v8634_v19 }
 0x7b4   : > { %v6583_v60 = vpop.f32.mrf.mxu0  ;;  %v6770_v39 = vpop.f32.mrf.mxu1 }
 0x7b5   : > { %v8632_v60 = vld [vmem:[%s11490_s11 + $0x28] sm:$0xff] }
 0x7b6   : > { %7183 = vmatpush.bf16.msrb.mxu1 %v8633_v59 }
 0x7b8   : > { %v6544_v12 = vpop.f32.mrf.mxu3  ;;  %v6655_v1 = vpop.f32.mrf.mxu2 }
 0x7b9   : > { %v6548_v54 = vadd.f32 %v6544_v12, %v6511_v29  ;;  %v8630_v12 = vld [vmem:[%s11490_s11 + $0x18] sm:$0xff] }
 0x7ba   : > { %7184 = vmatpush.bf16.msrb.mxu1 %v8632_v60 }
 0x7bb   : > { %v6585_v22 = vadd.f32 %v6581_v15, %v6548_v54 }
 0x7bc   : > { %v6728_v2 = vpop.f32.mrf.mxu0  ;;  %v6772_v0 = vpop.f32.mrf.mxu1 }
 0x7bd   : > { %v6622_v23 = vadd.f32 %v6618_v34, %v6585_v22  ;;  %v7035_v0 = vld [vmem:[%s11489_s10] sm:$0x1] }
 0x7bf   : > { %v6659_v18 = vadd.f32 %v6655_v1, %v6622_v23  ;;  %v8629_v1 = vld [vmem:[%s11490_s11 + $0x10] sm:$0xff] }
 0x7c0   : > { %v6546_v37 = vpop.f32.mrf.mxu3  ;;  %v6657_v55 = vpop.f32.mrf.mxu2 }
 0x7c4   : > { %v6730_v44 = vpop.f32.mrf.mxu0  ;;  %v6918_v25 = vpop.f32.mrf.mxu1 }
 0x7c8   : > { %v6692_v36 = vpop.f32.mrf.mxu3  ;;  %v6807_v30 = vpop.f32.mrf.mxu2 }
 0x7c9   : > { %v6696_v5 = vadd.f32 %v6692_v36, %v6659_v18 }
 0x7cb   : > { %v6732_v28 = vadd.f32 %v6728_v2, %v6696_v5  ;;  %v8627_v2 = vld [vmem:[%s11490_s11] sm:$0xff] }
 0x7cc   : > { %v6881_v42 = vpop.f32.mrf.mxu0  ;;  %v6920_v50 = vpop.f32.mrf.mxu1 }
 0x7cd   : > { %v6774_v11 = vadd.f32 %v6770_v39, %v6732_v28  ;;  %v8631_v39 = vld [vmem:[%s11490_s11 + $0x20] sm:$0xff] }
 0x7ce   : > { %7185 = vmatpush.bf16.msrb.mxu1 %v8631_v39  ;;  %v7133_v28 = vld [vmem:[%s11491_s12] sm:$0x1] }
 0x7cf   : > { %v6811_v61 = vadd.f32 %v6807_v30, %v6774_v11 }
 0x7d0   : > { %v6694_v52 = vpop.f32.mrf.mxu3  ;;  %v6809_v17 = vpop.f32.mrf.mxu2 }
 0x7d2   : > { %7186 = vmatpush.bf16.msrb.mxu1 %v8630_v12 }
 0x7d4   : > { %v6883_v62 = vpop.f32.mrf.mxu0 }
 0x7d6   : > { %7187 = vmatpush.bf16.msrb.mxu1 %v8629_v1 }
 0x7d8   : > { %v6844_v21 = vpop.f32.mrf.mxu3  ;;  %v6955_v14 = vpop.f32.mrf.mxu2 }
 0x7d9   : > { %v6848_v47 = vadd.f32 %v6844_v21, %v6811_v61 }
 0x7da   : > { %7188 = vmatpush.bf16.msrb.mxu1 %v8628_v6 }
 0x7db   : > { %v6885_v7 = vadd.f32 %v6881_v42, %v6848_v47 }
 0x7dd   : > { %v6922_v24 = vadd.f32 %v6918_v25, %v6885_v7 }
 0x7de   : > { %7189 = vmatpush.bf16.msrb.mxu1 %v8627_v2 }
 0x7df   : > { %v6959_v26 = vadd.f32 %v6955_v14, %v6922_v24 }
 0x7e0   : > { %v6846_v43 = vpop.f32.mrf.mxu3  ;;  %v6957_v32 = vpop.f32.mrf.mxu2 }
 0x7e8   : > { %v6992_v33 = vpop.f32.mrf.mxu3 }
 0x7e9   : > { %v6996_v20 = vadd.f32 %v6992_v33, %v6959_v26 }
 0x7eb   : > { %v6998_v46 = vadd.f32 %v6997_v48, %v6996_v20 }
 0x7ed   : > { %v8373_v41 = vmul.f32 -1.442695, %v6998_v46 }
 0x7ef   : > { %8746 = vpow2.f32 %v8373_v41 }
 0x7f0   : > { %v6994_v9 = vpop.f32.mrf.mxu3 }
 0x7f5   : > { %v8747_v27 = vpop.eup %8746 }
 0x7f6   : > { %v7002_v8 = vadd.f32 1.0, %v8747_v27 }
 0x7f8   : > { %8748 = vrcp.f32 %v7002_v8  ;;  %v7014_v63 = vand.u32 2147483648, %v7002_v8  ;;  %v7012_v45 = vand.u32 2147483647, %v7002_v8  ;;  %vm7008_vm4 = vweird.f32 %v7002_v8 }
 0x7fa   : > { %v7015_v51 = vor.u32 1.1754944e-38, %v7014_v63  ;;  %vm7013_vm11 = vcmp.eq.f32.partialorder %v7012_v45, 8.507059e+37 }
 0x7fe   : > { %v8749_v56 = vpop.eup %8748 }
 0x7ff   : > { %v7004_v31 = vmul.f32 %v8749_v56, %v7002_v8  ;;  %vm7009_vm3 = vweird.f32 %v8749_v56 }
 0x800   : > { %vm7010_vm5 = vmor %vm7008_vm4, %vm7009_vm3 }
 0x801   : > { %v7005_v4 = vsub.f32 1.0, %v7004_v31 }
 0x803   : > { %v7006_v49 = vmul.f32 %v8749_v56, %v7005_v4 }
 0x805   : > { %v7007_v34 = vadd.f32 %v8749_v56, %v7006_v49 }
 0x807   : > { %v7011_v35 = vsel %vm7010_vm5, %v8749_v56, %v7007_v34 }
 0x808   : > { %v7016_v15 = vsel %vm7013_vm11, %v7015_v51, %v7011_v35 }
 0x809   : > { %v7018_v58 = vpack.c.bf16 %v7016_v15, %v7016_v15 }
 0x80b   : > { %7092 = vmatmul.bf16.vlgmr.msrb.gmra.mxu0 %v7018_v58 }
 0x888   : > { %v7093_v29 = vpop.f32.mrf.mxu0 }
 0x889   : > { %v7094_v54 = vadd.f32 %v7093_v29, %v7035_v0 }
 0x88b   : > { %v8406_v37 = vmul.f32 -1.442695, %v7094_v54 }
 0x88d   : > { %8750 = vpow2.f32 %v8406_v37 }
 0x890   : > { %v7095_v55 = vpop.f32.mrf.mxu0 }
 0x893   : > { %v8751_v22 = vpop.eup %8750 }
 0x894   : > { %v7100_v44 = vadd.f32 1.0, %v8751_v22 }
 0x896   : > { %8752 = vrcp.f32 %v7100_v44  ;;  %v7112_v30 = vand.u32 2147483648, %v7100_v44  ;;  %v7110_v42 = vand.u32 2147483647, %v7100_v44  ;;  %vm7106_vm12 = vweird.f32 %v7100_v44 }
 0x898   : > { %v7113_v5 = vor.u32 1.1754944e-38, %v7112_v30  ;;  %vm7111_vm1 = vcmp.eq.f32.partialorder %v7110_v42, 8.507059e+37 }
 0x89c   : > { %v8753_v25 = vpop.eup %8752 }
 0x89d   : > { %v7102_v23 = vmul.f32 %v8753_v25, %v7100_v44  ;;  %vm7107_vm2 = vweird.f32 %v8753_v25 }
 0x89e   : > { %vm7108_vm13 = vmor %vm7106_vm12, %vm7107_vm2 }
 0x89f   : > { %v7103_v36 = vsub.f32 1.0, %v7102_v23 }
 0x8a1   : > { %v7104_v18 = vmul.f32 %v8753_v25, %v7103_v36 }
 0x8a3   : > { %v7105_v50 = vadd.f32 %v8753_v25, %v7104_v18 }
 0x8a5   : > { %v7109_v53 = vsel %vm7108_vm13, %v8753_v25, %v7105_v50 }
 0x8a6   : > { %v7114_v52 = vsel %vm7111_vm1, %v7113_v5, %v7109_v53 }
 0x8a7   : > { %v7116_v17 = vpack.c.bf16 %v7114_v52, %v7114_v52 }
 0x8a9   : > { %7190 = vmatmul.bf16.vlgmr.msrb.gmra.mxu1 %v7116_v17 }
 0x926   : > { %v7191_v3 = vpop.f32.mrf.mxu1 }
 0x927   : > { %v7192_v62 = vadd.f32 %v7191_v3, %v7133_v28 }
 0x929   : > { %7195 = vst [vmem:[%s449_s0] sm:$0x1] %v7192_v62 }
 0x92a   : > { %8811 = shalt.err (!%p8808_p8)
}
 0x92b   : > { %8640 = dma.vmem_to_hbm [thread:$0]  (%p9003_p5), %s7208_s30, 16, %s7210_s24, %s7197_s15  }
 0x92e   : > { %v7193_v11 = vpop.f32.mrf.mxu1 }
 0x92f PF: > { %p8652_p9 = scmp.ge.s32.totalorder %s8850_s28, 2  ;;  %s7221_s16 = sand.u32 1, %s8838_s25  }
 0x930   : > { %s7222_s3 = scalar_lea.sflag [#allocation4], %s7221_s16 }
 0x931   : > { %p8647_p10 = pnand %p8652_p9, %p9007_p6 }
 0x933   : > { %p8648_p11 = pneg %p8647_p10 }
 0x935   : > { %8833 = dma.done.wait (%p8648_p11), %s7222_s3, 16  }
 0x936   : > { %8835 = vsyncadd (%p8648_p11), %s7222_s3, 4294967280  ;;  %p24_p12 = scmp.ge.s32.totalorder %s8990_s14, 4   ;;  %s11548_s25 = smov %s8842_s26 }
 0x937   : > { %s11549_s26 = smov %s8846_s27  ;;  %s11550_s27 = smov %s9001_s17 }
 0x938   : > { %s11551_s28 = smov %s8990_s14  ;;  %26 = sbr.rel (!%p24_p12) target bundleno = 9 (0x9), region = 175 }
 0x93d   :  { %7227 = vsyncpa [#allocation3], 1 }
 0x93e   :  { %7229 = vsyncpa [#allocation3 + $0x1], 1 }
 0x93f   :  { %7230 = vsyncpa [#allocation4], 1 }
 0x940   :  { %7232 = vsyncpa [#allocation4 + $0x1], 1 }

</bundles_post_ra>
